<compile_context>
chip_gen: v7x
topology: tpu7x:2x2x1
jax: 0.10.0
libtpu: 0.0.40
codegen_flags: <defaults>
</compile_context>

<pallas_src>
import functools

import jax
import jax.numpy as jnp
from jax.experimental import pallas as pl
from jax.experimental.pallas import tpu as pltpu

_LANE = 128
_EPS = 1e-5
_VMEM_LIMIT = 48 * 1024 * 1024     # > v5e 16MiB default, < v7x 64MiB physical


def _round_up(v, m):
    return (v + m - 1) // m * m


def _pick_tile(m, want):
    """Largest multiple of 8 <= want that divides m (so no row padding/masks)."""
    t = min(want, m)
    t -= t % 8
    while t >= 64:
        if m % t == 0:
            return t
        t -= 8
    return None


# ----------------------------------------------------------------------------
# In-kernel helpers: per-tile partial stats written to a (4, C) block.
# rows = [sum, sum_sq, min, max].
# ----------------------------------------------------------------------------
def _write_stats(stats_ref, y, mask):
    if mask is None:
        y0, ylo, yhi = y, y, y
    else:
        y0 = jnp.where(mask, y, 0.0)
        ylo = jnp.where(mask, y, jnp.inf)
        yhi = jnp.where(mask, y, -jnp.inf)
    stats_ref[0:1, :] = jnp.sum(y0, axis=0, keepdims=True)
    stats_ref[1:2, :] = jnp.sum(y0 * y0, axis=0, keepdims=True)
    stats_ref[2:3, :] = jnp.min(ylo, axis=0, keepdims=True)
    stats_ref[3:4, :] = jnp.max(yhi, axis=0, keepdims=True)


def _row_mask(i, tile_m, rows_valid):
    row = i * tile_m + jax.lax.broadcasted_iota(jnp.int32, (tile_m, 1), 0)
    return row < rows_valid


def _write_stats_maybe_masked(stats_ref, y, i, tile_m, rows_valid):
    """Unmasked fast path; masking only on the (statically known) partial last tile."""
    if rows_valid is None:
        _write_stats(stats_ref, y, None)
    else:
        last = pl.num_programs(0) - 1

        @pl.when(i != last)
        def _():
            _write_stats(stats_ref, y, None)

        @pl.when(i == last)
        def _():
            _write_stats(stats_ref, y, _row_mask(i, tile_m, rows_valid))


# ----------------------------------------------------------------------------
# Pallas kernels
# ----------------------------------------------------------------------------
def _mm_stats_kernel(x_ref, w_ref, y_ref, stats_ref, *, tile_m, rows_valid):
    """1x1 conv (matmul) tile + per-tile BN/quant statistics (bf16 in/out)."""
    i = pl.program_id(0)
    y = jnp.dot(x_ref[...], w_ref[...], preferred_element_type=jnp.float32)
    y_ref[...] = y.astype(jnp.bfloat16)
    _write_stats_maybe_masked(stats_ref, y, i, tile_m, rows_valid)


def _bnq_mm_stats_kernel(y_ref, a_ref, b_ref, w_ref, o_ref, stats_ref, *,
                         tile_m, rows_valid):
    """Previous-stage BN + fake-quant, 1x1 conv tile, per-tile stats.

    The previous activation-quant scale is folded into `w` (w = s_prev * w_q),
    so the rounded integer levels (exact in bf16) feed the MXU directly.
    """
    i = pl.program_id(0)
    h = jnp.round(y_ref[...] * a_ref[...] + b_ref[...]).astype(jnp.bfloat16)
    y = jnp.dot(h, w_ref[...], preferred_element_type=jnp.float32)
    o_ref[...] = y.astype(jnp.bfloat16)
    _write_stats_maybe_masked(stats_ref, y, i, tile_m, rows_valid)


def _conv3x3_bnq_stats_kernel(x_ref, a_ref, b_ref, w_ref, y_ref, stats_ref,
                              pad_ref, pl_ref, pr_ref, acc_ref, *, hh, ww, cp):
    """Fused BN1 + fake-quant + 3x3 same conv (one image per grid step).

    No HBM im2col.  Layout plan (per review):
      * interior of the zero-halo buffer starts at sublane column 8 -> the big
        image store is an aligned, unmasked vst;
      * only the two W-shifted planes (dj=0 / dj=2) are relayout-copied once;
        the 9 taps slice only the leading H axis (layout-trivial, W % 8 == 0);
      * the f32 accumulator is a VMEM scratch (first tap initializes it).
    Halo strips are re-zeroed every step so scratch state never has to survive
    across (possibly core-split) grid iterations.
    """
    c0 = 8                                                   # aligned interior start

    zs = jnp.zeros((hh + 2, 8, cp), jnp.bfloat16)
    pad_ref[:, 0:c0, :] = zs                                 # left halo block
    pad_ref[:, c0 + ww:c0 + ww + 8, :] = zs                  # right halo block
    zr = jnp.zeros((1, ww, cp), jnp.bfloat16)
    pad_ref[0:1, c0:c0 + ww, :] = zr                         # top halo row
    pad_ref[hh + 1:hh + 2, c0:c0 + ww, :] = zr               # bottom halo row

    # BN1 + activation fake-quant, aligned interior store.
    h = jnp.round(x_ref[0] * a_ref[...] + b_ref[...]).astype(jnp.bfloat16)
    pad_ref[1:1 + hh, c0:c0 + ww, :] = h

    # Two pre-shifted planes (the only sublane-misaligned copies).
    pl_ref[...] = pad_ref[:, c0 - 1:c0 - 1 + ww, :]          # dj = 0 (left tap)
    pr_ref[...] = pad_ref[:, c0 + 1:c0 + 1 + ww, :]          # dj = 2 (right tap)

    def tap(di, dj):
        if dj == 0:
            v = pl_ref[di:di + hh]
        elif dj == 1:
            v = pad_ref[di:di + hh, c0:c0 + ww, :]           # aligned direct slice
        else:
            v = pr_ref[di:di + hh]
        return jnp.dot(v.reshape(hh * ww, cp), w_ref[di * 3 + dj],
                       preferred_element_type=jnp.float32)

    acc_ref[...] = tap(0, 0)                                 # init with first tap
    for di in range(3):
        for dj in range(3):
            if (di, dj) != (0, 0):
                acc_ref[...] += tap(di, dj)

    res = acc_ref[...]
    y_ref[...] = res.astype(jnp.bfloat16).reshape(1, hh, ww, cp)
    _write_stats(stats_ref, res, None)


def _bn_residual_kernel(y_ref, a_ref, b_ref, r_ref, o_ref):
    """Final BN (per-channel affine) + residual add (bf16 in, f32 out)."""
    o_ref[...] = y_ref[...] * a_ref[...] + b_ref[...] + r_ref[...]


# ----------------------------------------------------------------------------
# pallas_call wrappers
# ----------------------------------------------------------------------------
def _mm_stats(x, w, tile_m, rows_valid):
    mp, k = x.shape
    co = w.shape[1]
    nt = mp // tile_m
    kern = functools.partial(_mm_stats_kernel, tile_m=tile_m, rows_valid=rows_valid)
    return pl.pallas_call(
        kern,
        out_shape=(jax.ShapeDtypeStruct((mp, co), jnp.bfloat16),
                   jax.ShapeDtypeStruct((nt, 4, co), jnp.float32)),
        grid_spec=pltpu.PrefetchScalarGridSpec(
            num_scalar_prefetch=0,
            grid=(nt,),
            in_specs=[pl.BlockSpec((tile_m, k), lambda i: (i, 0)),
                      pl.BlockSpec((k, co), lambda i: (0, 0))],
            out_specs=(pl.BlockSpec((tile_m, co), lambda i: (i, 0)),
                       pl.BlockSpec((None, 4, co), lambda i: (i, 0, 0)))),
        compiler_params=pltpu.CompilerParams(
            dimension_semantics=("parallel",),
            vmem_limit_bytes=_VMEM_LIMIT),
        cost_estimate=pl.CostEstimate(
            flops=int(2 * mp * k * co), transcendentals=0,
            bytes_accessed=int(2 * mp * (k + co) + 2 * k * co)),
    )(x, w)


def _bnq_mm_stats(y, a, b, w, tile_m, rows_valid):
    mp, k = y.shape
    co = w.shape[1]
    nt = mp // tile_m
    kern = functools.partial(_bnq_mm_stats_kernel, tile_m=tile_m, rows_valid=rows_valid)
    return pl.pallas_call(
        kern,
        out_shape=(jax.ShapeDtypeStruct((mp, co), jnp.bfloat16),
                   jax.ShapeDtypeStruct((nt, 4, co), jnp.float32)),
        grid_spec=pltpu.PrefetchScalarGridSpec(
            num_scalar_prefetch=0,
            grid=(nt,),
            in_specs=[pl.BlockSpec((tile_m, k), lambda i: (i, 0)),
                      pl.BlockSpec((1, k), lambda i: (0, 0)),
                      pl.BlockSpec((1, k), lambda i: (0, 0)),
                      pl.BlockSpec((k, co), lambda i: (0, 0))],
            out_specs=(pl.BlockSpec((tile_m, co), lambda i: (i, 0)),
                       pl.BlockSpec((None, 4, co), lambda i: (i, 0, 0)))),
        compiler_params=pltpu.CompilerParams(
            dimension_semantics=("parallel",),
            vmem_limit_bytes=_VMEM_LIMIT),
        cost_estimate=pl.CostEstimate(
            flops=int(2 * mp * k * co), transcendentals=0,
            bytes_accessed=int(2 * mp * (k + co) + 2 * k * co)),
    )(y, a, b, w)


def _conv3x3_bnq_stats(y_img, a, b, w9):
    n, hh, ww, cp = y_img.shape
    hw = hh * ww
    kern = functools.partial(_conv3x3_bnq_stats_kernel, hh=hh, ww=ww, cp=cp)
    # NOTE: the constant-index weight block ((9,cp,cp)) is still double-buffered
    # by the pipeline; at real channel counts single-buffering it would save VMEM.
    return pl.pallas_call(
        kern,
        out_shape=(jax.ShapeDtypeStruct((n, hh, ww, cp), jnp.bfloat16),
                   jax.ShapeDtypeStruct((n, 4, cp), jnp.float32)),
        grid_spec=pltpu.PrefetchScalarGridSpec(
            num_scalar_prefetch=0,
            grid=(n,),
            in_specs=[pl.BlockSpec((1, hh, ww, cp), lambda i: (i, 0, 0, 0)),
                      pl.BlockSpec((1, cp), lambda i: (0, 0)),
                      pl.BlockSpec((1, cp), lambda i: (0, 0)),
                      pl.BlockSpec((9, cp, cp), lambda i: (0, 0, 0))],
            out_specs=(pl.BlockSpec((1, hh, ww, cp), lambda i: (i, 0, 0, 0)),
                       pl.BlockSpec((None, 4, cp), lambda i: (i, 0, 0))),
            scratch_shapes=[pltpu.VMEM((hh + 2, ww + 16, cp), jnp.bfloat16),
                            pltpu.VMEM((hh + 2, ww, cp), jnp.bfloat16),
                            pltpu.VMEM((hh + 2, ww, cp), jnp.bfloat16),
                            pltpu.VMEM((hw, cp), jnp.float32)]),
        compiler_params=pltpu.CompilerParams(
            dimension_semantics=("parallel",),
            vmem_limit_bytes=_VMEM_LIMIT),
        cost_estimate=pl.CostEstimate(
            flops=int(2 * n * hw * 9 * cp * cp), transcendentals=0,
            bytes_accessed=int(4 * n * hw * cp + 2 * 9 * cp * cp)),
    )(y_img, a, b, w9)


def _bn_residual(y, a, b, r, tile_m):
    mp, cp = y.shape
    return pl.pallas_call(
        _bn_residual_kernel,
        out_shape=jax.ShapeDtypeStruct((mp, cp), jnp.float32),
        grid_spec=pltpu.PrefetchScalarGridSpec(
            num_scalar_prefetch=0,
            grid=(mp // tile_m,),
            in_specs=[pl.BlockSpec((tile_m, cp), lambda i: (i, 0)),
                      pl.BlockSpec((1, cp), lambda i: (0, 0)),
                      pl.BlockSpec((1, cp), lambda i: (0, 0)),
                      pl.BlockSpec((tile_m, cp), lambda i: (i, 0))],
            out_specs=pl.BlockSpec((tile_m, cp), lambda i: (i, 0))),
        compiler_params=pltpu.CompilerParams(
            dimension_semantics=("parallel",),
            vmem_limit_bytes=_VMEM_LIMIT),
        cost_estimate=pl.CostEstimate(
            flops=int(3 * mp * cp), transcendentals=0,
            bytes_accessed=int(8 * mp * cp)),
    )(y, a, b, r)


# ----------------------------------------------------------------------------
# Glue (tiny JAX): weight fake-quant, partial-stats reduction, BN/quant params
# ----------------------------------------------------------------------------
def _fake_quant_weight(w, bit_w):
    qmax = float(2 ** (bit_w - 1) - 1)
    scale = jnp.maximum(jnp.max(jnp.abs(w)) / qmax, 1e-8)
    return jnp.round(w / scale) * scale


def _reduce_stats(parts):                       # (T, 4, C) -> (4, C)
    return jnp.stack([jnp.sum(parts[:, 0, :], axis=0),
                      jnp.sum(parts[:, 1, :], axis=0),
                      jnp.min(parts[:, 2, :], axis=0),
                      jnp.max(parts[:, 3, :], axis=0)], axis=0)


def _affine_from_stats(stats, gamma, beta, count):
    mean = stats[0] / count
    var = jnp.maximum(stats[1] / count - mean * mean, 0.0)   # biased (BN train mode)
    a = gamma * jax.lax.rsqrt(var + _EPS)
    b = beta - mean * a
    return a, b


def _act_quant_scale(a, b, stats, qmax):
    # max |a*y + b| over the whole tensor is attained at per-channel min/max.
    lo = a * stats[2] + b
    hi = a * stats[3] + b
    amax = jnp.max(jnp.maximum(jnp.abs(lo), jnp.abs(hi)))
    return jnp.maximum(amax / qmax, 1e-8)


class QBottleNeckBlockPallas:
    """in_channel == out_channel branch (identity proj, stride 1)."""

    def __init__(self, in_channel, out_channel, neck_reduction=4,
                 bit_w=8, bit_a=8, tile_m=256, key=None):
        assert in_channel == out_channel, "only the identity-proj branch is built"
        assert tile_m % 8 == 0
        cin, cout = in_channel, out_channel
        cn = int(out_channel / neck_reduction)
        cp_io = _round_up(cin, _LANE)           # lane-dense in/out channels
        cp_nk = _round_up(cn, _LANE)            # lane-dense bottleneck channels
        qmax_a = float(2 ** (bit_a - 1) - 1)

        k1, k2, k3 = jax.random.split(key, 3)
        w1 = _fake_quant_weight(0.1 * jax.random.normal(k1, (cin, cn), jnp.float32), bit_w)
        w2 = _fake_quant_weight(0.1 * jax.random.normal(k2, (3, 3, cn, cn), jnp.float32), bit_w)
        w3 = _fake_quant_weight(0.1 * jax.random.normal(k3, (cn, cout), jnp.float32), bit_w)

        # Zero-pad to lane-dense shapes; padded rows/cols are inert.
        w1p = jnp.zeros((cp_io, cp_nk), jnp.float32).at[:cin, :cn].set(w1)
        w1p = w1p.astype(jnp.bfloat16)
        w2p = jnp.zeros((3, 3, cp_nk, cp_nk), jnp.float32).at[:, :, :cn, :cn].set(w2)
        w2p = w2p.reshape(9, cp_nk, cp_nk)      # tap-major (kh*3+kw, Cin, Cout)
        w3p = jnp.zeros((cp_nk, cp_io), jnp.float32).at[:cn, :cout].set(w3)

        # BatchNorm affine params (PyTorch default init: gamma=1, beta=0).
        g1, be1 = jnp.ones((cp_nk,), jnp.float32), jnp.zeros((cp_nk,), jnp.float32)
        g2, be2 = jnp.ones((cp_nk,), jnp.float32), jnp.zeros((cp_nk,), jnp.float32)
        g3, be3 = jnp.ones((cp_io,), jnp.float32), jnp.zeros((cp_io,), jnp.float32)

        def forward(x_nchw):
            n, c, h, w = x_nchw.shape
            assert c == cin
            assert w % 8 == 0, "W must be a multiple of 8 (see TODO on H/W tiling)"
            m = n * h * w
            tm = _pick_tile(m, tile_m)
            if tm is None:                      # fallback: pad rows + masked last tile
                tm = min(tile_m, _round_up(m, 8))
            mp = _round_up(m, tm)
            rows_valid = None if mp == m else m

            # bf16 cast folded into the one existing transpose+pad pass.
            x_rows = jnp.transpose(x_nchw, (0, 2, 3, 1)).reshape(m, c).astype(jnp.bfloat16)
            x_pad = jnp.pad(x_rows, ((0, mp - m), (0, cp_io - c)))

            # ---- stage 1: 1x1 conv (+ BN1/quant1 statistics, per-tile partials)
            y1, st1p = _mm_stats(x_pad, w1p, tm, rows_valid)
            st1 = _reduce_stats(st1p)
            a1, b1 = _affine_from_stats(st1, g1, be1, m)
            s1 = _act_quant_scale(a1, b1, st1, qmax_a)
            a1p, b1p = (a1 / s1).reshape(1, cp_nk), (b1 / s1).reshape(1, cp_nk)
            w2s = (s1 * w2p).astype(jnp.bfloat16)      # fold act scale into w2

            # ---- stage 2: BN1 + quant fused into 3x3 conv (+ BN2/quant2 stats)
            y1_rows = y1 if mp == m else y1[:m]
            y2, st2p = _conv3x3_bnq_stats(y1_rows.reshape(n, h, w, cp_nk), a1p, b1p, w2s)
            st2 = _reduce_stats(st2p)
            a2, b2 = _affine_from_stats(st2, g2, be2, m)
            s2 = _act_quant_scale(a2, b2, st2, qmax_a)
            a2p, b2p = (a2 / s2).reshape(1, cp_nk), (b2 / s2).reshape(1, cp_nk)
            w3s = (s2 * w3p).astype(jnp.bfloat16)      # fold act scale into w3

            # ---- stage 3: BN2 + quant fused into last 1x1 conv (+ BN3 stats)
            y2r = y2.reshape(m, cp_nk)
            y2p = y2r if mp == m else jnp.pad(y2r, ((0, mp - m), (0, 0)))
            y3, st3p = _bnq_mm_stats(y2p, a2p, b2p, w3s, tm, rows_valid)
            st3 = _reduce_stats(st3p)
            a3, b3 = _affine_from_stats(st3, g3, be3, m)

            # ---- final: BN3 + residual add (proj == identity)
            out2d = _bn_residual(y3, a3.reshape(1, cp_io), b3.reshape(1, cp_io),
                                 x_pad, tm)
            out = out2d[:m, :c].reshape(n, h, w, c)
            return jnp.transpose(out, (0, 3, 1, 2))    # NHWC -> NCHW (kept for parity)

        self._forward = jax.jit(forward)

    def __call__(self, x_nchw):
        return self._forward(x_nchw)


if __name__ == "__main__":
    key = jax.random.PRNGKey(0)
    k_x, k_p = jax.random.split(key)

    N, C, H, W = 2, 32, 16, 16
    x = jax.random.normal(k_x, (N, C, H, W), jnp.float32)

    # tile_m=128 -> M=512 rows run as a 4-step, fully "parallel" grid.
    block = QBottleNeckBlockPallas(in_channel=C, out_channel=C,
                                   neck_reduction=4, bit_w=8, bit_a=8,
                                   tile_m=128, key=k_p)

    out = jax.block_until_ready(block(x))

    assert out.shape == (N, C, H, W)
    assert bool(jnp.all(jnp.isfinite(out)))
    print("KERNEL_OK")
</pallas_src>

<mosaic_0001>
module attributes {stable_mosaic.version = 11 : i64} {
  func.func @_mm_stats_kernel(%arg0: i32, %arg1: memref<128x128xbf16, #tpu.memory_space<vmem>>, %arg2: memref<128x128xbf16, #tpu.memory_space<vmem>>, %arg3: memref<128x128xbf16, #tpu.memory_space<vmem>>, %arg4: memref<1x4x128xf32, #tpu.memory_space<vmem>>) attributes {dimension_semantics = [#tpu.dimension_semantics<parallel>], iteration_bounds = array<i64: 4>, scalar_prefetch = 0 : i64, scratch_operands = 0 : i64, tpu.core_type = #tpu.core_type<tc>, window_params = [{transform_indices = @transform_0, window_bounds = array<i64: 128, 128>}, {pipeline_mode = #tpu.pipeline_mode<synchronous>, transform_indices = @transform_1, window_bounds = array<i64: 128, 128>}, {transform_indices = @transform_2, window_bounds = array<i64: 128, 128>}, {transform_indices = @transform_3, window_bounds = array<i64: 1, 4, 128>}]} {
    %c0 = arith.constant 0 : index
    %c0_0 = arith.constant 0 : index
    %0 = vector.load %arg1[%c0, %c0_0] : memref<128x128xbf16, #tpu.memory_space<vmem>>, vector<128x128xbf16>
    %c0_1 = arith.constant 0 : index
    %c0_2 = arith.constant 0 : index
    %1 = vector.load %arg2[%c0_1, %c0_2] : memref<128x128xbf16, #tpu.memory_space<vmem>>, vector<128x128xbf16>
    %cst = arith.constant dense<0.000000e+00> : vector<128x128xf32>
    %2 = tpu.matmul %0, %1, %cst {dimension_numbers = #tpu.dot_dimension_numbers<[1], [0], [0], [1], [0, 0, 1, 1], [], []>} : vector<128x128xbf16>, vector<128x128xbf16>, vector<128x128xf32> -> vector<128x128xf32>
    %3 = arith.truncf %2 : vector<128x128xf32> to vector<128x128xbf16>
    %c0_3 = arith.constant 0 : index
    %c0_4 = arith.constant 0 : index
    %4 = vector.load %arg3[%c0_3, %c0_4] : memref<128x128xbf16, #tpu.memory_space<vmem>>, vector<128x128xbf16>
    tpu.vector_store %arg3[%c0_3, %c0_4], %3 {strides = array<i32>} : memref<128x128xbf16, #tpu.memory_space<vmem>>, vector<128x128xbf16>,
    %cst_5 = arith.constant dense<0.000000e+00> : vector<128xf32>
    %5 = vector.multi_reduction <add>, %2, %cst_5 [0] : vector<128x128xf32> to vector<128xf32>
    %6 = vector.shape_cast %5 : vector<128xf32> to vector<1x128xf32>
    %c0_6 = arith.constant 0 : index
    %c0_7 = arith.constant 0 : index
    %c0_8 = arith.constant 0 : index
    %7 = vector.load %arg4[%c0_6, %c0_7, %c0_8] : memref<1x4x128xf32, #tpu.memory_space<vmem>>, vector<1x1x128xf32>
    %8 = vector.shape_cast %7 : vector<1x1x128xf32> to vector<1x128xf32>
    %9 = vector.shape_cast %6 : vector<1x128xf32> to vector<1x1x128xf32>
    tpu.vector_store %arg4[%c0_6, %c0_7, %c0_8], %9 {strides = array<i32>} : memref<1x4x128xf32, #tpu.memory_space<vmem>>, vector<1x1x128xf32>,
    %10 = arith.mulf %2, %2 : vector<128x128xf32>
    %cst_9 = arith.constant dense<0.000000e+00> : vector<128xf32>
    %11 = vector.multi_reduction <add>, %10, %cst_9 [0] : vector<128x128xf32> to vector<128xf32>
    %12 = vector.shape_cast %11 : vector<128xf32> to vector<1x128xf32>
    %c0_10 = arith.constant 0 : index
    %c1 = arith.constant 1 : index
    %c0_11 = arith.constant 0 : index
    %13 = vector.load %arg4[%c0_10, %c1, %c0_11] : memref<1x4x128xf32, #tpu.memory_space<vmem>>, vector<1x1x128xf32>
    %14 = vector.shape_cast %13 : vector<1x1x128xf32> to vector<1x128xf32>
    %15 = vector.shape_cast %12 : vector<1x128xf32> to vector<1x1x128xf32>
    tpu.vector_store %arg4[%c0_10, %c1, %c0_11], %15 {strides = array<i32>} : memref<1x4x128xf32, #tpu.memory_space<vmem>>, vector<1x1x128xf32>,
    %cst_12 = arith.constant dense<0x7F800000> : vector<128xf32>
    %16 = vector.multi_reduction <minimumf>, %2, %cst_12 [0] : vector<128x128xf32> to vector<128xf32>
    %17 = vector.shape_cast %16 : vector<128xf32> to vector<1x128xf32>
    %c0_13 = arith.constant 0 : index
    %c2 = arith.constant 2 : index
    %c0_14 = arith.constant 0 : index
    %18 = vector.load %arg4[%c0_13, %c2, %c0_14] : memref<1x4x128xf32, #tpu.memory_space<vmem>>, vector<1x1x128xf32>
    %19 = vector.shape_cast %18 : vector<1x1x128xf32> to vector<1x128xf32>
    %20 = vector.shape_cast %17 : vector<1x128xf32> to vector<1x1x128xf32>
    tpu.vector_store %arg4[%c0_13, %c2, %c0_14], %20 {strides = array<i32>} : memref<1x4x128xf32, #tpu.memory_space<vmem>>, vector<1x1x128xf32>,
    %cst_15 = arith.constant dense<0xFF800000> : vector<128xf32>
    %21 = vector.multi_reduction <maximumf>, %2, %cst_15 [0] : vector<128x128xf32> to vector<128xf32>
    %22 = vector.shape_cast %21 : vector<128xf32> to vector<1x128xf32>
    %c0_16 = arith.constant 0 : index
    %c3 = arith.constant 3 : index
    %c0_17 = arith.constant 0 : index
    %23 = vector.load %arg4[%c0_16, %c3, %c0_17] : memref<1x4x128xf32, #tpu.memory_space<vmem>>, vector<1x1x128xf32>
    %24 = vector.shape_cast %23 : vector<1x1x128xf32> to vector<1x128xf32>
    %25 = vector.shape_cast %22 : vector<1x128xf32> to vector<1x1x128xf32>
    tpu.vector_store %arg4[%c0_16, %c3, %c0_17], %25 {strides = array<i32>} : memref<1x4x128xf32, #tpu.memory_space<vmem>>, vector<1x1x128xf32>,
    return
  }
  func.func @transform_0(%arg0: i32) -> (i32, i32) {
    %c0_i32 = arith.constant 0 : i32
    %c0_i32_0 = arith.constant 0 : i32
    return %arg0, %c0_i32 : i32, i32
  }
  func.func @transform_1(%arg0: i32) -> (i32, i32) {
    %c0_i32 = arith.constant 0 : i32
    %c0_i32_0 = arith.constant 0 : i32
    %c0_i32_1 = arith.constant 0 : i32
    return %c0_i32, %c0_i32_0 : i32, i32
  }
  func.func @transform_2(%arg0: i32) -> (i32, i32) {
    %c0_i32 = arith.constant 0 : i32
    %c0_i32_0 = arith.constant 0 : i32
    return %arg0, %c0_i32 : i32, i32
  }
  func.func @transform_3(%arg0: i32) -> (i32, i32, i32) {
    %c0_i32 = arith.constant 0 : i32
    %c0_i32_0 = arith.constant 0 : i32
    %c0_i32_1 = arith.constant 0 : i32
    return %arg0, %c0_i32, %c0_i32_0 : i32, i32, i32
  }
}

module attributes {stable_mosaic.version = 11 : i64} {
  func.func @_conv3x3_bnq_stats_kernel(%arg0: i32, %arg1: memref<1x16x16x128xbf16, #tpu.memory_space<vmem>>, %arg2: memref<1x128xf32, #tpu.memory_space<vmem>>, %arg3: memref<1x128xf32, #tpu.memory_space<vmem>>, %arg4: memref<9x128x128xbf16, #tpu.memory_space<vmem>>, %arg5: memref<1x16x16x128xbf16, #tpu.memory_space<vmem>>, %arg6: memref<1x4x128xf32, #tpu.memory_space<vmem>>, %arg7: memref<18x32x128xbf16, #tpu.memory_space<vmem>>, %arg8: memref<18x16x128xbf16, #tpu.memory_space<vmem>>, %arg9: memref<18x16x128xbf16, #tpu.memory_space<vmem>>, %arg10: memref<256x128xf32, #tpu.memory_space<vmem>>) attributes {dimension_semantics = [#tpu.dimension_semantics<parallel>], iteration_bounds = array<i64: 2>, scalar_prefetch = 0 : i64, scratch_operands = 4 : i64, tpu.core_type = #tpu.core_type<tc>, window_params = [{transform_indices = @transform_0, window_bounds = array<i64: 1, 16, 16, 128>}, {pipeline_mode = #tpu.pipeline_mode<synchronous>, transform_indices = @transform_1, window_bounds = array<i64: 1, 128>}, {pipeline_mode = #tpu.pipeline_mode<synchronous>, transform_indices = @transform_2, window_bounds = array<i64: 1, 128>}, {pipeline_mode = #tpu.pipeline_mode<synchronous>, transform_indices = @transform_3, window_bounds = array<i64: 9, 128, 128>}, {transform_indices = @transform_4, window_bounds = array<i64: 1, 16, 16, 128>}, {transform_indices = @transform_5, window_bounds = array<i64: 1, 4, 128>}]} {
    %cst = arith.constant 0.000000e+00 : bf16
    %0 = vector.broadcast %cst : bf16 to vector<18x8x128xbf16>
    %c0 = arith.constant 0 : index
    %c0_0 = arith.constant 0 : index
    %c0_1 = arith.constant 0 : index
    %1 = vector.load %arg7[%c0, %c0_0, %c0_1] : memref<18x32x128xbf16, #tpu.memory_space<vmem>>, vector<18x8x128xbf16>
    tpu.vector_store %arg7[%c0, %c0_0, %c0_1], %0 {strides = array<i32>} : memref<18x32x128xbf16, #tpu.memory_space<vmem>>, vector<18x8x128xbf16>,
    %c0_2 = arith.constant 0 : index
    %c24 = arith.constant 24 : index
    %c0_3 = arith.constant 0 : index
    %2 = vector.load %arg7[%c0_2, %c24, %c0_3] : memref<18x32x128xbf16, #tpu.memory_space<vmem>>, vector<18x8x128xbf16>
    tpu.vector_store %arg7[%c0_2, %c24, %c0_3], %0 {strides = array<i32>} : memref<18x32x128xbf16, #tpu.memory_space<vmem>>, vector<18x8x128xbf16>,
    %cst_4 = arith.constant 0.000000e+00 : bf16
    %3 = vector.broadcast %cst_4 : bf16 to vector<1x16x128xbf16>
    %c0_5 = arith.constant 0 : index
    %c8 = arith.constant 8 : index
    %c0_6 = arith.constant 0 : index
    %4 = vector.load %arg7[%c0_5, %c8, %c0_6] : memref<18x32x128xbf16, #tpu.memory_space<vmem>>, vector<1x16x128xbf16>
    tpu.vector_store %arg7[%c0_5, %c8, %c0_6], %3 {strides = array<i32>} : memref<18x32x128xbf16, #tpu.memory_space<vmem>>, vector<1x16x128xbf16>,
    %c17 = arith.constant 17 : index
    %c8_7 = arith.constant 8 : index
    %c0_8 = arith.constant 0 : index
    %5 = vector.load %arg7[%c17, %c8_7, %c0_8] : memref<18x32x128xbf16, #tpu.memory_space<vmem>>, vector<1x16x128xbf16>
    tpu.vector_store %arg7[%c17, %c8_7, %c0_8], %3 {strides = array<i32>} : memref<18x32x128xbf16, #tpu.memory_space<vmem>>, vector<1x16x128xbf16>,
    %c0_9 = arith.constant 0 : index
    %c0_10 = arith.constant 0 : index
    %c0_11 = arith.constant 0 : index
    %c0_12 = arith.constant 0 : index
    %6 = vector.load %arg1[%c0_9, %c0_10, %c0_11, %c0_12] : memref<1x16x16x128xbf16, #tpu.memory_space<vmem>>, vector<1x16x16x128xbf16>
    %7 = vector.shape_cast %6 : vector<1x16x16x128xbf16> to vector<16x16x128xbf16>
    %c0_13 = arith.constant 0 : index
    %c0_14 = arith.constant 0 : index
    %8 = vector.load %arg2[%c0_13, %c0_14] : memref<1x128xf32, #tpu.memory_space<vmem>>, vector<1x128xf32>
    %9 = arith.extf %7 : vector<16x16x128xbf16> to vector<16x16x128xf32>
    %10 = vector.shape_cast %8 : vector<1x128xf32> to vector<1x1x128xf32>
    %11 = vector.broadcast %10 : vector<1x1x128xf32> to vector<16x16x128xf32>
    %12 = arith.mulf %9, %11 : vector<16x16x128xf32>
    %c0_15 = arith.constant 0 : index
    %c0_16 = arith.constant 0 : index
    %13 = vector.load %arg3[%c0_15, %c0_16] : memref<1x128xf32, #tpu.memory_space<vmem>>, vector<1x128xf32>
    %14 = vector.shape_cast %13 : vector<1x128xf32> to vector<1x1x128xf32>
    %15 = vector.broadcast %14 : vector<1x1x128xf32> to vector<16x16x128xf32>
    %16 = arith.addf %12, %15 : vector<16x16x128xf32>
    %17 = math.roundeven %16 : vector<16x16x128xf32>
    %18 = arith.truncf %17 : vector<16x16x128xf32> to vector<16x16x128xbf16>
    %c1 = arith.constant 1 : index
    %c8_17 = arith.constant 8 : index
    %c0_18 = arith.constant 0 : index
    %19 = vector.load %arg7[%c1, %c8_17, %c0_18] : memref<18x32x128xbf16, #tpu.memory_space<vmem>>, vector<16x16x128xbf16>
    tpu.vector_store %arg7[%c1, %c8_17, %c0_18], %18 {strides = array<i32>} : memref<18x32x128xbf16, #tpu.memory_space<vmem>>, vector<16x16x128xbf16>,
    %c0_19 = arith.constant 0 : index
    %c7 = arith.constant 7 : index
    %c0_20 = arith.constant 0 : index
    %20 = vector.load %arg7[%c0_19, %c7, %c0_20] : memref<18x32x128xbf16, #tpu.memory_space<vmem>>, vector<18x16x128xbf16>
    %c0_21 = arith.constant 0 : index
    %c0_22 = arith.constant 0 : index
    %c0_23 = arith.constant 0 : index
    %21 = vector.load %arg8[%c0_21, %c0_22, %c0_23] : memref<18x16x128xbf16, #tpu.memory_space<vmem>>, vector<18x16x128xbf16>
    tpu.vector_store %arg8[%c0_21, %c0_22, %c0_23], %20 {strides = array<i32>} : memref<18x16x128xbf16, #tpu.memory_space<vmem>>, vector<18x16x128xbf16>,
    %c0_24 = arith.constant 0 : index
    %c9 = arith.constant 9 : index
    %c0_25 = arith.constant 0 : index
    %22 = vector.load %arg7[%c0_24, %c9, %c0_25] : memref<18x32x128xbf16, #tpu.memory_space<vmem>>, vector<18x16x128xbf16>
    %c0_26 = arith.constant 0 : index
    %c0_27 = arith.constant 0 : index
    %c0_28 = arith.constant 0 : index
    %23 = vector.load %arg9[%c0_26, %c0_27, %c0_28] : memref<18x16x128xbf16, #tpu.memory_space<vmem>>, vector<18x16x128xbf16>
    tpu.vector_store %arg9[%c0_26, %c0_27, %c0_28], %22 {strides = array<i32>} : memref<18x16x128xbf16, #tpu.memory_space<vmem>>, vector<18x16x128xbf16>,
    %c0_29 = arith.constant 0 : index
    %c0_30 = arith.constant 0 : index
    %c0_31 = arith.constant 0 : index
    %24 = vector.load %arg8[%c0_29, %c0_30, %c0_31] : memref<18x16x128xbf16, #tpu.memory_space<vmem>>, vector<16x16x128xbf16>
    %25 = vector.shape_cast %24 : vector<16x16x128xbf16> to vector<256x128xbf16>
    %c0_32 = arith.constant 0 : index
    %c0_33 = arith.constant 0 : index
    %c0_34 = arith.constant 0 : index
    %26 = vector.load %arg4[%c0_32, %c0_33, %c0_34] : memref<9x128x128xbf16, #tpu.memory_space<vmem>>, vector<1x128x128xbf16>
    %27 = vector.shape_cast %26 : vector<1x128x128xbf16> to vector<128x128xbf16>
    %cst_35 = arith.constant dense<0.000000e+00> : vector<256x128xf32>
    %28 = tpu.matmul %25, %27, %cst_35 {dimension_numbers = #tpu.dot_dimension_numbers<[1], [0], [0], [1], [0, 0, 1, 1], [], []>} : vector<256x128xbf16>, vector<128x128xbf16>, vector<256x128xf32> -> vector<256x128xf32>
    %c0_36 = arith.constant 0 : index
    %c0_37 = arith.constant 0 : index
    %29 = vector.load %arg10[%c0_36, %c0_37] : memref<256x128xf32, #tpu.memory_space<vmem>>, vector<256x128xf32>
    tpu.vector_store %arg10[%c0_36, %c0_37], %28 {strides = array<i32>} : memref<256x128xf32, #tpu.memory_space<vmem>>, vector<256x128xf32>,
    %c0_38 = arith.constant 0 : index
    %c0_39 = arith.constant 0 : index
    %30 = vector.load %arg10[%c0_38, %c0_39] : memref<256x128xf32, #tpu.memory_space<vmem>>, vector<256x128xf32>
    %c0_40 = arith.constant 0 : index
    %c8_41 = arith.constant 8 : index
    %c0_42 = arith.constant 0 : index
    %31 = vector.load %arg7[%c0_40, %c8_41, %c0_42] : memref<18x32x128xbf16, #tpu.memory_space<vmem>>, vector<16x16x128xbf16>
    %32 = vector.shape_cast %31 : vector<16x16x128xbf16> to vector<256x128xbf16>
    %c1_43 = arith.constant 1 : index
    %c0_44 = arith.constant 0 : index
    %c0_45 = arith.constant 0 : index
    %33 = vector.load %arg4[%c1_43, %c0_44, %c0_45] : memref<9x128x128xbf16, #tpu.memory_space<vmem>>, vector<1x128x128xbf16>
    %34 = vector.shape_cast %33 : vector<1x128x128xbf16> to vector<128x128xbf16>
    %cst_46 = arith.constant dense<0.000000e+00> : vector<256x128xf32>
    %35 = tpu.matmul %32, %34, %cst_46 {dimension_numbers = #tpu.dot_dimension_numbers<[1], [0], [0], [1], [0, 0, 1, 1], [], []>} : vector<256x128xbf16>, vector<128x128xbf16>, vector<256x128xf32> -> vector<256x128xf32>
    %36 = arith.addf %30, %35 : vector<256x128xf32>
    %c0_47 = arith.constant 0 : index
    %c0_48 = arith.constant 0 : index
    %37 = vector.load %arg10[%c0_47, %c0_48] : memref<256x128xf32, #tpu.memory_space<vmem>>, vector<256x128xf32>
    tpu.vector_store %arg10[%c0_47, %c0_48], %36 {strides = array<i32>} : memref<256x128xf32, #tpu.memory_space<vmem>>, vector<256x128xf32>,
    %c0_49 = arith.constant 0 : index
    %c0_50 = arith.constant 0 : index
    %38 = vector.load %arg10[%c0_49, %c0_50] : memref<256x128xf32, #tpu.memory_space<vmem>>, vector<256x128xf32>
    %c0_51 = arith.constant 0 : index
    %c0_52 = arith.constant 0 : index
    %c0_53 = arith.constant 0 : index
    %39 = vector.load %arg9[%c0_51, %c0_52, %c0_53] : memref<18x16x128xbf16, #tpu.memory_space<vmem>>, vector<16x16x128xbf16>
    %40 = vector.shape_cast %39 : vector<16x16x128xbf16> to vector<256x128xbf16>
    %c2 = arith.constant 2 : index
    %c0_54 = arith.constant 0 : index
    %c0_55 = arith.constant 0 : index
    %41 = vector.load %arg4[%c2, %c0_54, %c0_55] : memref<9x128x128xbf16, #tpu.memory_space<vmem>>, vector<1x128x128xbf16>
    %42 = vector.shape_cast %41 : vector<1x128x128xbf16> to vector<128x128xbf16>
    %cst_56 = arith.constant dense<0.000000e+00> : vector<256x128xf32>
    %43 = tpu.matmul %40, %42, %cst_56 {dimension_numbers = #tpu.dot_dimension_numbers<[1], [0], [0], [1], [0, 0, 1, 1], [], []>} : vector<256x128xbf16>, vector<128x128xbf16>, vector<256x128xf32> -> vector<256x128xf32>
    %44 = arith.addf %38, %43 : vector<256x128xf32>
    %c0_57 = arith.constant 0 : index
    %c0_58 = arith.constant 0 : index
    %45 = vector.load %arg10[%c0_57, %c0_58] : memref<256x128xf32, #tpu.memory_space<vmem>>, vector<256x128xf32>
    tpu.vector_store %arg10[%c0_57, %c0_58], %44 {strides = array<i32>} : memref<256x128xf32, #tpu.memory_space<vmem>>, vector<256x128xf32>,
    %c0_59 = arith.constant 0 : index
    %c0_60 = arith.constant 0 : index
    %46 = vector.load %arg10[%c0_59, %c0_60] : memref<256x128xf32, #tpu.memory_space<vmem>>, vector<256x128xf32>
    %c1_61 = arith.constant 1 : index
    %c0_62 = arith.constant 0 : index
    %c0_63 = arith.constant 0 : index
    %47 = vector.load %arg8[%c1_61, %c0_62, %c0_63] : memref<18x16x128xbf16, #tpu.memory_space<vmem>>, vector<16x16x128xbf16>
    %48 = vector.shape_cast %47 : vector<16x16x128xbf16> to vector<256x128xbf16>
    %c3 = arith.constant 3 : index
    %c0_64 = arith.constant 0 : index
    %c0_65 = arith.constant 0 : index
    %49 = vector.load %arg4[%c3, %c0_64, %c0_65] : memref<9x128x128xbf16, #tpu.memory_space<vmem>>, vector<1x128x128xbf16>
    %50 = vector.shape_cast %49 : vector<1x128x128xbf16> to vector<128x128xbf16>
    %cst_66 = arith.constant dense<0.000000e+00> : vector<256x128xf32>
    %51 = tpu.matmul %48, %50, %cst_66 {dimension_numbers = #tpu.dot_dimension_numbers<[1], [0], [0], [1], [0, 0, 1, 1], [], []>} : vector<256x128xbf16>, vector<128x128xbf16>, vector<256x128xf32> -> vector<256x128xf32>
    %52 = arith.addf %46, %51 : vector<256x128xf32>
    %c0_67 = arith.constant 0 : index
    %c0_68 = arith.constant 0 : index
    %53 = vector.load %arg10[%c0_67, %c0_68] : memref<256x128xf32, #tpu.memory_space<vmem>>, vector<256x128xf32>
    tpu.vector_store %arg10[%c0_67, %c0_68], %52 {strides = array<i32>} : memref<256x128xf32, #tpu.memory_space<vmem>>, vector<256x128xf32>,
    %c0_69 = arith.constant 0 : index
    %c0_70 = arith.constant 0 : index
    %54 = vector.load %arg10[%c0_69, %c0_70] : memref<256x128xf32, #tpu.memory_space<vmem>>, vector<256x128xf32>
    %c1_71 = arith.constant 1 : index
    %c8_72 = arith.constant 8 : index
    %c0_73 = arith.constant 0 : index
    %55 = vector.load %arg7[%c1_71, %c8_72, %c0_73] : memref<18x32x128xbf16, #tpu.memory_space<vmem>>, vector<16x16x128xbf16>
    %56 = vector.shape_cast %55 : vector<16x16x128xbf16> to vector<256x128xbf16>
    %c4 = arith.constant 4 : index
    %c0_74 = arith.constant 0 : index
    %c0_75 = arith.constant 0 : index
    %57 = vector.load %arg4[%c4, %c0_74, %c0_75] : memref<9x128x128xbf16, #tpu.memory_space<vmem>>, vector<1x128x128xbf16>
    %58 = vector.shape_cast %57 : vector<1x128x128xbf16> to vector<128x128xbf16>
    %cst_76 = arith.constant dense<0.000000e+00> : vector<256x128xf32>
    %59 = tpu.matmul %56, %58, %cst_76 {dimension_numbers = #tpu.dot_dimension_numbers<[1], [0], [0], [1], [0, 0, 1, 1], [], []>} : vector<256x128xbf16>, vector<128x128xbf16>, vector<256x128xf32> -> vector<256x128xf32>
    %60 = arith.addf %54, %59 : vector<256x128xf32>
    %c0_77 = arith.constant 0 : index
    %c0_78 = arith.constant 0 : index
    %61 = vector.load %arg10[%c0_77, %c0_78] : memref<256x128xf32, #tpu.memory_space<vmem>>, vector<256x128xf32>
    tpu.vector_store %arg10[%c0_77, %c0_78], %60 {strides = array<i32>} : memref<256x128xf32, #tpu.memory_space<vmem>>, vector<256x128xf32>,
    %c0_79 = arith.constant 0 : index
    %c0_80 = arith.constant 0 : index
    %62 = vector.load %arg10[%c0_79, %c0_80] : memref<256x128xf32, #tpu.memory_space<vmem>>, vector<256x128xf32>
    %c1_81 = arith.constant 1 : index
    %c0_82 = arith.constant 0 : index
    %c0_83 = arith.constant 0 : index
    %63 = vector.load %arg9[%c1_81, %c0_82, %c0_83] : memref<18x16x128xbf16, #tpu.memory_space<vmem>>, vector<16x16x128xbf16>
    %64 = vector.shape_cast %63 : vector<16x16x128xbf16> to vector<256x128xbf16>
    %c5 = arith.constant 5 : index
    %c0_84 = arith.constant 0 : index
    %c0_85 = arith.constant 0 : index
    %65 = vector.load %arg4[%c5, %c0_84, %c0_85] : memref<9x128x128xbf16, #tpu.memory_space<vmem>>, vector<1x128x128xbf16>
    %66 = vector.shape_cast %65 : vector<1x128x128xbf16> to vector<128x128xbf16>
    %cst_86 = arith.constant dense<0.000000e+00> : vector<256x128xf32>
    %67 = tpu.matmul %64, %66, %cst_86 {dimension_numbers = #tpu.dot_dimension_numbers<[1], [0], [0], [1], [0, 0, 1, 1], [], []>} : vector<256x128xbf16>, vector<128x128xbf16>, vector<256x128xf32> -> vector<256x128xf32>
    %68 = arith.addf %62, %67 : vector<256x128xf32>
    %c0_87 = arith.constant 0 : index
    %c0_88 = arith.constant 0 : index
    %69 = vector.load %arg10[%c0_87, %c0_88] : memref<256x128xf32, #tpu.memory_space<vmem>>, vector<256x128xf32>
    tpu.vector_store %arg10[%c0_87, %c0_88], %68 {strides = array<i32>} : memref<256x128xf32, #tpu.memory_space<vmem>>, vector<256x128xf32>,
    %c0_89 = arith.constant 0 : index
    %c0_90 = arith.constant 0 : index
    %70 = vector.load %arg10[%c0_89, %c0_90] : memref<256x128xf32, #tpu.memory_space<vmem>>, vector<256x128xf32>
    %c2_91 = arith.constant 2 : index
    %c0_92 = arith.constant 0 : index
    %c0_93 = arith.constant 0 : index
    %71 = vector.load %arg8[%c2_91, %c0_92, %c0_93] : memref<18x16x128xbf16, #tpu.memory_space<vmem>>, vector<16x16x128xbf16>
    %72 = vector.shape_cast %71 : vector<16x16x128xbf16> to vector<256x128xbf16>
    %c6 = arith.constant 6 : index
    %c0_94 = arith.constant 0 : index
    %c0_95 = arith.constant 0 : index
    %73 = vector.load %arg4[%c6, %c0_94, %c0_95] : memref<9x128x128xbf16, #tpu.memory_space<vmem>>, vector<1x128x128xbf16>
    %74 = vector.shape_cast %73 : vector<1x128x128xbf16> to vector<128x128xbf16>
    %cst_96 = arith.constant dense<0.000000e+00> : vector<256x128xf32>
    %75 = tpu.matmul %72, %74, %cst_96 {dimension_numbers = #tpu.dot_dimension_numbers<[1], [0], [0], [1], [0, 0, 1, 1], [], []>} : vector<256x128xbf16>, vector<128x128xbf16>, vector<256x128xf32> -> vector<256x128xf32>
    %76 = arith.addf %70, %75 : vector<256x128xf32>
    %c0_97 = arith.constant 0 : index
    %c0_98 = arith.constant 0 : index
    %77 = vector.load %arg10[%c0_97, %c0_98] : memref<256x128xf32, #tpu.memory_space<vmem>>, vector<256x128xf32>
    tpu.vector_store %arg10[%c0_97, %c0_98], %76 {strides = array<i32>} : memref<256x128xf32, #tpu.memory_space<vmem>>, vector<256x128xf32>,
    %c0_99 = arith.constant 0 : index
    %c0_100 = arith.constant 0 : index
    %78 = vector.load %arg10[%c0_99, %c0_100] : memref<256x128xf32, #tpu.memory_space<vmem>>, vector<256x128xf32>
    %c2_101 = arith.constant 2 : index
    %c8_102 = arith.constant 8 : index
    %c0_103 = arith.constant 0 : index
    %79 = vector.load %arg7[%c2_101, %c8_102, %c0_103] : memref<18x32x128xbf16, #tpu.memory_space<vmem>>, vector<16x16x128xbf16>
    %80 = vector.shape_cast %79 : vector<16x16x128xbf16> to vector<256x128xbf16>
    %c7_104 = arith.constant 7 : index
    %c0_105 = arith.constant 0 : index
    %c0_106 = arith.constant 0 : index
    %81 = vector.load %arg4[%c7_104, %c0_105, %c0_106] : memref<9x128x128xbf16, #tpu.memory_space<vmem>>, vector<1x128x128xbf16>
    %82 = vector.shape_cast %81 : vector<1x128x128xbf16> to vector<128x128xbf16>
    %cst_107 = arith.constant dense<0.000000e+00> : vector<256x128xf32>
    %83 = tpu.matmul %80, %82, %cst_107 {dimension_numbers = #tpu.dot_dimension_numbers<[1], [0], [0], [1], [0, 0, 1, 1], [], []>} : vector<256x128xbf16>, vector<128x128xbf16>, vector<256x128xf32> -> vector<256x128xf32>
    %84 = arith.addf %78, %83 : vector<256x128xf32>
    %c0_108 = arith.constant 0 : index
    %c0_109 = arith.constant 0 : index
    %85 = vector.load %arg10[%c0_108, %c0_109] : memref<256x128xf32, #tpu.memory_space<vmem>>, vector<256x128xf32>
    tpu.vector_store %arg10[%c0_108, %c0_109], %84 {strides = array<i32>} : memref<256x128xf32, #tpu.memory_space<vmem>>, vector<256x128xf32>,
    %c0_110 = arith.constant 0 : index
    %c0_111 = arith.constant 0 : index
    %86 = vector.load %arg10[%c0_110, %c0_111] : memref<256x128xf32, #tpu.memory_space<vmem>>, vector<256x128xf32>
    %c2_112 = arith.constant 2 : index
    %c0_113 = arith.constant 0 : index
    %c0_114 = arith.constant 0 : index
    %87 = vector.load %arg9[%c2_112, %c0_113, %c0_114] : memref<18x16x128xbf16, #tpu.memory_space<vmem>>, vector<16x16x128xbf16>
    %88 = vector.shape_cast %87 : vector<16x16x128xbf16> to vector<256x128xbf16>
    %c8_115 = arith.constant 8 : index
    %c0_116 = arith.constant 0 : index
    %c0_117 = arith.constant 0 : index
    %89 = vector.load %arg4[%c8_115, %c0_116, %c0_117] : memref<9x128x128xbf16, #tpu.memory_space<vmem>>, vector<1x128x128xbf16>
    %90 = vector.shape_cast %89 : vector<1x128x128xbf16> to vector<128x128xbf16>
    %cst_118 = arith.constant dense<0.000000e+00> : vector<256x128xf32>
    %91 = tpu.matmul %88, %90, %cst_118 {dimension_numbers = #tpu.dot_dimension_numbers<[1], [0], [0], [1], [0, 0, 1, 1], [], []>} : vector<256x128xbf16>, vector<128x128xbf16>, vector<256x128xf32> -> vector<256x128xf32>
    %92 = arith.addf %86, %91 : vector<256x128xf32>
    %c0_119 = arith.constant 0 : index
    %c0_120 = arith.constant 0 : index
    %93 = vector.load %arg10[%c0_119, %c0_120] : memref<256x128xf32, #tpu.memory_space<vmem>>, vector<256x128xf32>
    tpu.vector_store %arg10[%c0_119, %c0_120], %92 {strides = array<i32>} : memref<256x128xf32, #tpu.memory_space<vmem>>, vector<256x128xf32>,
    %c0_121 = arith.constant 0 : index
    %c0_122 = arith.constant 0 : index
    %94 = vector.load %arg10[%c0_121, %c0_122] : memref<256x128xf32, #tpu.memory_space<vmem>>, vector<256x128xf32>
    %95 = arith.truncf %94 : vector<256x128xf32> to vector<256x128xbf16>
    %96 = vector.shape_cast %95 : vector<256x128xbf16> to vector<1x16x16x128xbf16>
    %c0_123 = arith.constant 0 : index
    %c0_124 = arith.constant 0 : index
    %c0_125 = arith.constant 0 : index
    %c0_126 = arith.constant 0 : index
    %97 = vector.load %arg5[%c0_123, %c0_124, %c0_125, %c0_126] : memref<1x16x16x128xbf16, #tpu.memory_space<vmem>>, vector<1x16x16x128xbf16>
    tpu.vector_store %arg5[%c0_123, %c0_124, %c0_125, %c0_126], %96 {strides = array<i32>} : memref<1x16x16x128xbf16, #tpu.memory_space<vmem>>, vector<1x16x16x128xbf16>,
    %cst_127 = arith.constant dense<0.000000e+00> : vector<128xf32>
    %98 = vector.multi_reduction <add>, %94, %cst_127 [0] : vector<256x128xf32> to vector<128xf32>
    %99 = vector.shape_cast %98 : vector<128xf32> to vector<1x128xf32>
    %c0_128 = arith.constant 0 : index
    %c0_129 = arith.constant 0 : index
    %c0_130 = arith.constant 0 : index
    %100 = vector.load %arg6[%c0_128, %c0_129, %c0_130] : memref<1x4x128xf32, #tpu.memory_space<vmem>>, vector<1x1x128xf32>
    %101 = vector.shape_cast %100 : vector<1x1x128xf32> to vector<1x128xf32>
    %102 = vector.shape_cast %99 : vector<1x128xf32> to vector<1x1x128xf32>
    tpu.vector_store %arg6[%c0_128, %c0_129, %c0_130], %102 {strides = array<i32>} : memref<1x4x128xf32, #tpu.memory_space<vmem>>, vector<1x1x128xf32>,
    %103 = arith.mulf %94, %94 : vector<256x128xf32>
    %cst_131 = arith.constant dense<0.000000e+00> : vector<128xf32>
    %104 = vector.multi_reduction <add>, %103, %cst_131 [0] : vector<256x128xf32> to vector<128xf32>
    %105 = vector.shape_cast %104 : vector<128xf32> to vector<1x128xf32>
    %c0_132 = arith.constant 0 : index
    %c1_133 = arith.constant 1 : index
    %c0_134 = arith.constant 0 : index
    %106 = vector.load %arg6[%c0_132, %c1_133, %c0_134] : memref<1x4x128xf32, #tpu.memory_space<vmem>>, vector<1x1x128xf32>
    %107 = vector.shape_cast %106 : vector<1x1x128xf32> to vector<1x128xf32>
    %108 = vector.shape_cast %105 : vector<1x128xf32> to vector<1x1x128xf32>
    tpu.vector_store %arg6[%c0_132, %c1_133, %c0_134], %108 {strides = array<i32>} : memref<1x4x128xf32, #tpu.memory_space<vmem>>, vector<1x1x128xf32>,
    %cst_135 = arith.constant dense<0x7F800000> : vector<128xf32>
    %109 = vector.multi_reduction <minimumf>, %94, %cst_135 [0] : vector<256x128xf32> to vector<128xf32>
    %110 = vector.shape_cast %109 : vector<128xf32> to vector<1x128xf32>
    %c0_136 = arith.constant 0 : index
    %c2_137 = arith.constant 2 : index
    %c0_138 = arith.constant 0 : index
    %111 = vector.load %arg6[%c0_136, %c2_137, %c0_138] : memref<1x4x128xf32, #tpu.memory_space<vmem>>, vector<1x1x128xf32>
    %112 = vector.shape_cast %111 : vector<1x1x128xf32> to vector<1x128xf32>
    %113 = vector.shape_cast %110 : vector<1x128xf32> to vector<1x1x128xf32>
    tpu.vector_store %arg6[%c0_136, %c2_137, %c0_138], %113 {strides = array<i32>} : memref<1x4x128xf32, #tpu.memory_space<vmem>>, vector<1x1x128xf32>,
    %cst_139 = arith.constant dense<0xFF800000> : vector<128xf32>
    %114 = vector.multi_reduction <maximumf>, %94, %cst_139 [0] : vector<256x128xf32> to vector<128xf32>
    %115 = vector.shape_cast %114 : vector<128xf32> to vector<1x128xf32>
    %c0_140 = arith.constant 0 : index
    %c3_141 = arith.constant 3 : index
    %c0_142 = arith.constant 0 : index
    %116 = vector.load %arg6[%c0_140, %c3_141, %c0_142] : memref<1x4x128xf32, #tpu.memory_space<vmem>>, vector<1x1x128xf32>
    %117 = vector.shape_cast %116 : vector<1x1x128xf32> to vector<1x128xf32>
    %118 = vector.shape_cast %115 : vector<1x128xf32> to vector<1x1x128xf32>
    tpu.vector_store %arg6[%c0_140, %c3_141, %c0_142], %118 {strides = array<i32>} : memref<1x4x128xf32, #tpu.memory_space<vmem>>, vector<1x1x128xf32>,
    return
  }
  func.func @transform_0(%arg0: i32) -> (i32, i32, i32, i32) {
    %c0_i32 = arith.constant 0 : i32
    %c0_i32_0 = arith.constant 0 : i32
    %c0_i32_1 = arith.constant 0 : i32
    %c0_i32_2 = arith.constant 0 : i32
    return %arg0, %c0_i32, %c0_i32_0, %c0_i32_1 : i32, i32, i32, i32
  }
  func.func @transform_1(%arg0: i32) -> (i32, i32) {
    %c0_i32 = arith.constant 0 : i32
    %c0_i32_0 = arith.constant 0 : i32
    %c0_i32_1 = arith.constant 0 : i32
    return %c0_i32, %c0_i32_0 : i32, i32
  }
  func.func @transform_2(%arg0: i32) -> (i32, i32) {
    %c0_i32 = arith.constant 0 : i32
    %c0_i32_0 = arith.constant 0 : i32
    %c0_i32_1 = arith.constant 0 : i32
    return %c0_i32, %c0_i32_0 : i32, i32
  }
  func.func @transform_3(%arg0: i32) -> (i32, i32, i32) {
    %c0_i32 = arith.constant 0 : i32
    %c0_i32_0 = arith.constant 0 : i32
    %c0_i32_1 = arith.constant 0 : i32
    %c0_i32_2 = arith.constant 0 : i32
    return %c0_i32, %c0_i32_0, %c0_i32_1 : i32, i32, i32
  }
  func.func @transform_4(%arg0: i32) -> (i32, i32, i32, i32) {
    %c0_i32 = arith.constant 0 : i32
    %c0_i32_0 = arith.constant 0 : i32
    %c0_i32_1 = arith.constant 0 : i32
    %c0_i32_2 = arith.constant 0 : i32
    return %arg0, %c0_i32, %c0_i32_0, %c0_i32_1 : i32, i32, i32, i32
  }
  func.func @transform_5(%arg0: i32) -> (i32, i32, i32) {
    %c0_i32 = arith.constant 0 : i32
    %c0_i32_0 = arith.constant 0 : i32
    %c0_i32_1 = arith.constant 0 : i32
    return %arg0, %c0_i32, %c0_i32_0 : i32, i32, i32
  }
}

module attributes {stable_mosaic.version = 11 : i64} {
  func.func @_bnq_mm_stats_kernel(%arg0: i32, %arg1: memref<128x128xbf16, #tpu.memory_space<vmem>>, %arg2: memref<1x128xf32, #tpu.memory_space<vmem>>, %arg3: memref<1x128xf32, #tpu.memory_space<vmem>>, %arg4: memref<128x128xbf16, #tpu.memory_space<vmem>>, %arg5: memref<128x128xbf16, #tpu.memory_space<vmem>>, %arg6: memref<1x4x128xf32, #tpu.memory_space<vmem>>) attributes {dimension_semantics = [#tpu.dimension_semantics<parallel>], iteration_bounds = array<i64: 4>, scalar_prefetch = 0 : i64, scratch_operands = 0 : i64, tpu.core_type = #tpu.core_type<tc>, window_params = [{transform_indices = @transform_0, window_bounds = array<i64: 128, 128>}, {pipeline_mode = #tpu.pipeline_mode<synchronous>, transform_indices = @transform_1, window_bounds = array<i64: 1, 128>}, {pipeline_mode = #tpu.pipeline_mode<synchronous>, transform_indices = @transform_2, window_bounds = array<i64: 1, 128>}, {pipeline_mode = #tpu.pipeline_mode<synchronous>, transform_indices = @transform_3, window_bounds = array<i64: 128, 128>}, {transform_indices = @transform_4, window_bounds = array<i64: 128, 128>}, {transform_indices = @transform_5, window_bounds = array<i64: 1, 4, 128>}]} {
    %c0 = arith.constant 0 : index
    %c0_0 = arith.constant 0 : index
    %0 = vector.load %arg1[%c0, %c0_0] : memref<128x128xbf16, #tpu.memory_space<vmem>>, vector<128x128xbf16>
    %c0_1 = arith.constant 0 : index
    %c0_2 = arith.constant 0 : index
    %1 = vector.load %arg2[%c0_1, %c0_2] : memref<1x128xf32, #tpu.memory_space<vmem>>, vector<1x128xf32>
    %2 = arith.extf %0 : vector<128x128xbf16> to vector<128x128xf32>
    %3 = vector.broadcast %1 : vector<1x128xf32> to vector<128x128xf32>
    %4 = arith.mulf %2, %3 : vector<128x128xf32>
    %c0_3 = arith.constant 0 : index
    %c0_4 = arith.constant 0 : index
    %5 = vector.load %arg3[%c0_3, %c0_4] : memref<1x128xf32, #tpu.memory_space<vmem>>, vector<1x128xf32>
    %6 = vector.broadcast %5 : vector<1x128xf32> to vector<128x128xf32>
    %7 = arith.addf %4, %6 : vector<128x128xf32>
    %8 = math.roundeven %7 : vector<128x128xf32>
    %9 = arith.truncf %8 : vector<128x128xf32> to vector<128x128xbf16>
    %c0_5 = arith.constant 0 : index
    %c0_6 = arith.constant 0 : index
    %10 = vector.load %arg4[%c0_5, %c0_6] : memref<128x128xbf16, #tpu.memory_space<vmem>>, vector<128x128xbf16>
    %cst = arith.constant dense<0.000000e+00> : vector<128x128xf32>
    %11 = tpu.matmul %9, %10, %cst {dimension_numbers = #tpu.dot_dimension_numbers<[1], [0], [0], [1], [0, 0, 1, 1], [], []>} : vector<128x128xbf16>, vector<128x128xbf16>, vector<128x128xf32> -> vector<128x128xf32>
    %12 = arith.truncf %11 : vector<128x128xf32> to vector<128x128xbf16>
    %c0_7 = arith.constant 0 : index
    %c0_8 = arith.constant 0 : index
    %13 = vector.load %arg5[%c0_7, %c0_8] : memref<128x128xbf16, #tpu.memory_space<vmem>>, vector<128x128xbf16>
    tpu.vector_store %arg5[%c0_7, %c0_8], %12 {strides = array<i32>} : memref<128x128xbf16, #tpu.memory_space<vmem>>, vector<128x128xbf16>,
    %cst_9 = arith.constant dense<0.000000e+00> : vector<128xf32>
    %14 = vector.multi_reduction <add>, %11, %cst_9 [0] : vector<128x128xf32> to vector<128xf32>
    %15 = vector.shape_cast %14 : vector<128xf32> to vector<1x128xf32>
    %c0_10 = arith.constant 0 : index
    %c0_11 = arith.constant 0 : index
    %c0_12 = arith.constant 0 : index
    %16 = vector.load %arg6[%c0_10, %c0_11, %c0_12] : memref<1x4x128xf32, #tpu.memory_space<vmem>>, vector<1x1x128xf32>
    %17 = vector.shape_cast %16 : vector<1x1x128xf32> to vector<1x128xf32>
    %18 = vector.shape_cast %15 : vector<1x128xf32> to vector<1x1x128xf32>
    tpu.vector_store %arg6[%c0_10, %c0_11, %c0_12], %18 {strides = array<i32>} : memref<1x4x128xf32, #tpu.memory_space<vmem>>, vector<1x1x128xf32>,
    %19 = arith.mulf %11, %11 : vector<128x128xf32>
    %cst_13 = arith.constant dense<0.000000e+00> : vector<128xf32>
    %20 = vector.multi_reduction <add>, %19, %cst_13 [0] : vector<128x128xf32> to vector<128xf32>
    %21 = vector.shape_cast %20 : vector<128xf32> to vector<1x128xf32>
    %c0_14 = arith.constant 0 : index
    %c1 = arith.constant 1 : index
    %c0_15 = arith.constant 0 : index
    %22 = vector.load %arg6[%c0_14, %c1, %c0_15] : memref<1x4x128xf32, #tpu.memory_space<vmem>>, vector<1x1x128xf32>
    %23 = vector.shape_cast %22 : vector<1x1x128xf32> to vector<1x128xf32>
    %24 = vector.shape_cast %21 : vector<1x128xf32> to vector<1x1x128xf32>
    tpu.vector_store %arg6[%c0_14, %c1, %c0_15], %24 {strides = array<i32>} : memref<1x4x128xf32, #tpu.memory_space<vmem>>, vector<1x1x128xf32>,
    %cst_16 = arith.constant dense<0x7F800000> : vector<128xf32>
    %25 = vector.multi_reduction <minimumf>, %11, %cst_16 [0] : vector<128x128xf32> to vector<128xf32>
    %26 = vector.shape_cast %25 : vector<128xf32> to vector<1x128xf32>
    %c0_17 = arith.constant 0 : index
    %c2 = arith.constant 2 : index
    %c0_18 = arith.constant 0 : index
    %27 = vector.load %arg6[%c0_17, %c2, %c0_18] : memref<1x4x128xf32, #tpu.memory_space<vmem>>, vector<1x1x128xf32>
    %28 = vector.shape_cast %27 : vector<1x1x128xf32> to vector<1x128xf32>
    %29 = vector.shape_cast %26 : vector<1x128xf32> to vector<1x1x128xf32>
    tpu.vector_store %arg6[%c0_17, %c2, %c0_18], %29 {strides = array<i32>} : memref<1x4x128xf32, #tpu.memory_space<vmem>>, vector<1x1x128xf32>,
    %cst_19 = arith.constant dense<0xFF800000> : vector<128xf32>
    %30 = vector.multi_reduction <maximumf>, %11, %cst_19 [0] : vector<128x128xf32> to vector<128xf32>
    %31 = vector.shape_cast %30 : vector<128xf32> to vector<1x128xf32>
    %c0_20 = arith.constant 0 : index
    %c3 = arith.constant 3 : index
    %c0_21 = arith.constant 0 : index
    %32 = vector.load %arg6[%c0_20, %c3, %c0_21] : memref<1x4x128xf32, #tpu.memory_space<vmem>>, vector<1x1x128xf32>
    %33 = vector.shape_cast %32 : vector<1x1x128xf32> to vector<1x128xf32>
    %34 = vector.shape_cast %31 : vector<1x128xf32> to vector<1x1x128xf32>
    tpu.vector_store %arg6[%c0_20, %c3, %c0_21], %34 {strides = array<i32>} : memref<1x4x128xf32, #tpu.memory_space<vmem>>, vector<1x1x128xf32>,
    return
  }
  func.func @transform_0(%arg0: i32) -> (i32, i32) {
    %c0_i32 = arith.constant 0 : i32
    %c0_i32_0 = arith.constant 0 : i32
    return %arg0, %c0_i32 : i32, i32
  }
  func.func @transform_1(%arg0: i32) -> (i32, i32) {
    %c0_i32 = arith.constant 0 : i32
    %c0_i32_0 = arith.constant 0 : i32
    %c0_i32_1 = arith.constant 0 : i32
    return %c0_i32, %c0_i32_0 : i32, i32
  }
  func.func @transform_2(%arg0: i32) -> (i32, i32) {
    %c0_i32 = arith.constant 0 : i32
    %c0_i32_0 = arith.constant 0 : i32
    %c0_i32_1 = arith.constant 0 : i32
    return %c0_i32, %c0_i32_0 : i32, i32
  }
  func.func @transform_3(%arg0: i32) -> (i32, i32) {
    %c0_i32 = arith.constant 0 : i32
    %c0_i32_0 = arith.constant 0 : i32
    %c0_i32_1 = arith.constant 0 : i32
    return %c0_i32, %c0_i32_0 : i32, i32
  }
  func.func @transform_4(%arg0: i32) -> (i32, i32) {
    %c0_i32 = arith.constant 0 : i32
    %c0_i32_0 = arith.constant 0 : i32
    return %arg0, %c0_i32 : i32, i32
  }
  func.func @transform_5(%arg0: i32) -> (i32, i32, i32) {
    %c0_i32 = arith.constant 0 : i32
    %c0_i32_0 = arith.constant 0 : i32
    %c0_i32_1 = arith.constant 0 : i32
    return %arg0, %c0_i32, %c0_i32_0 : i32, i32, i32
  }
}

module attributes {stable_mosaic.version = 11 : i64} {
  func.func @_bn_residual_kernel(%arg0: i32, %arg1: memref<128x128xbf16, #tpu.memory_space<vmem>>, %arg2: memref<1x128xf32, #tpu.memory_space<vmem>>, %arg3: memref<1x128xf32, #tpu.memory_space<vmem>>, %arg4: memref<128x128xbf16, #tpu.memory_space<vmem>>, %arg5: memref<128x128xf32, #tpu.memory_space<vmem>>) attributes {dimension_semantics = [#tpu.dimension_semantics<parallel>], iteration_bounds = array<i64: 4>, scalar_prefetch = 0 : i64, scratch_operands = 0 : i64, tpu.core_type = #tpu.core_type<tc>, window_params = [{transform_indices = @transform_0, window_bounds = array<i64: 128, 128>}, {pipeline_mode = #tpu.pipeline_mode<synchronous>, transform_indices = @transform_1, window_bounds = array<i64: 1, 128>}, {pipeline_mode = #tpu.pipeline_mode<synchronous>, transform_indices = @transform_2, window_bounds = array<i64: 1, 128>}, {transform_indices = @transform_3, window_bounds = array<i64: 128, 128>}, {transform_indices = @transform_4, window_bounds = array<i64: 128, 128>}]} {
    %c0 = arith.constant 0 : index
    %c0_0 = arith.constant 0 : index
    %0 = vector.load %arg1[%c0, %c0_0] : memref<128x128xbf16, #tpu.memory_space<vmem>>, vector<128x128xbf16>
    %c0_1 = arith.constant 0 : index
    %c0_2 = arith.constant 0 : index
    %1 = vector.load %arg2[%c0_1, %c0_2] : memref<1x128xf32, #tpu.memory_space<vmem>>, vector<1x128xf32>
    %2 = arith.extf %0 : vector<128x128xbf16> to vector<128x128xf32>
    %3 = vector.broadcast %1 : vector<1x128xf32> to vector<128x128xf32>
    %4 = arith.mulf %2, %3 : vector<128x128xf32>
    %c0_3 = arith.constant 0 : index
    %c0_4 = arith.constant 0 : index
    %5 = vector.load %arg3[%c0_3, %c0_4] : memref<1x128xf32, #tpu.memory_space<vmem>>, vector<1x128xf32>
    %6 = vector.broadcast %5 : vector<1x128xf32> to vector<128x128xf32>
    %7 = arith.addf %4, %6 : vector<128x128xf32>
    %c0_5 = arith.constant 0 : index
    %c0_6 = arith.constant 0 : index
    %8 = vector.load %arg4[%c0_5, %c0_6] : memref<128x128xbf16, #tpu.memory_space<vmem>>, vector<128x128xbf16>
    %9 = arith.extf %8 : vector<128x128xbf16> to vector<128x128xf32>
    %10 = arith.addf %7, %9 : vector<128x128xf32>
    %c0_7 = arith.constant 0 : index
    %c0_8 = arith.constant 0 : index
    %11 = vector.load %arg5[%c0_7, %c0_8] : memref<128x128xf32, #tpu.memory_space<vmem>>, vector<128x128xf32>
    tpu.vector_store %arg5[%c0_7, %c0_8], %10 {strides = array<i32>} : memref<128x128xf32, #tpu.memory_space<vmem>>, vector<128x128xf32>,
    return
  }
  func.func @transform_0(%arg0: i32) -> (i32, i32) {
    %c0_i32 = arith.constant 0 : i32
    %c0_i32_0 = arith.constant 0 : i32
    return %arg0, %c0_i32 : i32, i32
  }
  func.func @transform_1(%arg0: i32) -> (i32, i32) {
    %c0_i32 = arith.constant 0 : i32
    %c0_i32_0 = arith.constant 0 : i32
    %c0_i32_1 = arith.constant 0 : i32
    return %c0_i32, %c0_i32_0 : i32, i32
  }
  func.func @transform_2(%arg0: i32) -> (i32, i32) {
    %c0_i32 = arith.constant 0 : i32
    %c0_i32_0 = arith.constant 0 : i32
    %c0_i32_1 = arith.constant 0 : i32
    return %c0_i32, %c0_i32_0 : i32, i32
  }
  func.func @transform_3(%arg0: i32) -> (i32, i32) {
    %c0_i32 = arith.constant 0 : i32
    %c0_i32_0 = arith.constant 0 : i32
    return %arg0, %c0_i32 : i32, i32
  }
  func.func @transform_4(%arg0: i32) -> (i32, i32) {
    %c0_i32 = arith.constant 0 : i32
    %c0_i32_0 = arith.constant 0 : i32
    return %arg0, %c0_i32 : i32, i32
  }
}

</mosaic_0001>

<bundles_post_ra>
// kernel: forward.4
= control target key start
LH: loop header
LB: loop body
LE: loop exit
PB: predicated region body
PF: predicated region fallthrough
CT: control target
= control target key end

     0   :  { %s905_s12 = smov 0   ;;  %s1053_s0 = inlined_call_operand.vmem [shape: bf16[512,128], index: 0, kind: input, shape index: {}]   ;;  %s1054_s1 = inlined_call_operand.vmem [shape: bf16[128,128], index: 1, kind: input, shape index: {}]   ;;  %s1055_s2 = inlined_call_operand.vmem [shape: bf16[512,128], index: 2, kind: output, shape index: {0}]   ;;  %s1056_s3 = inlined_call_operand.vmem [shape: f32[4,4,128], index: 3, kind: output, shape index: {1}]  }
   0x1 LB: > { %s911_s13 = sadd.s32 4294967295, %s883_s12   ;;  %p686_p0 = scmp.ge.s32.totalorder %s883_s12, 1  ;;  %s883_s12 = sphi %s905_s12, %s14_s12  }
   0x2   : > { %p141_p1 = scmp.lt.s32.totalorder %s883_s12, 5 }
   0x4   : > { %p142_p2 = pnand %p686_p0, %p141_p1 }
   0x5   : > { %v861_v0 = vld [vmem:[%s1054_s1] sm:$0xff] (!%p142_p2)   ;;  %s687_s16 = sshll.u32 (!%p142_p2), %s911_s13, 4  ;;  %v862_v1 = vld [vmem:[%s1054_s1 + $0x8] sm:$0xff] (!%p142_p2)   ;;  %v863_v2 = vld [vmem:[%s1054_s1 + $0x10] sm:$0xff] (!%p142_p2)   ;;  %p181_p4 = scmp.lt.s32.totalorder (!%p142_p2), %s911_s13, 3 }
   0x6   : > { %145 = sbr.rel (%p142_p2) target bundleno = 301 (0x12d), region = 28  ;;  %p170_p3 = scmp.lt.s32.totalorder (!%p142_p2), %s687_s16, 63  ;;  %805 = vmatprep.subr.bf16.mxu0 (!%p142_p2), %v861_v0  ;;  %837 = vmatprep.subr.bf16.mxu1 (!%p142_p2), %v861_v0  ;;  %v864_v3 = vld [vmem:[%s1054_s1 + $0x18] sm:$0xff] (!%p142_p2)   ;;  %v865_v6 = vld [vmem:[%s1054_s1 + $0x20] sm:$0xff] (!%p142_p2)   ;;  %v866_v7 = vld [vmem:[%s1054_s1 + $0x28] sm:$0xff] (!%p142_p2)  }
   0x7   : > { %806 = vmatpush3.bf16.msra.mxu0 (!%p142_p2), %v861_v0  ;;  %845 = vmatpush3.bf16.msra.mxu1 (!%p142_p2), %v861_v0  ;;  %v867_v8 = vld [vmem:[%s1054_s1 + $0x30] sm:$0xff] (!%p142_p2)   ;;  %v868_v9 = vld [vmem:[%s1054_s1 + $0x38] sm:$0xff] (!%p142_p2)  }
   0x8   : > { %807 = vmatprep.subr.bf16.mxu0 (!%p142_p2), %v862_v1  ;;  %838 = vmatprep.subr.bf16.mxu1 (!%p142_p2), %v862_v1 }
   0xb   : > { %808 = vmatpush3.bf16.msra.mxu0 (!%p142_p2), %v862_v1  ;;  %846 = vmatpush3.bf16.msra.mxu1 (!%p142_p2), %v862_v1 }
   0xc   : > { %809 = vmatprep.subr.bf16.mxu0 (!%p142_p2), %v863_v2  ;;  %839 = vmatprep.subr.bf16.mxu1 (!%p142_p2), %v863_v2 }
   0xd   : > { %s1058_s16 = smov (!%p170_p3, %s687_s16), 63  ;;  %s1060_s13 = smov (!%p181_p4, %s911_s13), 3 }
   0xe   : > { %s688_s21 = sshll.u32 %s1058_s16, 2  ;;  %s691_s11 = sshll.u32 %s1060_s13, 2 }
   0xf   : > { %s933_s24 = scalar_lea.vmem %s1053_s0, %s688_s21  ;;  %810 = vmatpush3.bf16.msra.mxu0 %v863_v2  ;;  %847 = vmatpush3.bf16.msra.mxu1 %v863_v2  ;;  %s967_s10 = scalar_lea.vmem %s1055_s2, %s688_s21 }
  0x10   : > { %v869_v4 = vld [vmem:[%s933_s24] sm:$0xff]   ;;  %811 = vmatprep.subr.bf16.mxu0 %v864_v3  ;;  %840 = vmatprep.subr.bf16.mxu1 %v864_v3  ;;  %v870_v10 = vld [vmem:[%s933_s24 + $0x8] sm:$0xff]   ;;  %v873_v12 = vld [vmem:[%s933_s24 + $0x10] sm:$0xff]   ;;  %s184_s16 = scalar_lea.vmem %s1056_s3, %s691_s11 }
  0x11   : > { %821 = vmatprep.mubr.bf16.mxu0 %v869_v4  ;;  %v871_v5 = vld [vmem:[%s933_s24 + $0x20] sm:$0xff]   ;;  %v872_v11 = vld [vmem:[%s933_s24 + $0x28] sm:$0xff]   ;;  %v875_v13 = vld [vmem:[%s933_s24 + $0x30] sm:$0xff]  }
  0x12   : > { %829 = vmatprep.mubr.bf16.mxu1 %v871_v5  ;;  %v874_v14 = vld [vmem:[%s933_s24 + $0x18] sm:$0xff]  }
  0x13   : > { %812 = vmatpush3.bf16.msra.mxu0 %v864_v3  ;;  %848 = vmatpush3.bf16.msra.mxu1 %v864_v3  ;;  %v876_v15 = vld [vmem:[%s933_s24 + $0x38] sm:$0xff]  }
  0x14   : > { %813 = vmatprep.subr.bf16.mxu0 %v865_v6  ;;  %841 = vmatprep.subr.bf16.mxu1 %v865_v6 }
  0x17   : > { %814 = vmatpush3.bf16.msra.mxu0 %v865_v6  ;;  %849 = vmatpush3.bf16.msra.mxu1 %v865_v6 }
  0x18   : > { %815 = vmatprep.subr.bf16.mxu0 %v866_v7  ;;  %842 = vmatprep.subr.bf16.mxu1 %v866_v7 }
  0x1b   : > { %816 = vmatpush3.bf16.msra.mxu0 %v866_v7  ;;  %850 = vmatpush3.bf16.msra.mxu1 %v866_v7 }
  0x1c   : > { %817 = vmatprep.subr.bf16.mxu0 %v867_v8  ;;  %843 = vmatprep.subr.bf16.mxu1 %v867_v8 }
  0x1f   : > { %818 = vmatpush3.bf16.msra.mxu0 %v867_v8  ;;  %851 = vmatpush3.bf16.msra.mxu1 %v867_v8 }
  0x20   : > { %819 = vmatprep.subr.bf16.mxu0 %v868_v9  ;;  %844 = vmatprep.subr.bf16.mxu1 %v868_v9 }
  0x23   : > { %820 = vmatpush3.bf16.msra.mxu0 %v868_v9  ;;  %852 = vmatpush3.bf16.msra.mxu1 %v868_v9 }
  0x26   : > { %822 = vmatmul.mubr.bf16.vlgmr.msra.gmra.mrb[0].mxu0 %v870_v10  ;;  %830 = vmatmul.mubr.bf16.vlgmr.msra.gmra.mrb[0].mxu1 %v872_v11 }
  0x27   : > { %825 = vmatprep.mubr.bf16.mxu0 %v873_v12  ;;  %833 = vmatprep.mubr.bf16.mxu1 %v875_v13 }
  0x2e   : > { %826 = vmatmul.mubr.bf16.gmra.mrb[4].mxu0 %v874_v14  ;;  %834 = vmatmul.mubr.bf16.gmra.mrb[4].mxu1 %v876_v15 }
  0xf9   : > { %v823_v16 = vpop.f32.mrb[0].mxu0  ;;  %v958_v17 = vpop.f32.mrb[0].mxu1 }
  0xfa   : > { %v348_v18 = vpop.f32.mrb[1].mxu0  ;;  %v960_v19 = vpop.f32.mrb[1].mxu1  ;;  %v515_v31 = vmul.f32 %v823_v16, %v823_v16 }
  0xfb   : > { %v824_v20 = vpop.f32.mrb[2].mxu0  ;;  %v969_v21 = vpop.f32.mrb[2].mxu1  ;;  %v513_v22 = vmul.f32 %v348_v18, %v348_v18  ;;  %v521_v6 = vmul.f32 %v960_v19, %v960_v19 }
  0xfc   : > { %v750_v23 = vpack.c.bf16 %v824_v20, %v823_v16  ;;  %v971_v24 = vpop.f32.mrb[3].mxu0  ;;  %v770_v25 = vpack.c.bf16 %v969_v21, %v958_v17  ;;  %v975_v26 = vpop.f32.mrb[3].mxu1  ;;  %v516_v42 = vmul.f32 %v824_v20, %v824_v20 }
  0xfd   : > { %v745_v27 = vpack.c.bf16 %v971_v24, %v348_v18  ;;  %v491_v28 = vadd.f32 %v971_v24, %v348_v18  ;;  %v514_v29 = vmul.f32 %v971_v24, %v971_v24  ;;  %v765_v30 = vpack.c.bf16 %v975_v26, %v960_v19 }
  0xfe   : > { %782 = vst [vmem:[%s967_s10 + $0x8] sm:$0xff] %v750_v23   ;;  %786 = vst [vmem:[%s967_s10 + $0x28] sm:$0xff] %v770_v25  }
  0xff   : > { %746 = vst [vmem:[%s967_s10] sm:$0xff] %v745_v27   ;;  %v492_v32 = vadd.f32 %v823_v16, %v491_v28  ;;  %v529_v33 = vadd.f32 %v514_v29, %v513_v22  ;;  %785 = vst [vmem:[%s967_s10 + $0x20] sm:$0xff] %v765_v30  }
 0x101   : > { %v530_v34 = vadd.f32 %v529_v33, %v515_v31  ;;  %v827_v35 = vpop.f32.mrb[4].mxu0  ;;  %v493_v36 = vadd.f32 %v824_v20, %v492_v32  ;;  %v987_v37 = vpop.f32.mrb[4].mxu1  ;;  %v522_v33 = vmul.f32 %v975_v26, %v975_v26 }
 0x102   : > { %v553_v38 = vmin.f32 %v823_v16, %v827_v35  ;;  %v575_v39 = vmax.f32 %v823_v16, %v827_v35  ;;  %v364_v40 = vpop.f32.mrb[5].mxu0  ;;  %v989_v41 = vpop.f32.mrb[5].mxu1  ;;  %v519_v10 = vmul.f32 %v827_v35, %v827_v35 }
 0x103   : > { %v551_v43 = vmin.f32 %v348_v18, %v364_v40  ;;  %v573_v44 = vmax.f32 %v348_v18, %v364_v40  ;;  %v828_v45 = vpop.f32.mrb[6].mxu0  ;;  %v494_v46 = vadd.f32 %v493_v36, %v364_v40  ;;  %v991_v47 = vpop.f32.mrb[6].mxu1  ;;  %v517_v50 = vmul.f32 %v364_v40, %v364_v40 }
 0x104   : > { %v557_v48 = vmin.f32 %v553_v38, %v958_v17  ;;  %v579_v49 = vmax.f32 %v575_v39, %v958_v17  ;;  %v760_v51 = vpack.c.bf16 %v828_v45, %v827_v35  ;;  %v367_v52 = vpop.f32.mrb[7].mxu0  ;;  %v995_v53 = vpop.f32.mrb[7].mxu1  ;;  %v554_v56 = vmin.f32 %v824_v20, %v828_v45 }
 0x105   : > { %v555_v54 = vmin.f32 %v551_v43, %v960_v19  ;;  %v577_v55 = vmax.f32 %v573_v44, %v960_v19  ;;  %v576_v57 = vmax.f32 %v824_v20, %v828_v45  ;;  %v755_v58 = vpack.c.bf16 %v367_v52, %v364_v40 }
 0x106   : > { %784 = vst [vmem:[%s967_s10 + $0x18] sm:$0xff] %v760_v51   ;;  %v495_v59 = vadd.f32 %v494_v46, %v367_v52  ;;  %v518_v60 = vmul.f32 %v367_v52, %v367_v52  ;;  %v531_v61 = vadd.f32 %v530_v34, %v516_v42  ;;  %v558_v62 = vmin.f32 %v554_v56, %v969_v21 }
 0x107   : > { %v580_v63 = vmax.f32 %v576_v57, %v969_v21  ;;  %v552_v0 = vmin.f32 %v971_v24, %v367_v52  ;;  %v574_v1 = vmax.f32 %v971_v24, %v367_v52  ;;  %783 = vst [vmem:[%s967_s10 + $0x10] sm:$0xff] %v755_v58   ;;  %v561_v4 = vmin.f32 %v557_v48, %v987_v37 }
 0x108   : > { %v496_v2 = vadd.f32 %v827_v35, %v495_v59  ;;  %v532_v3 = vadd.f32 %v531_v61, %v517_v50  ;;  %v583_v5 = vmax.f32 %v579_v49, %v987_v37  ;;  %v559_v7 = vmin.f32 %v555_v54, %v989_v41 }
 0x109   : > { %v581_v8 = vmax.f32 %v577_v55, %v989_v41  ;;  %v780_v9 = vpack.c.bf16 %v991_v47, %v987_v37  ;;  %v562_v13 = vmin.f32 %v558_v62, %v991_v47  ;;  %v520_v14 = vmul.f32 %v828_v45, %v828_v45 }
 0x10a   : > { %v497_v11 = vadd.f32 %v828_v45, %v496_v2  ;;  %v533_v12 = vadd.f32 %v532_v3, %v518_v60  ;;  %v584_v15 = vmax.f32 %v580_v63, %v991_v47  ;;  %v775_v16 = vpack.c.bf16 %v995_v53, %v989_v41 }
 0x10b   : > { %788 = vst [vmem:[%s967_s10 + $0x38] sm:$0xff] %v780_v9   ;;  %v556_v18 = vmin.f32 %v552_v0, %v975_v26  ;;  %v564_v23 = vmin.f32 %v561_v4, %v562_v13  ;;  %v578_v24 = vmax.f32 %v574_v1, %v975_v26  ;;  %v523_v36 = vmul.f32 %v958_v17, %v958_v17 }
 0x10c   : > { %v534_v20 = vadd.f32 %v533_v12, %v519_v10  ;;  %v498_v22 = vadd.f32 %v497_v11, %v960_v19  ;;  %v586_v25 = vmax.f32 %v583_v5, %v584_v15  ;;  %787 = vst [vmem:[%s967_s10 + $0x30] sm:$0xff] %v775_v16   ;;  %v524_v42 = vmul.f32 %v969_v21, %v969_v21 }
 0x10d   : > { %v560_v27 = vmin.f32 %v556_v18, %v995_v53  ;;  %v582_v30 = vmax.f32 %v578_v24, %v995_v53  ;;  %v525_v45 = vmul.f32 %v989_v41, %v989_v41  ;;  %v528_v61 = vmul.f32 %v991_v47, %v991_v47 }
 0x10e   : > { %v535_v28 = vadd.f32 %v534_v20, %v520_v14  ;;  %v499_v29 = vadd.f32 %v498_v22, %v975_v26 }
 0x10f   : > { %v563_v31 = vmin.f32 %v559_v7, %v560_v27  ;;  %v585_v34 = vmax.f32 %v581_v8, %v582_v30 }
 0x110   : > { %v500_v32 = vadd.f32 %v958_v17, %v499_v29  ;;  %v536_v19 = vadd.f32 %v535_v28, %v521_v6 }
 0x111   : > { %v565_v35 = vmin.f32 %v563_v31, %v564_v23  ;;  %v587_v40 = vmax.f32 %v585_v34, %v586_v25 }
 0x112   : > { %v537_v38 = vadd.f32 %v536_v19, %v522_v33  ;;  %v501_v39 = vadd.f32 %v969_v21, %v500_v32  ;;  %v526_v21 = vmul.f32 %v995_v53, %v995_v53 }
 0x113   : > { %v566_v43 = vrot.slane %v565_v35, 4  ;;  %v588_v46 = vrot.slane %v587_v40, 4 }
 0x114   : > { %v538_v44 = vadd.f32 %v537_v38, %v523_v36  ;;  %v502_v26 = vadd.f32 %v501_v39, %v989_v41  ;;  %v527_v41 = vmul.f32 %v987_v37, %v987_v37 }
 0x115   : > { %v567_v48 = vmin.f32 %v565_v35, %v566_v43  ;;  %v589_v50 = vmax.f32 %v587_v40, %v588_v46 }
 0x116   : > { %v503_v49 = vadd.f32 %v502_v26, %v995_v53  ;;  %v539_v17 = vadd.f32 %v538_v44, %v524_v42 }
 0x117   : > { %v568_v51 = vrot.slane %v567_v48, 2  ;;  %v590_v55 = vrot.slane %v589_v50, 2 }
 0x118   : > { %v504_v52 = vadd.f32 %v987_v37, %v503_v49  ;;  %v540_v54 = vadd.f32 %v539_v17, %v525_v45 }
 0x119   : > { %v569_v56 = vmin.f32 %v567_v48, %v568_v51  ;;  %v591_v59 = vmax.f32 %v589_v50, %v590_v55 }
 0x11a   : > { %v505_v57 = vadd.f32 %v991_v47, %v504_v52  ;;  %v541_v58 = vadd.f32 %v540_v54, %v526_v21 }
 0x11b   : > { %v570_v60 = vrot.slane %v569_v56, 1  ;;  %v592_v63 = vrot.slane %v591_v59, 1 }
 0x11c   : > { %v506_v53 = vrot.slane %v505_v57, 4  ;;  %v542_v62 = vadd.f32 %v541_v58, %v527_v41 }
 0x11d   : > { %v571_v0 = vmin.f32 %v569_v56, %v570_v60  ;;  %v593_v3 = vmax.f32 %v591_v59, %v592_v63 }
 0x11e   : > { %v507_v1 = vadd.f32 %v506_v53, %v505_v57  ;;  %v543_v2 = vadd.f32 %v542_v62, %v528_v61 }
 0x11f   : > { %572 = vst [vmem:[%s184_s16 + $0x2] sm:$0x1] %v571_v0  ;;  %594 = vst [vmem:[%s184_s16 + $0x3] sm:$0x1] %v593_v3 }
 0x120   : > { %v508_v37 = vrot.slane %v507_v1, 2  ;;  %v544_v4 = vrot.slane %v543_v2, 4 }
 0x122   : > { %v509_v5 = vadd.f32 %v508_v37, %v507_v1  ;;  %v545_v6 = vadd.f32 %v544_v4, %v543_v2 }
 0x124   : > { %v510_v7 = vrot.slane %v509_v5, 1  ;;  %v546_v8 = vrot.slane %v545_v6, 2 }
 0x126   : > { %v511_v47 = vadd.f32 %v510_v7, %v509_v5  ;;  %v547_v9 = vadd.f32 %v546_v8, %v545_v6 }
 0x128   : > { %512 = vst [vmem:[%s184_s16] sm:$0x1] %v511_v47  ;;  %v548_v10 = vrot.slane %v547_v9, 1 }
 0x12a   : > { %v549_v11 = vadd.f32 %v548_v10, %v547_v9 }
 0x12c   : > { %550 = vst [vmem:[%s184_s16 + $0x1] sm:$0x1] %v549_v11 }
 0x12d PF: > { %s14_s12 = sadd.s32 1, %s883_s12  }
 0x12e   : > { %p11_p5 = scmp.ge.s32.totalorder %s14_s12, 6  }
 0x130   :  { %13 = sbr.rel (!%p11_p5) target bundleno = 1 (0x1), region = 70 }

// kernel: forward.6
= control target key start
LH: loop header
LB: loop body
LE: loop exit
PB: predicated region body
PF: predicated region fallthrough
CT: control target
= control target key end

     0   :  { %s1048_s18 = smov 0   ;;  %s1238_s0 = inlined_call_operand.vmem [shape: bf16[512,128], index: 0, kind: input, shape index: {}]   ;;  %s1239_s1 = inlined_call_operand.vmem [shape: f32[1,128], index: 1, kind: input, shape index: {}]   ;;  %s1240_s2 = inlined_call_operand.vmem [shape: f32[1,128], index: 2, kind: input, shape index: {}]   ;;  %s1241_s3 = inlined_call_operand.vmem [shape: bf16[128,128], index: 3, kind: input, shape index: {}]   ;;  %s1242_s4 = inlined_call_operand.vmem [shape: bf16[512,128], index: 4, kind: output, shape index: {0}]   ;;  %s1243_s5 = inlined_call_operand.vmem [shape: f32[4,4,128], index: 5, kind: output, shape index: {1}]  }
   0x1 LB: > { %s1054_s19 = sadd.s32 4294967295, %s1016_s18   ;;  %p778_p0 = scmp.ge.s32.totalorder %s1016_s18, 1  ;;  %s1016_s18 = sphi %s1048_s18, %s16_s18  }
   0x2   : > { %p191_p1 = scmp.lt.s32.totalorder %s1016_s18, 5 }
   0x4   : > { %p192_p2 = pnand %p778_p0, %p191_p1 }
   0x5   : > { %v1002_v0 = vld [vmem:[%s1241_s3] sm:$0xff] (!%p192_p2)   ;;  %s779_s22 = sshll.u32 (!%p192_p2), %s1054_s19, 4  ;;  %v1003_v1 = vld [vmem:[%s1241_s3 + $0x8] sm:$0xff] (!%p192_p2)   ;;  %v1004_v2 = vld [vmem:[%s1241_s3 + $0x10] sm:$0xff] (!%p192_p2)   ;;  %p235_p4 = scmp.lt.s32.totalorder (!%p192_p2), %s1054_s19, 3 }
   0x6   : > { %195 = sbr.rel (%p192_p2) target bundleno = 301 (0x12d), region = 36  ;;  %p224_p3 = scmp.lt.s32.totalorder (!%p192_p2), %s779_s22, 63  ;;  %930 = vmatprep.subr.bf16.mxu0 (!%p192_p2), %v1002_v0  ;;  %962 = vmatprep.subr.bf16.mxu1 (!%p192_p2), %v1002_v0  ;;  %v1005_v3 = vld [vmem:[%s1241_s3 + $0x18] sm:$0xff] (!%p192_p2)   ;;  %v1085_v5 = vld [vmem:[%s1239_s1] ss:$0 sm:$0xff] (!%p192_p2)  ;;  %v1007_v31 = vld [vmem:[%s1241_s3 + $0x28] sm:$0xff] (!%p192_p2)  }
   0x7   : > { %931 = vmatpush3.bf16.msra.mxu0 (!%p192_p2), %v1002_v0  ;;  %970 = vmatpush3.bf16.msra.mxu1 (!%p192_p2), %v1002_v0  ;;  %v1093_v11 = vld [vmem:[%s1240_s2] ss:$0 sm:$0xff] (!%p192_p2)  ;;  %v1008_v47 = vld [vmem:[%s1241_s3 + $0x30] sm:$0xff] (!%p192_p2)   ;;  %v1009_v62 = vld [vmem:[%s1241_s3 + $0x38] sm:$0xff] (!%p192_p2)  }
   0x8   : > { %932 = vmatprep.subr.bf16.mxu0 (!%p192_p2), %v1003_v1  ;;  %963 = vmatprep.subr.bf16.mxu1 (!%p192_p2), %v1003_v1  ;;  %v1006_v16 = vld [vmem:[%s1241_s3 + $0x20] sm:$0xff] (!%p192_p2)  }
   0xb   : > { %933 = vmatpush3.bf16.msra.mxu0 (!%p192_p2), %v1003_v1  ;;  %971 = vmatpush3.bf16.msra.mxu1 (!%p192_p2), %v1003_v1 }
   0xc   : > { %934 = vmatprep.subr.bf16.mxu0 (!%p192_p2), %v1004_v2  ;;  %964 = vmatprep.subr.bf16.mxu1 (!%p192_p2), %v1004_v2 }
   0xd   : > { %s1245_s22 = smov (!%p224_p3, %s779_s22), 63  ;;  %s1247_s19 = smov (!%p235_p4, %s1054_s19), 3 }
   0xe   : > { %s780_s27 = sshll.u32 %s1245_s22, 2  ;;  %s783_s22 = sshll.u32 %s1247_s19, 2 }
   0xf   : > { %s1076_s30 = scalar_lea.vmem %s1238_s0, %s780_s27  ;;  %935 = vmatpush3.bf16.msra.mxu0 %v1004_v2  ;;  %972 = vmatpush3.bf16.msra.mxu1 %v1004_v2  ;;  %s1152_s25 = scalar_lea.vmem %s1242_s4, %s780_s27 }
  0x10   : > { %v829_v4 = vld [vmem:[%s1076_s30] sm:$0xff]   ;;  %v900_v8 = vld [vmem:[%s1076_s30 + $0x8] sm:$0xff]   ;;  %936 = vmatprep.subr.bf16.mxu0 %v1005_v3  ;;  %965 = vmatprep.subr.bf16.mxu1 %v1005_v3  ;;  %v901_v21 = vld [vmem:[%s1076_s30 + $0x10] sm:$0xff]   ;;  %s238_s28 = scalar_lea.vmem %s1243_s5, %s783_s22 }
  0x11   : > { %v830_v6 = vunpack.c.l.bf16 %v829_v4  ;;  %v831_v7 = vunpack.c.h.bf16 %v829_v4  ;;  %v903_v9 = vld [vmem:[%s1076_s30 + $0x20] sm:$0xff]   ;;  %v904_v10 = vld [vmem:[%s1076_s30 + $0x28] sm:$0xff]   ;;  %v834_v17 = vunpack.c.l.bf16 %v900_v8  ;;  %v835_v18 = vunpack.c.h.bf16 %v900_v8  ;;  %v905_v36 = vld [vmem:[%s1076_s30 + $0x30] sm:$0xff]  }
  0x12   : > { %v846_v12 = vunpack.c.l.bf16 %v903_v9  ;;  %v847_v13 = vunpack.c.h.bf16 %v903_v9  ;;  %v850_v20 = vunpack.c.l.bf16 %v904_v10  ;;  %v851_v25 = vunpack.c.h.bf16 %v904_v10  ;;  %v902_v41 = vld [vmem:[%s1076_s30 + $0x18] sm:$0xff]  }
  0x13   : > { %v279_v14 = vmul.f32 %v830_v6, %v1085_v5  ;;  %v280_v15 = vmul.f32 %v831_v7, %v1085_v5  ;;  %937 = vmatpush3.bf16.msra.mxu0 %v1005_v3  ;;  %973 = vmatpush3.bf16.msra.mxu1 %v1005_v3  ;;  %v838_v30 = vunpack.c.l.bf16 %v901_v21  ;;  %v281_v32 = vmul.f32 %v834_v17, %v1085_v5  ;;  %v906_v46 = vld [vmem:[%s1076_s30 + $0x38] sm:$0xff]  }
  0x14   : > { %v287_v19 = vmul.f32 %v846_v12, %v1085_v5  ;;  %v288_v24 = vmul.f32 %v847_v13, %v1085_v5  ;;  %938 = vmatprep.subr.bf16.mxu0 %v1006_v16  ;;  %966 = vmatprep.subr.bf16.mxu1 %v1006_v16  ;;  %v282_v33 = vmul.f32 %v835_v18, %v1085_v5  ;;  %v839_v40 = vunpack.c.h.bf16 %v901_v21 }
  0x15   : > { %v302_v22 = vadd.f32 %v1093_v11, %v279_v14  ;;  %v303_v23 = vadd.f32 %v1093_v11, %v280_v15  ;;  %v289_v35 = vmul.f32 %v850_v20, %v1085_v5  ;;  %v290_v39 = vmul.f32 %v851_v25, %v1085_v5 }
  0x16   : > { %v310_v26 = vadd.f32 %v1093_v11, %v287_v19  ;;  %v311_v29 = vadd.f32 %v1093_v11, %v288_v24  ;;  %v283_v43 = vmul.f32 %v838_v30, %v1085_v5  ;;  %v284_v44 = vmul.f32 %v839_v40, %v1085_v5 }
  0x17   : > { %v978_v27 = vround.rtne.f32 %v302_v22  ;;  %v979_v28 = vround.rtne.f32 %v303_v23  ;;  %939 = vmatpush3.bf16.msra.mxu0 %v1006_v16  ;;  %974 = vmatpush3.bf16.msra.mxu1 %v1006_v16  ;;  %v854_v45 = vunpack.c.l.bf16 %v905_v36  ;;  %v304_v48 = vadd.f32 %v1093_v11, %v281_v32 }
  0x18   : > { %v986_v34 = vround.rtne.f32 %v310_v26  ;;  %v987_v38 = vround.rtne.f32 %v311_v29  ;;  %940 = vmatprep.subr.bf16.mxu0 %v1007_v31  ;;  %967 = vmatprep.subr.bf16.mxu1 %v1007_v31  ;;  %v305_v49 = vadd.f32 %v1093_v11, %v282_v33  ;;  %v855_v50 = vunpack.c.h.bf16 %v905_v36 }
  0x19   : > { %v334_v37 = vpack.c.bf16 %v979_v28, %v978_v27  ;;  %v312_v51 = vadd.f32 %v1093_v11, %v289_v35  ;;  %v313_v52 = vadd.f32 %v1093_v11, %v290_v39  ;;  %v842_v53 = vunpack.c.l.bf16 %v902_v41 }
  0x1a   : > { %v338_v42 = vpack.c.bf16 %v987_v38, %v986_v34  ;;  %v291_v54 = vmul.f32 %v854_v45, %v1085_v5  ;;  %v843_v55 = vunpack.c.h.bf16 %v902_v41  ;;  %v292_v56 = vmul.f32 %v855_v50, %v1085_v5 }
  0x1b   : > { %946 = vmatprep.mubr.bf16.mxu0 %v334_v37  ;;  %v858_v57 = vunpack.c.l.bf16 %v906_v46  ;;  %v859_v58 = vunpack.c.h.bf16 %v906_v46  ;;  %941 = vmatpush3.bf16.msra.mxu0 %v1007_v31  ;;  %v306_v59 = vadd.f32 %v1093_v11, %v283_v43  ;;  %v307_v60 = vadd.f32 %v1093_v11, %v284_v44 }
  0x1c   : > { %954 = vmatprep.mubr.bf16.mxu1 %v338_v42  ;;  %975 = vmatpush3.bf16.msra.mxu1 %v1007_v31  ;;  %v314_v61 = vadd.f32 %v1093_v11, %v291_v54  ;;  %v315_v63 = vadd.f32 %v1093_v11, %v292_v56  ;;  %v980_v0 = vround.rtne.f32 %v304_v48  ;;  %v981_v1 = vround.rtne.f32 %v305_v49 }
  0x1d   : > { %942 = vmatprep.subr.bf16.mxu0 %v1008_v47  ;;  %968 = vmatprep.subr.bf16.mxu1 %v1008_v47  ;;  %v988_v2 = vround.rtne.f32 %v312_v51  ;;  %v989_v3 = vround.rtne.f32 %v313_v52  ;;  %v285_v4 = vmul.f32 %v842_v53, %v1085_v5  ;;  %v286_v6 = vmul.f32 %v843_v55, %v1085_v5 }
  0x1e   : > { %v293_v7 = vmul.f32 %v858_v57, %v1085_v5  ;;  %v294_v8 = vmul.f32 %v859_v58, %v1085_v5  ;;  %v982_v9 = vround.rtne.f32 %v306_v59  ;;  %v983_v10 = vround.rtne.f32 %v307_v60 }
  0x1f   : > { %943 = vmatpush3.bf16.msra.mxu0 %v1008_v47  ;;  %v990_v12 = vround.rtne.f32 %v314_v61  ;;  %v991_v13 = vround.rtne.f32 %v315_v63  ;;  %v335_v14 = vpack.c.bf16 %v981_v1, %v980_v0  ;;  %v339_v15 = vpack.c.bf16 %v989_v3, %v988_v2 }
  0x20   : > { %976 = vmatpush3.bf16.msra.mxu1 %v1008_v47  ;;  %944 = vmatprep.subr.bf16.mxu0 %v1009_v62  ;;  %v308_v16 = vadd.f32 %v1093_v11, %v285_v4  ;;  %v309_v17 = vadd.f32 %v1093_v11, %v286_v6  ;;  %v316_v18 = vadd.f32 %v1093_v11, %v293_v7 }
  0x21   : > { %969 = vmatprep.subr.bf16.mxu1 %v1009_v62  ;;  %v317_v19 = vadd.f32 %v1093_v11, %v294_v8  ;;  %v336_v5 = vpack.c.bf16 %v983_v10, %v982_v9  ;;  %v340_v20 = vpack.c.bf16 %v991_v13, %v990_v12 }
  0x22   : > { %v984_v21 = vround.rtne.f32 %v308_v16  ;;  %v985_v22 = vround.rtne.f32 %v309_v17  ;;  %v992_v23 = vround.rtne.f32 %v316_v18 }
  0x23   : > { %945 = vmatpush3.bf16.msra.mxu0 %v1009_v62  ;;  %v993_v24 = vround.rtne.f32 %v317_v19 }
  0x24   : > { %977 = vmatpush3.bf16.msra.mxu1 %v1009_v62  ;;  %v337_v25 = vpack.c.bf16 %v985_v22, %v984_v21 }
  0x25   : > { %v341_v26 = vpack.c.bf16 %v993_v24, %v992_v23 }
  0x26   : > { %947 = vmatmul.mubr.bf16.vlgmr.msra.gmra.mrb[0].mxu0 %v335_v14 }
  0x27   : > { %955 = vmatmul.mubr.bf16.vlgmr.msra.gmra.mrb[0].mxu1 %v339_v15  ;;  %950 = vmatprep.mubr.bf16.mxu0 %v336_v5 }
  0x28   : > { %958 = vmatprep.mubr.bf16.mxu1 %v340_v20 }
  0x2e   : > { %951 = vmatmul.mubr.bf16.gmra.mrb[4].mxu0 %v337_v25 }
  0x2f   : > { %959 = vmatmul.mubr.bf16.gmra.mrb[4].mxu1 %v341_v26 }
  0xf9   : > { %v948_v27 = vpop.f32.mrb[0].mxu0 }
  0xfa   : > { %v1143_v28 = vpop.f32.mrb[0].mxu1  ;;  %v440_v11 = vpop.f32.mrb[1].mxu0  ;;  %v607_v41 = vmul.f32 %v948_v27, %v948_v27 }
  0xfb   : > { %v1145_v29 = vpop.f32.mrb[1].mxu1  ;;  %v949_v30 = vpop.f32.mrb[2].mxu0  ;;  %v605_v32 = vmul.f32 %v440_v11, %v440_v11 }
  0xfc   : > { %v1154_v31 = vpop.f32.mrb[2].mxu1  ;;  %v868_v33 = vpack.c.bf16 %v949_v30, %v948_v27  ;;  %v1156_v34 = vpop.f32.mrb[3].mxu0  ;;  %v608_v52 = vmul.f32 %v949_v30, %v949_v30  ;;  %v613_v18 = vmul.f32 %v1145_v29, %v1145_v29 }
  0xfd   : > { %v888_v35 = vpack.c.bf16 %v1154_v31, %v1143_v28  ;;  %v1160_v36 = vpop.f32.mrb[3].mxu1  ;;  %v863_v37 = vpack.c.bf16 %v1156_v34, %v440_v11  ;;  %v583_v38 = vadd.f32 %v1156_v34, %v440_v11  ;;  %v606_v39 = vmul.f32 %v1156_v34, %v1156_v34 }
  0xfe   : > { %v883_v40 = vpack.c.bf16 %v1160_v36, %v1145_v29  ;;  %907 = vst [vmem:[%s1152_s25 + $0x8] sm:$0xff] %v868_v33  }
  0xff   : > { %911 = vst [vmem:[%s1152_s25 + $0x28] sm:$0xff] %v888_v35   ;;  %864 = vst [vmem:[%s1152_s25] sm:$0xff] %v863_v37   ;;  %v584_v42 = vadd.f32 %v948_v27, %v583_v38  ;;  %v621_v43 = vadd.f32 %v606_v39, %v605_v32 }
 0x100   : > { %910 = vst [vmem:[%s1152_s25 + $0x20] sm:$0xff] %v883_v40  }
 0x101   : > { %v622_v44 = vadd.f32 %v621_v43, %v607_v41  ;;  %v952_v45 = vpop.f32.mrb[4].mxu0  ;;  %v585_v46 = vadd.f32 %v949_v30, %v584_v42  ;;  %v614_v43 = vmul.f32 %v1160_v36, %v1160_v36 }
 0x102   : > { %v1172_v47 = vpop.f32.mrb[4].mxu1  ;;  %v645_v48 = vmin.f32 %v948_v27, %v952_v45  ;;  %v667_v49 = vmax.f32 %v948_v27, %v952_v45  ;;  %v456_v50 = vpop.f32.mrb[5].mxu0  ;;  %v611_v21 = vmul.f32 %v952_v45, %v952_v45 }
 0x103   : > { %v1174_v51 = vpop.f32.mrb[5].mxu1  ;;  %v643_v53 = vmin.f32 %v440_v11, %v456_v50  ;;  %v665_v54 = vmax.f32 %v440_v11, %v456_v50  ;;  %v953_v55 = vpop.f32.mrb[6].mxu0  ;;  %v586_v56 = vadd.f32 %v585_v46, %v456_v50  ;;  %v609_v60 = vmul.f32 %v456_v50, %v456_v50 }
 0x104   : > { %v1176_v57 = vpop.f32.mrb[6].mxu1  ;;  %v649_v58 = vmin.f32 %v645_v48, %v1143_v28  ;;  %v671_v59 = vmax.f32 %v667_v49, %v1143_v28  ;;  %v878_v61 = vpack.c.bf16 %v953_v55, %v952_v45  ;;  %v459_v62 = vpop.f32.mrb[7].mxu0  ;;  %v646_v2 = vmin.f32 %v949_v30, %v953_v55 }
 0x105   : > { %v1180_v63 = vpop.f32.mrb[7].mxu1  ;;  %v647_v0 = vmin.f32 %v643_v53, %v1145_v29  ;;  %v669_v1 = vmax.f32 %v665_v54, %v1145_v29  ;;  %v668_v3 = vmax.f32 %v949_v30, %v953_v55  ;;  %v873_v4 = vpack.c.bf16 %v459_v62, %v456_v50 }
 0x106   : > { %909 = vst [vmem:[%s1152_s25 + $0x18] sm:$0xff] %v878_v61   ;;  %v587_v6 = vadd.f32 %v586_v56, %v459_v62  ;;  %v610_v7 = vmul.f32 %v459_v62, %v459_v62  ;;  %v623_v8 = vadd.f32 %v622_v44, %v608_v52  ;;  %v650_v9 = vmin.f32 %v646_v2, %v1154_v31 }
 0x107   : > { %v672_v10 = vmax.f32 %v668_v3, %v1154_v31  ;;  %v644_v12 = vmin.f32 %v1156_v34, %v459_v62  ;;  %v666_v13 = vmax.f32 %v1156_v34, %v459_v62  ;;  %908 = vst [vmem:[%s1152_s25 + $0x10] sm:$0xff] %v873_v4   ;;  %v653_v16 = vmin.f32 %v649_v58, %v1172_v47 }
 0x108   : > { %v588_v14 = vadd.f32 %v952_v45, %v587_v6  ;;  %v624_v15 = vadd.f32 %v623_v8, %v609_v60  ;;  %v675_v17 = vmax.f32 %v671_v59, %v1172_v47  ;;  %v651_v19 = vmin.f32 %v647_v0, %v1174_v51 }
 0x109   : > { %v673_v5 = vmax.f32 %v669_v1, %v1174_v51  ;;  %v898_v20 = vpack.c.bf16 %v1176_v57, %v1172_v47  ;;  %v654_v24 = vmin.f32 %v650_v9, %v1176_v57  ;;  %v612_v25 = vmul.f32 %v953_v55, %v953_v55 }
 0x10a   : > { %v589_v22 = vadd.f32 %v953_v55, %v588_v14  ;;  %v625_v23 = vadd.f32 %v624_v15, %v610_v7  ;;  %v676_v26 = vmax.f32 %v672_v10, %v1176_v57  ;;  %v893_v27 = vpack.c.bf16 %v1180_v63, %v1174_v51 }
 0x10b   : > { %913 = vst [vmem:[%s1152_s25 + $0x38] sm:$0xff] %v898_v20   ;;  %v648_v11 = vmin.f32 %v644_v12, %v1160_v36  ;;  %v656_v33 = vmin.f32 %v653_v16, %v654_v24  ;;  %v670_v34 = vmax.f32 %v666_v13, %v1160_v36  ;;  %v615_v46 = vmul.f32 %v1143_v28, %v1143_v28 }
 0x10c   : > { %v626_v30 = vadd.f32 %v625_v23, %v611_v21  ;;  %v590_v32 = vadd.f32 %v589_v22, %v1145_v29  ;;  %v678_v35 = vmax.f32 %v675_v17, %v676_v26  ;;  %912 = vst [vmem:[%s1152_s25 + $0x30] sm:$0xff] %v893_v27   ;;  %v616_v52 = vmul.f32 %v1154_v31, %v1154_v31 }
 0x10d   : > { %v652_v37 = vmin.f32 %v648_v11, %v1180_v63  ;;  %v674_v40 = vmax.f32 %v670_v34, %v1180_v63  ;;  %v617_v55 = vmul.f32 %v1174_v51, %v1174_v51  ;;  %v620_v8 = vmul.f32 %v1176_v57, %v1176_v57 }
 0x10e   : > { %v627_v38 = vadd.f32 %v626_v30, %v612_v25  ;;  %v591_v39 = vadd.f32 %v590_v32, %v1160_v36 }
 0x10f   : > { %v655_v41 = vmin.f32 %v651_v19, %v652_v37  ;;  %v677_v44 = vmax.f32 %v673_v5, %v674_v40 }
 0x110   : > { %v592_v42 = vadd.f32 %v1143_v28, %v591_v39  ;;  %v628_v29 = vadd.f32 %v627_v38, %v613_v18 }
 0x111   : > { %v657_v45 = vmin.f32 %v655_v41, %v656_v33  ;;  %v679_v50 = vmax.f32 %v677_v44, %v678_v35 }
 0x112   : > { %v629_v48 = vadd.f32 %v628_v29, %v614_v43  ;;  %v593_v49 = vadd.f32 %v1154_v31, %v592_v42  ;;  %v618_v31 = vmul.f32 %v1180_v63, %v1180_v63 }
 0x113   : > { %v658_v53 = vrot.slane %v657_v45, 4  ;;  %v680_v56 = vrot.slane %v679_v50, 4 }
 0x114   : > { %v630_v54 = vadd.f32 %v629_v48, %v615_v46  ;;  %v594_v36 = vadd.f32 %v593_v49, %v1174_v51  ;;  %v619_v51 = vmul.f32 %v1172_v47, %v1172_v47 }
 0x115   : > { %v659_v58 = vmin.f32 %v657_v45, %v658_v53  ;;  %v681_v60 = vmax.f32 %v679_v50, %v680_v56 }
 0x116   : > { %v595_v59 = vadd.f32 %v594_v36, %v1180_v63  ;;  %v631_v28 = vadd.f32 %v630_v54, %v616_v52 }
 0x117   : > { %v660_v61 = vrot.slane %v659_v58, 2  ;;  %v682_v1 = vrot.slane %v681_v60, 2 }
 0x118   : > { %v596_v62 = vadd.f32 %v1172_v47, %v595_v59  ;;  %v632_v0 = vadd.f32 %v631_v28, %v617_v55 }
 0x119   : > { %v661_v2 = vmin.f32 %v659_v58, %v660_v61  ;;  %v683_v6 = vmax.f32 %v681_v60, %v682_v1 }
 0x11a   : > { %v597_v3 = vadd.f32 %v1176_v57, %v596_v62  ;;  %v633_v4 = vadd.f32 %v632_v0, %v618_v31 }
 0x11b   : > { %v662_v7 = vrot.slane %v661_v2, 1  ;;  %v684_v10 = vrot.slane %v683_v6, 1 }
 0x11c   : > { %v598_v63 = vrot.slane %v597_v3, 4  ;;  %v634_v9 = vadd.f32 %v633_v4, %v619_v51 }
 0x11d   : > { %v663_v12 = vmin.f32 %v661_v2, %v662_v7  ;;  %v685_v15 = vmax.f32 %v683_v6, %v684_v10 }
 0x11e   : > { %v599_v13 = vadd.f32 %v598_v63, %v597_v3  ;;  %v635_v14 = vadd.f32 %v634_v9, %v620_v8 }
 0x11f   : > { %664 = vst [vmem:[%s238_s28 + $0x2] sm:$0x1] %v663_v12  ;;  %686 = vst [vmem:[%s238_s28 + $0x3] sm:$0x1] %v685_v15 }
 0x120   : > { %v600_v47 = vrot.slane %v599_v13, 2  ;;  %v636_v16 = vrot.slane %v635_v14, 4 }
 0x122   : > { %v601_v17 = vadd.f32 %v600_v47, %v599_v13  ;;  %v637_v18 = vadd.f32 %v636_v16, %v635_v14 }
 0x124   : > { %v602_v19 = vrot.slane %v601_v17, 1  ;;  %v638_v5 = vrot.slane %v637_v18, 2 }
 0x126   : > { %v603_v57 = vadd.f32 %v602_v19, %v601_v17  ;;  %v639_v20 = vadd.f32 %v638_v5, %v637_v18 }
 0x128   : > { %604 = vst [vmem:[%s238_s28] sm:$0x1] %v603_v57  ;;  %v640_v21 = vrot.slane %v639_v20, 1 }
 0x12a   : > { %v641_v22 = vadd.f32 %v640_v21, %v639_v20 }
 0x12c   : > { %642 = vst [vmem:[%s238_s28 + $0x1] sm:$0x1] %v641_v22 }
 0x12d PF: > { %s16_s18 = sadd.s32 1, %s1016_s18  }
 0x12e   : > { %p13_p5 = scmp.ge.s32.totalorder %s16_s18, 6  }
 0x130   :  { %15 = sbr.rel (!%p13_p5) target bundleno = 1 (0x1), region = 78 }

// kernel: forward.7
= control target key start
LH: loop header
LB: loop body
LE: loop exit
PB: predicated region body
PF: predicated region fallthrough
CT: control target
= control target key end

     0   :  { %9 = vsyncpa [#allocation3], 0  ;;  %s869_s0 = inlined_call_operand.vmem [shape: bf16[512,128], index: 0, kind: input, shape index: {}]   ;;  %s870_s1 = inlined_call_operand.vmem [shape: f32[1,128], index: 1, kind: input, shape index: {}]   ;;  %s871_s2 = inlined_call_operand.vmem [shape: f32[1,128], index: 2, kind: input, shape index: {}]   ;;  %s872_s3 = inlined_call_operand.vmem [shape: bf16[512,128], index: 3, kind: input, shape index: {}]   ;;  %s873_s4 = inlined_call_operand.hbm [shape: f32[512,128], index: 4, kind: output, shape index: {}]  }
   0x1   :  { %11 = vsyncpa [#allocation3 + $0x1], 0  ;;  %s679_s15 = smov 0   ;;  %s681_s16 = smov 0  }
   0x2   :  { %s683_s17 = smov 0   ;;  %s685_s18 = smov 0  }
   0x3 LB: > { %s700_s19 = sadd.s32 4294967295, %s649_s18   ;;  %s451_s20 = sadd.s32 4294967294, %s649_s18   ;;  %s649_s18 = sphi %s685_s18, %s879_s18   ;;  %s645_s17 = sphi %s683_s17, %s878_s17   ;;  %s641_s16 = sphi %s681_s16, %s877_s16   ;;  %s637_s15 = sphi %s679_s15, %s876_s15  }
   0x4   : > { %s704_s21 = sadd.s32 1, %s649_s18   ;;  %s118_s22 = sadd.s32 1, %s645_s17 }
   0x5   : > { %s115_s23 = ssub.s32 %s649_s18, %s704_s21  ;;  %p128_p0 = scmp.ne.s32.totalorder %s645_s17, %s641_s16 }
   0x6   : > { %p116_p1 = scmp.eq.s32.totalorder %s115_s23, 0  ;;  %p129_p2 = scmp.eq.s32.totalorder %s700_s19, 3 }
   0x7   : > { %p134_p3 = scmp.ne.s32.totalorder %s641_s16, %s637_s15  ;;  %p135_p4 = scmp.eq.s32.totalorder %s451_s20, 3 }
   0x8   : > { %s715_s24 = scalar_select %p116_p1, %s645_s17, %s118_s22  }
   0x9   : > { %p717_p5 = por %p129_p2, %p128_p0  ;;  %p721_p6 = por %p135_p4, %p134_p3 }
   0xa   : > { %p454_p7 = scmp.ge.s32.totalorder %s649_s18, 1  ;;  %p177_p8 = scmp.lt.s32.totalorder %s649_s18, 5 }
   0xc   : > { %p178_p9 = pnand %p454_p7, %p177_p8 }
   0xd   : > { %s456_s27 = sshll.u32 (!%p178_p9), %s700_s19, 4  ;;  %v741_v0 = vld [vmem:[%s870_s1] ss:$0 sm:$0xff] (!%p178_p9)  ;;  %s205_s11 = sand.u32 (!%p178_p9), 1, %s641_s16  }
   0xe   : > { %181 = sbr.rel (%p178_p9) target bundleno = 65 (0x41), region = 36  ;;  %p209_p10 = scmp.lt.s32.totalorder (!%p178_p9), %s456_s27, 63  ;;  %v753_v11 = vld [vmem:[%s871_s2] ss:$0 sm:$0xff] (!%p178_p9) }
   0xf   : > { %s455_s14 = sshll.u32 (!%p178_p9), %s205_s11, 7  ;;  %s467_s22 = sshll.u32 (!%p178_p9), %s700_s19, 11 }
  0x10   : > { %s775_s20 = scalar_lea.vmem (!%p178_p9), [#allocation2], %s455_s14  ;;  %s820_s29 = scalar_lea.hbm (!%p178_p9), %s873_s4, %s467_s22 }
  0x11   : > { %s377_s23 = sshll.u32 (!%p178_p9), %s775_s20, 4  ;;  %s828_s19 = scalar_lea.sflag (!%p178_p9), [#allocation3], %s205_s11  ;;  %s822_s23 = int_to_ptr.vmem [resolvable:$true] %s377_s23 }
  0x12   : > { %s587_s30 = scalar_lea.vmem (!%p178_p9), %s822_s23, 2048 }
  0x13   : > { %p588_p11 = scmp.ne.s32.totalorder (!%p178_p9), %s822_s23, %s587_s30 }
  0x15   : > { %s881_s27 = smov (!%p209_p10, %s456_s27), 63  ;;  %p589_p12 = pnand %p588_p11, %p717_p5 }
  0x16   : > { %s457_s28 = sshll.u32 %s881_s27, 2 }
  0x17   : > { %s731_s5 = scalar_lea.vmem %s869_s0, %s457_s28  ;;  %s736_s8 = scalar_lea.vmem %s872_s3, %s457_s28 }
  0x18   : > { %v469_v1 = vld [vmem:[%s731_s5] sm:$0xff]   ;;  %v532_v3 = vld [vmem:[%s731_s5 + $0x8] sm:$0xff]   ;;  %v533_v9 = vld [vmem:[%s731_s5 + $0x10] sm:$0xff]   ;;  %p590_p13 = pneg %p589_p12 }
  0x19   : > { %v501_v2 = vld [vmem:[%s736_s8] sm:$0xff]   ;;  %v470_v4 = vunpack.c.l.bf16 %v469_v1  ;;  %v471_v6 = vunpack.c.h.bf16 %v469_v1  ;;  %v539_v8 = vld [vmem:[%s736_s8 + $0x8] sm:$0xff]   ;;  %v540_v10 = vld [vmem:[%s736_s8 + $0x10] sm:$0xff]   ;;  %v474_v12 = vunpack.c.l.bf16 %v532_v3  ;;  %v475_v14 = vunpack.c.h.bf16 %v532_v3 }
  0x1a   : > { %v502_v5 = vunpack.c.l.bf16 %v501_v2  ;;  %v503_v7 = vunpack.c.h.bf16 %v501_v2  ;;  %v506_v13 = vunpack.c.l.bf16 %v539_v8  ;;  %v507_v15 = vunpack.c.h.bf16 %v539_v8  ;;  %v534_v16 = vld [vmem:[%s731_s5 + $0x18] sm:$0xff]   ;;  %v535_v34 = vld [vmem:[%s731_s5 + $0x20] sm:$0xff]   ;;  %v536_v44 = vld [vmem:[%s731_s5 + $0x28] sm:$0xff]  }
  0x1b   : > { %v260_v17 = vmul.f32 %v470_v4, %v741_v0  ;;  %v261_v18 = vmul.f32 %v471_v6, %v741_v0  ;;  %v478_v19 = vunpack.c.l.bf16 %v533_v9  ;;  %v510_v20 = vunpack.c.l.bf16 %v540_v10  ;;  %v541_v21 = vld [vmem:[%s736_s8 + $0x18] sm:$0xff]   ;;  %v542_v39 = vld [vmem:[%s736_s8 + $0x20] sm:$0xff]   ;;  %v543_v49 = vld [vmem:[%s736_s8 + $0x28] sm:$0xff]  }
  0x1c   : > { %v262_v22 = vmul.f32 %v474_v12, %v741_v0  ;;  %v263_v23 = vmul.f32 %v475_v14, %v741_v0  ;;  %v479_v24 = vunpack.c.h.bf16 %v533_v9  ;;  %v511_v25 = vunpack.c.h.bf16 %v540_v10  ;;  %v537_v54 = vld [vmem:[%s731_s5 + $0x30] sm:$0xff]  }
  0x1d   : > { %v283_v26 = vadd.f32 %v753_v11, %v260_v17  ;;  %v284_v27 = vadd.f32 %v753_v11, %v261_v18  ;;  %v264_v28 = vmul.f32 %v478_v19, %v741_v0  ;;  %v482_v29 = vunpack.c.l.bf16 %v534_v16  ;;  %v544_v59 = vld [vmem:[%s736_s8 + $0x30] sm:$0xff]  }
  0x1e   : > { %v285_v30 = vadd.f32 %v753_v11, %v262_v22  ;;  %v286_v31 = vadd.f32 %v753_v11, %v263_v23  ;;  %v265_v32 = vmul.f32 %v479_v24, %v741_v0  ;;  %v514_v33 = vunpack.c.l.bf16 %v541_v21 }
  0x1f   : > { %v331_v35 = vadd.f32 %v502_v5, %v283_v26  ;;  %v332_v36 = vadd.f32 %v503_v7, %v284_v27  ;;  %v287_v37 = vadd.f32 %v753_v11, %v264_v28  ;;  %v266_v38 = vmul.f32 %v482_v29, %v741_v0  ;;  %v538_v5 = vld [vmem:[%s731_s5 + $0x38] sm:$0xff]   ;;  %s651_s5 = smov [#allocation2]  }
  0x20   : > { %v333_v40 = vadd.f32 %v506_v13, %v285_v30  ;;  %v334_v41 = vadd.f32 %v507_v15, %v286_v31  ;;  %v288_v42 = vadd.f32 %v753_v11, %v265_v32  ;;  %v483_v43 = vunpack.c.h.bf16 %v534_v16  ;;  %v545_v15 = vld [vmem:[%s736_s8 + $0x38] sm:$0xff]   ;;  %s591_s6 = sshll.u32 %s651_s5, 4  ;;  %s592_s6 = int_to_ptr.vmem [resolvable:$false] %s591_s6 }
  0x21   : > { %347 = vst [vmem:[%s775_s20] sm:$0xff] %v331_v35  ;;  %348 = vst [vmem:[%s775_s20 + $0x8] sm:$0xff] %v332_v36  ;;  %v335_v45 = vadd.f32 %v510_v20, %v287_v37  ;;  %v289_v46 = vadd.f32 %v753_v11, %v266_v38  ;;  %v515_v47 = vunpack.c.h.bf16 %v541_v21  ;;  %v486_v48 = vunpack.c.l.bf16 %v535_v34  ;;  %s593_s7 = scalar_lea.vmem %s592_s6, 4096  ;;  %p594_p0 = scmp.lt.s32.totalorder %s822_s23, %s592_s6 }
  0x22   : > { %349 = vst [vmem:[%s775_s20 + $0x10] sm:$0xff] %v333_v40  ;;  %350 = vst [vmem:[%s775_s20 + $0x18] sm:$0xff] %v334_v41  ;;  %v336_v50 = vadd.f32 %v511_v25, %v288_v42  ;;  %v267_v51 = vmul.f32 %v483_v43, %v741_v0  ;;  %v518_v52 = vunpack.c.l.bf16 %v542_v39  ;;  %v487_v53 = vunpack.c.h.bf16 %v535_v34  ;;  %p595_p1 = scmp.lt.s32.totalorder %s593_s7, %s587_s30 }
  0x23   : > { %351 = vst [vmem:[%s775_s20 + $0x20] sm:$0xff] %v335_v45  ;;  %v337_v55 = vadd.f32 %v514_v33, %v289_v46  ;;  %v268_v56 = vmul.f32 %v486_v48, %v741_v0  ;;  %v519_v57 = vunpack.c.h.bf16 %v542_v39  ;;  %v490_v58 = vunpack.c.l.bf16 %v536_v44 }
  0x24   : > { %352 = vst [vmem:[%s775_s20 + $0x28] sm:$0xff] %v336_v50  ;;  %v290_v60 = vadd.f32 %v753_v11, %v267_v51  ;;  %v269_v61 = vmul.f32 %v487_v53, %v741_v0  ;;  %v522_v62 = vunpack.c.l.bf16 %v543_v49  ;;  %v491_v63 = vunpack.c.h.bf16 %v536_v44  ;;  %p596_p2 = por %p595_p1, %p594_p0 }
  0x25   : > { %353 = vst [vmem:[%s775_s20 + $0x30] sm:$0xff] %v337_v55  ;;  %v291_v1 = vadd.f32 %v753_v11, %v268_v56  ;;  %v270_v2 = vmul.f32 %v490_v58, %v741_v0  ;;  %v523_v3 = vunpack.c.h.bf16 %v543_v49  ;;  %v494_v4 = vunpack.c.l.bf16 %v537_v54 }
  0x26   : > { %v338_v6 = vadd.f32 %v515_v47, %v290_v60  ;;  %v292_v7 = vadd.f32 %v753_v11, %v269_v61  ;;  %v271_v8 = vmul.f32 %v491_v63, %v741_v0  ;;  %v526_v9 = vunpack.c.l.bf16 %v544_v59  ;;  %p597_p3 = pnand %p596_p2, %p590_p13 }
  0x27   : > { %v339_v10 = vadd.f32 %v518_v52, %v291_v1  ;;  %v293_v12 = vadd.f32 %v753_v11, %v270_v2  ;;  %v272_v13 = vmul.f32 %v494_v4, %v741_v0  ;;  %v495_v14 = vunpack.c.h.bf16 %v537_v54 }
  0x28   : > { %354 = vst [vmem:[%s775_s20 + $0x38] sm:$0xff] %v338_v6  ;;  %v340_v16 = vadd.f32 %v519_v57, %v292_v7  ;;  %v294_v17 = vadd.f32 %v753_v11, %v271_v8  ;;  %v498_v18 = vunpack.c.l.bf16 %v538_v5  ;;  %v527_v22 = vunpack.c.h.bf16 %v544_v59 }
  0x29   : > { %355 = vst [vmem:[%s775_s20 + $0x40] sm:$0xff] %v339_v10  ;;  %v341_v19 = vadd.f32 %v522_v62, %v293_v12  ;;  %v295_v20 = vadd.f32 %v753_v11, %v272_v13  ;;  %v273_v21 = vmul.f32 %v495_v14, %v741_v0  ;;  %v530_v25 = vunpack.c.l.bf16 %v545_v15 }
  0x2a   : > { %356 = vst [vmem:[%s775_s20 + $0x48] sm:$0xff] %v340_v16  ;;  %v342_v23 = vadd.f32 %v523_v3, %v294_v17  ;;  %v274_v24 = vmul.f32 %v498_v18, %v741_v0  ;;  %v499_v26 = vunpack.c.h.bf16 %v538_v5  ;;  %v531_v31 = vunpack.c.h.bf16 %v545_v15 }
  0x2b   : > { %357 = vst [vmem:[%s775_s20 + $0x50] sm:$0xff] %v341_v19  ;;  %v343_v27 = vadd.f32 %v526_v9, %v295_v20  ;;  %v296_v28 = vadd.f32 %v753_v11, %v273_v21 }
  0x2c   : > { %358 = vst [vmem:[%s775_s20 + $0x58] sm:$0xff] %v342_v23  ;;  %v297_v29 = vadd.f32 %v753_v11, %v274_v24  ;;  %v275_v30 = vmul.f32 %v499_v26, %v741_v0 }
  0x2d   : > { %359 = vst [vmem:[%s775_s20 + $0x60] sm:$0xff] %v343_v27  ;;  %v344_v32 = vadd.f32 %v527_v22, %v296_v28 }
  0x2e   : > { %v345_v33 = vadd.f32 %v530_v25, %v297_v29  ;;  %v298_v34 = vadd.f32 %v753_v11, %v275_v30 }
  0x2f   : > { %360 = vst [vmem:[%s775_s20 + $0x68] sm:$0xff] %v344_v32 }
  0x30   : > { %361 = vst [vmem:[%s775_s20 + $0x70] sm:$0xff] %v345_v33  ;;  %v346_v0 = vadd.f32 %v531_v31, %v298_v34 }
  0x32   : > { %362 = vst [vmem:[%s775_s20 + $0x78] sm:$0xff] %v346_v0 }
  0x33   : > { %600 = shalt.err (!%p597_p3)
}
  0x34   : > { %s601_s8 = scalar_lea.hbm %s820_s29, 2048  ;;  %s605_s11 = scalar_lea.hbm %s873_s4, 8192 }
  0x35   : > { %p602_p4 = scmp.ne.s32.totalorder %s820_s29, %s601_s8  ;;  %p606_p9 = scmp.lt.u32.totalorder %s820_s29, %s873_s4 }
  0x36   : > { %p607_p10 = scmp.lt.u32.totalorder %s605_s11, %s601_s8  ;;  %p609_p12 = scmp.lt.u32.totalorder %s601_s8, %s820_s29 }
  0x37   : > { %p603_p7 = pnand %p602_p4, %p717_p5 }
  0x38   : > { %p608_p11 = por %p607_p10, %p606_p9 }
  0x39   : > { %p604_p8 = pneg %p603_p7 }
  0x3a   : > { %p610_p13 = por %p609_p12, %p608_p11 }
  0x3c   : > { %p611_p0 = pnand %p610_p13, %p604_p8 }
  0x3e   : > { %614 = shalt.err (!%p611_p0)
}
  0x3f   : > { %s652_s14 = smov 128   ;;  %s653_s20 = smov 8  }
  0x40   : > { %546 = dma.vmem_to_hbm [thread:$0]  (%p717_p5), %s822_s23, 2048, %s820_s29, %s828_s19, %s652_s14, %s652_s14, %s653_s20  }
  0x41 PF: > { %p552_p1 = scmp.ge.s32.totalorder %s649_s18, 2  ;;  %s392_s22 = sand.u32 1, %s637_s15  }
  0x42   : > { %s393_s27 = scalar_lea.sflag [#allocation3], %s392_s22 }
  0x43   : > { %p549_p2 = pnand %p552_p1, %p721_p6 }
  0x45   : > { %632 = dma.done.wait (!%p549_p2), %s393_s27, 2048  }
  0x46   : > { %634 = vsyncadd (!%p549_p2), %s393_s27, 4294965248  ;;  %p14_p3 = scmp.ge.s32.totalorder %s704_s21, 6   ;;  %s876_s15 = smov %s641_s16 }
  0x47   : > { %s877_s16 = smov %s645_s17  ;;  %s878_s17 = smov %s715_s24 }
  0x48   : > { %s879_s18 = smov %s704_s21  ;;  %16 = sbr.rel (!%p14_p3) target bundleno = 3 (0x3), region = 74 }
  0x4f   :  { %398 = vsyncpa [#allocation3], 1 }
  0x50   :  { %400 = vsyncpa [#allocation3 + $0x1], 1 }

// kernel: forward.5
= control target key start
LH: loop header
LB: loop body
LE: loop exit
PB: predicated region body
PF: predicated region fallthrough
CT: control target
= control target key end

     0   :  { %s6624_s18 = smov 0   ;;  %s7426_s0 = inlined_call_operand.vmem [shape: bf16[2,16,16,128], index: 0, kind: input, shape index: {}]   ;;  %s7427_s1 = inlined_call_operand.vmem [shape: f32[1,128], index: 1, kind: input, shape index: {}]   ;;  %s7428_s2 = inlined_call_operand.vmem [shape: f32[1,128], index: 2, kind: input, shape index: {}]   ;;  %s7429_s3 = inlined_call_operand.vmem [shape: bf16[9,128,128], index: 3, kind: input, shape index: {}]   ;;  %s7430_s4 = inlined_call_operand.vmem [shape: bf16[2,16,16,128], index: 4, kind: output, shape index: {0}]   ;;  %s7431_s5 = inlined_call_operand.vmem [shape: f32[2,4,128], index: 5, kind: output, shape index: {1}]  }
   0x1 LB: > { %s5088_s19 = sadd.s32 4294967295, %s6591_s18   ;;  %p5092_p0 = scmp.ge.s32.totalorder %s6591_s18, 1  ;;  %s6591_s18 = sphi %s6624_s18, %s16_s18  }
   0x2   : > { %p190_p1 = scmp.lt.s32.totalorder %s6591_s18, 3 }
   0x4   : > { %p191_p2 = pnand %p5092_p0, %p190_p1 }
   0x5   : > { %v6503_v0 = vld [vmem:[%s7429_s3] sm:$0xff] (!%p191_p2)   ;;  %v6593_v2 = vmov (!%p191_p2), 0   ;;  %v6505_v3 = vld [vmem:[%s7429_s3 + $0x8] sm:$0xff] (!%p191_p2)   ;;  %p222_p3 = scmp.lt.s32.totalorder (!%p191_p2), %s5088_s19, 1  ;;  %v6507_v5 = vld [vmem:[%s7429_s3 + $0x10] sm:$0xff] (!%p191_p2)   ;;  %vm1676_vm1 = vcmask (!%p191_p2), 1043456  }
   0x6   : > { %194 = sbr.rel (%p191_p2) target bundleno = 612 (0x264), region = 36  ;;  %v6504_v1 = vld [vmem:[%s7429_s3 + $0x100] sm:$0xff] (!%p191_p2)   ;;  %237 = vst [vmem:[#allocation2] sm:$0xf] (!%p191_p2), %v6593_v2  ;;  %273 = vst [vmem:[#allocation2] sm:$0xf0] (!%p191_p2), %v6593_v2  ;;  %5758 = vmatprep.subr.bf16.mxu1 (!%p191_p2), %v6503_v0 }
   0x7   : > { %274 = vst [vmem:[#allocation2 + $0x8] sm:$0xf] (!%p191_p2), %v6593_v2  ;;  %238 = vst [vmem:[#allocation2 + $0x10] sm:$0xf] (!%p191_p2), %v6593_v2  ;;  %5950 = vmatprep.subr.bf16.mxu0 (!%p191_p2), %v6504_v1  ;;  %5759 = vmatpush3.bf16.msra.mxu1 (!%p191_p2), %v6503_v0  ;;  %v6506_v4 = vld [vmem:[%s7429_s3 + $0x108] sm:$0xff] (!%p191_p2)   ;;  %v6508_v6 = vld [vmem:[%s7429_s3 + $0x110] sm:$0xff] (!%p191_p2)  }
   0x8   : > { %239 = vst [vmem:[#allocation2 + $0x20] sm:$0xf] (!%p191_p2), %v6593_v2  ;;  %240 = vst [vmem:[#allocation2 + $0x30] sm:$0xf] (!%p191_p2), %v6593_v2  ;;  %5951 = vmatpush3.bf16.msra.mxu0 (!%p191_p2), %v6504_v1  ;;  %5760 = vmatprep.subr.bf16.mxu1 (!%p191_p2), %v6505_v3  ;;  %v6509_v7 = vld [vmem:[%s7429_s3 + $0x18] sm:$0xff] (!%p191_p2)   ;;  %v6511_v9 = vld [vmem:[%s7429_s3 + $0x20] sm:$0xff] (!%p191_p2)  }
   0x9   : > { %241 = vst [vmem:[#allocation2 + $0x40] sm:$0xf] (!%p191_p2), %v6593_v2  ;;  %242 = vst [vmem:[#allocation2 + $0x50] sm:$0xf] (!%p191_p2), %v6593_v2  ;;  %5952 = vmatprep.subr.bf16.mxu0 (!%p191_p2), %v6506_v4  ;;  %v6510_v8 = vld [vmem:[%s7429_s3 + $0x118] sm:$0xff] (!%p191_p2)   ;;  %v6512_v10 = vld [vmem:[%s7429_s3 + $0x120] sm:$0xff] (!%p191_p2)  }
   0xa   : > { %243 = vst [vmem:[#allocation2 + $0x60] sm:$0xf] (!%p191_p2), %v6593_v2  ;;  %244 = vst [vmem:[#allocation2 + $0x70] sm:$0xf] (!%p191_p2), %v6593_v2  ;;  %v6513_v11 = vld [vmem:[%s7429_s3 + $0x28] sm:$0xff] (!%p191_p2)   ;;  %v6515_v20 = vld [vmem:[%s7429_s3 + $0x30] sm:$0xff] (!%p191_p2)  }
   0xb   : > { %245 = vst [vmem:[#allocation2 + $0x80] sm:$0xf] (!%p191_p2), %v6593_v2  ;;  %246 = vst [vmem:[#allocation2 + $0x90] sm:$0xf] (!%p191_p2), %v6593_v2  ;;  %5761 = vmatpush3.bf16.msra.mxu1 (!%p191_p2), %v6505_v3  ;;  %vm585_vm0 = vsmask.f32 (!%p191_p2), 4352 }
   0xc   : > { %247 = vst [vmem:[#allocation2 + $0xa0] sm:$0xf] (!%p191_p2), %v6593_v2  ;;  %248 = vst [vmem:[#allocation2 + $0xb0] sm:$0xf] (!%p191_p2), %v6593_v2  ;;  %5953 = vmatpush3.bf16.msra.mxu0 (!%p191_p2), %v6506_v4  ;;  %5762 = vmatprep.subr.bf16.mxu1 (!%p191_p2), %v6507_v5  ;;  %v6514_v14 = vld [vmem:[%s7429_s3 + $0x128] sm:$0xff] (!%p191_p2)   ;;  %v6516_v32 = vld [vmem:[%s7429_s3 + $0x130] sm:$0xff] (!%p191_p2)  }
   0xd   : > { %249 = vst [vmem:[#allocation2 + $0xc0] sm:$0xf] %v6593_v2  ;;  %250 = vst [vmem:[#allocation2 + $0xd0] sm:$0xf] %v6593_v2  ;;  %s7433_s19 = smov (!%p222_p3, %s5088_s19), 1  ;;  %5954 = vmatprep.subr.bf16.mxu0 %v6508_v6  ;;  %v6517_v45 = vld [vmem:[%s7429_s3 + $0x38] sm:$0xff]  }
   0xe   : > { %251 = vst [vmem:[#allocation2 + $0xe0] sm:$0xf] %v6593_v2  ;;  %252 = vst [vmem:[#allocation2 + $0xf0] sm:$0xf] %v6593_v2  ;;  %s5334_s11 = sshll.u32 %s7433_s19, 7  ;;  %v6518_v50 = vld [vmem:[%s7429_s3 + $0x138] sm:$0xff]  }
   0xf   : > { %253 = vst [vmem:[#allocation2 + $0x100] sm:$0xf] %v6593_v2  ;;  %254 = vst [vmem:[#allocation2 + $0x110] sm:$0xf] %v6593_v2  ;;  %5763 = vmatpush3.bf16.msra.mxu1 %v6507_v5  ;;  %s6674_s20 = scalar_lea.vmem %s7426_s0, %s5334_s11  ;;  %v549_v12 = vld [vmem:[#allocation2] sm:$0xf8]  ;;  %s7327_s17 = scalar_lea.vmem %s7430_s4, %s5334_s11 }
  0x10   : > { %255 = vst [vmem:[#allocation2 + $0x8] sm:$0xf0] %v6593_v2  ;;  %256 = vst [vmem:[#allocation2 + $0x18] sm:$0xf0] %v6593_v2  ;;  %5955 = vmatpush3.bf16.msra.mxu0 %v6508_v6  ;;  %5764 = vmatprep.subr.bf16.mxu1 %v6509_v7  ;;  %v550_v13 = vld [vmem:[#allocation2 + $0x8] sm:$0xf] }
  0x11   : > { %257 = vst [vmem:[#allocation2 + $0x28] sm:$0xf0] %v6593_v2  ;;  %258 = vst [vmem:[#allocation2 + $0x38] sm:$0xf0] %v6593_v2  ;;  %5956 = vmatprep.subr.bf16.mxu0 %v6510_v8  ;;  %v587_v15 = vshrl.u32 %v549_v12, 16  ;;  %v590_v16 = vshll.u32 %v549_v12, 16 }
  0x12   : > { %259 = vst [vmem:[#allocation2 + $0x48] sm:$0xf0] %v6593_v2  ;;  %260 = vst [vmem:[#allocation2 + $0x58] sm:$0xf0] %v6593_v2  ;;  %v595_v17 = vshrl.u32 %v550_v13, 16  ;;  %v598_v18 = vshll.u32 %v550_v13, 16 }
  0x13   : > { %261 = vst [vmem:[#allocation2 + $0x68] sm:$0xf0] %v6593_v2  ;;  %262 = vst [vmem:[#allocation2 + $0x78] sm:$0xf0] %v6593_v2  ;;  %5765 = vmatpush3.bf16.msra.mxu1 %v6509_v7  ;;  %v5369_v19 = vld [vmem:[%s6674_s20] sm:$0xff]   ;;  %v589_v25 = vrot.slane %v587_v15, 3 }
  0x14   : > { %263 = vst [vmem:[#allocation2 + $0x88] sm:$0xf0] %v6593_v2  ;;  %264 = vst [vmem:[#allocation2 + $0x98] sm:$0xf0] %v6593_v2  ;;  %5957 = vmatpush3.bf16.msra.mxu0 %v6510_v8  ;;  %5766 = vmatprep.subr.bf16.mxu1 %v6511_v9  ;;  %v5370_v21 = vunpack.c.l.bf16 %v5369_v19  ;;  %v5371_v22 = vunpack.c.h.bf16 %v5369_v19  ;;  %v6689_v23 = vld [vmem:[%s7427_s1] ss:$0 sm:$0xff] }
  0x15   : > { %265 = vst [vmem:[#allocation2 + $0xa8] sm:$0xf0] %v6593_v2  ;;  %266 = vst [vmem:[#allocation2 + $0xb8] sm:$0xf0] %v6593_v2  ;;  %5958 = vmatprep.subr.bf16.mxu0 %v6512_v10  ;;  %v6694_v24 = vld [vmem:[%s7428_s2] ss:$0 sm:$0xff] }
  0x16   : > { %267 = vst [vmem:[#allocation2 + $0xc8] sm:$0xf0] %v6593_v2  ;;  %268 = vst [vmem:[#allocation2 + $0xd8] sm:$0xf0] %v6593_v2  ;;  %v592_v26 = vrot.slane %v590_v16, 4  ;;  %v597_v27 = vrot.slane %v595_v17, 3  ;;  %v349_v29 = vmul.f32 %v5370_v21, %v6689_v23  ;;  %v350_v30 = vmul.f32 %v5371_v22, %v6689_v23 }
  0x17   : > { %269 = vst [vmem:[#allocation2 + $0xe8] sm:$0xf0] %v6593_v2  ;;  %270 = vst [vmem:[#allocation2 + $0xf8] sm:$0xf0] %v6593_v2  ;;  %5767 = vmatpush3.bf16.msra.mxu1 %v6511_v9  ;;  %v600_v28 = vrot.slane %v598_v18, 4  ;;  %v5512_v31 = vld [vmem:[%s6674_s20 + $0x8] sm:$0xff]  }
  0x18   : > { %271 = vst [vmem:[#allocation2 + $0x108] sm:$0xf0] %v6593_v2  ;;  %272 = vst [vmem:[#allocation2 + $0x118] sm:$0xf0] %v6593_v2  ;;  %5959 = vmatpush3.bf16.msra.mxu0 %v6512_v10  ;;  %5768 = vmatprep.subr.bf16.mxu1 %v6513_v11  ;;  %v593_v33 = vor.u32 %v592_v26, %v589_v25  ;;  %v5374_v35 = vunpack.c.l.bf16 %v5512_v31  ;;  %v5375_v36 = vunpack.c.h.bf16 %v5512_v31  ;;  %v5513_v39 = vld [vmem:[%s6674_s20 + $0x10] sm:$0xff]   ;;  %v5514_v44 = vld [vmem:[%s6674_s20 + $0x18] sm:$0xff]  }
  0x19   : > { %276 = vst [vmem:[#allocation2 + $0x110] sm:$0xf0] %v6593_v2  ;;  %277 = vst [vmem:[#allocation2 + $0x118] sm:$0xf] %v6593_v2  ;;  %5960 = vmatprep.subr.bf16.mxu0 %v6514_v14  ;;  %v601_v34 = vor.u32 %v600_v28, %v597_v27  ;;  %v388_v37 = vadd.f32 %v6694_v24, %v349_v29  ;;  %v389_v38 = vadd.f32 %v6694_v24, %v350_v30  ;;  %v5515_v58 = vld [vmem:[%s6674_s20 + $0x20] sm:$0xff]   ;;  %v5516_v63 = vld [vmem:[%s6674_s20 + $0x28] sm:$0xff]  }
  0x1a   : > { %v351_v41 = vmul.f32 %v5374_v35, %v6689_v23  ;;  %v352_v42 = vmul.f32 %v5375_v36, %v6689_v23  ;;  %v5378_v43 = vunpack.c.l.bf16 %v5513_v39  ;;  %v5379_v48 = vunpack.c.h.bf16 %v5513_v39  ;;  %v6727_v1 = vld [vmem:[%s7429_s3 + $0x40] sm:$0xff]   ;;  %v5517_v10 = vld [vmem:[%s6674_s20 + $0x30] sm:$0xff]   ;;  %v6747_v29 = vld [vmem:[%s6674_s20 + $0x38] sm:$0xff]   ;;  %s5097_s11 = sshll.u32 %s7433_s19, 2 }
  0x1b   : > { %5769 = vmatpush3.bf16.msra.mxu1 %v6513_v11  ;;  %v602_v40 = vsel %vm585_vm0, %v593_v33, %v601_v34  ;;  %v6462_v46 = vround.rtne.f32 %v388_v37  ;;  %v6463_v47 = vround.rtne.f32 %v389_v38  ;;  %v5382_v49 = vunpack.c.l.bf16 %v5514_v44  ;;  %v6734_v6 = vld [vmem:[%s7429_s3 + $0x140] sm:$0xff]   ;;  %s235_s23 = scalar_lea.vmem %s7431_s5, %s5097_s11 }
  0x1c   : > { %5961 = vmatpush3.bf16.msra.mxu0 %v6514_v14  ;;  %5770 = vmatprep.subr.bf16.mxu1 %v6515_v20  ;;  %v390_v51 = vadd.f32 %v6694_v24, %v351_v41  ;;  %v391_v52 = vadd.f32 %v6694_v24, %v352_v42  ;;  %v353_v53 = vmul.f32 %v5378_v43, %v6689_v23  ;;  %v5383_v54 = vunpack.c.h.bf16 %v5514_v44  ;;  %v6752_v34 = vld [vmem:[%s6674_s20 + $0x40] sm:$0xff]  }
  0x1d   : > { %5962 = vmatprep.subr.bf16.mxu0 %v6516_v32  ;;  %5774 = vmatprep.mubr.bf16.mxu1 %v602_v40  ;;  %v452_v55 = vpack.c.bf16 %v6463_v47, %v6462_v46  ;;  %v354_v56 = vmul.f32 %v5379_v48, %v6689_v23  ;;  %v355_v57 = vmul.f32 %v5382_v49, %v6689_v23  ;;  %v5386_v4 = vunpack.c.l.bf16 %v5515_v58 }
  0x1e   : > { %v6464_v59 = vround.rtne.f32 %v390_v51  ;;  %v6465_v60 = vround.rtne.f32 %v391_v52  ;;  %v392_v61 = vadd.f32 %v6694_v24, %v353_v53  ;;  %v356_v62 = vmul.f32 %v5383_v54, %v6689_v23 }
  0x1f   : > { %5771 = vmatpush3.bf16.msra.mxu1 %v6515_v20  ;;  %v484_v0 = vrot.slane %v452_v55, 4  ;;  %v393_v2 = vadd.f32 %v6694_v24, %v354_v56  ;;  %v394_v3 = vadd.f32 %v6694_v24, %v355_v57  ;;  %v5387_v9 = vunpack.c.h.bf16 %v5515_v58 }
  0x20   : > { %5963 = vmatpush3.bf16.msra.mxu0 %v6516_v32  ;;  %5772 = vmatprep.subr.bf16.mxu1 %v6517_v45  ;;  %v453_v5 = vpack.c.bf16 %v6465_v60, %v6464_v59  ;;  %v6466_v7 = vround.rtne.f32 %v392_v61  ;;  %v395_v8 = vadd.f32 %v6694_v24, %v356_v62  ;;  %v357_v13 = vmul.f32 %v5386_v4, %v6689_v23 }
  0x21   : > { %5964 = vmatprep.subr.bf16.mxu0 %v6518_v50  ;;  %517 = vst [vmem:[#allocation2 + $0x18] ss:$-4 sps:$4 sm:$0xff] %v484_v0   ;;  %v6467_v11 = vround.rtne.f32 %v393_v2  ;;  %v6468_v12 = vround.rtne.f32 %v394_v3  ;;  %v5390_v14 = vunpack.c.l.bf16 %v5516_v63  ;;  %v358_v17 = vmul.f32 %v5387_v9, %v6689_v23  ;;  %v6521_v0 = vld [vmem:[%s7429_s3 + $0x148] sm:$0xff]  }
  0x22   : > { %v485_v15 = vrot.slane %v453_v5, 4  ;;  %v6469_v16 = vround.rtne.f32 %v395_v8  ;;  %v5391_v18 = vunpack.c.h.bf16 %v5516_v63  ;;  %v396_v20 = vadd.f32 %v6694_v24, %v357_v13  ;;  %v6522_v13 = vld [vmem:[%s7429_s3 + $0x48] sm:$0xff]  }
  0x23   : > { %5773 = vmatpush3.bf16.msra.mxu1 %v6517_v45  ;;  %v454_v19 = vpack.c.bf16 %v6467_v11, %v6466_v7  ;;  %v359_v21 = vmul.f32 %v5390_v14, %v6689_v23  ;;  %v5394_v22 = vunpack.c.l.bf16 %v5517_v10  ;;  %v397_v26 = vadd.f32 %v6694_v24, %v358_v17 }
  0x24   : > { %5965 = vmatpush3.bf16.msra.mxu0 %v6518_v50  ;;  %5806 = vmatprep.subr.bf16.mxu1 %v6727_v1  ;;  %519 = vst [vmem:[#allocation2 + $0x28] ss:$-4 sps:$4 sm:$0xff] %v485_v15   ;;  %v455_v25 = vpack.c.bf16 %v6469_v16, %v6468_v12  ;;  %v360_v27 = vmul.f32 %v5391_v18, %v6689_v23  ;;  %v5395_v28 = vunpack.c.h.bf16 %v5517_v10  ;;  %v6470_v31 = vround.rtne.f32 %v396_v20 }
  0x25   : > { %5998 = vmatprep.subr.bf16.mxu0 %v6734_v6  ;;  %v486_v30 = vrot.slane %v454_v19, 4  ;;  %v398_v32 = vadd.f32 %v6694_v24, %v359_v21  ;;  %v361_v33 = vmul.f32 %v5394_v22, %v6689_v23  ;;  %v6471_v36 = vround.rtne.f32 %v397_v26 }
  0x26   : > { %v487_v35 = vrot.slane %v455_v25, 4  ;;  %v399_v37 = vadd.f32 %v6694_v24, %v360_v27  ;;  %v362_v38 = vmul.f32 %v5395_v28, %v6689_v23  ;;  %v5398_v41 = vunpack.c.l.bf16 %v6747_v29 }
  0x27   : > { %521 = vst [vmem:[#allocation2 + $0x38] ss:$-4 sps:$4 sm:$0xff] %v486_v30   ;;  %v6472_v39 = vround.rtne.f32 %v398_v32  ;;  %v6757_v40 = vadd.f32 %v6694_v24, %v361_v33  ;;  %v5399_v42 = vunpack.c.h.bf16 %v6747_v29  ;;  %v456_v46 = vpack.c.bf16 %v6471_v36, %v6470_v31 }
  0x28   : > { %v2740_v43 = vld [vmem:[#allocation2 + $0x10] sm:$0xf0]  ;;  %v2741_v44 = vld [vmem:[#allocation2 + $0x18] sm:$0xf]  ;;  %523 = vst [vmem:[#allocation2 + $0x48] ss:$-4 sps:$4 sm:$0xff] %v487_v35   ;;  %v6473_v47 = vround.rtne.f32 %v399_v37  ;;  %v6762_v48 = vadd.f32 %v6694_v24, %v362_v38  ;;  %v5402_v49 = vunpack.c.l.bf16 %v6752_v34 }
  0x29   : > { %v551_v45 = vld [vmem:[#allocation2 + $0x10] sm:$0xf8]  ;;  %v2804_v50 = vrot.slane %v2740_v43, 4  ;;  %v2805_v51 = vrot.slane %v2741_v44, 4  ;;  %v552_v52 = vld [vmem:[#allocation2 + $0x18] sm:$0xf]  ;;  %v6474_v2 = vround.rtne.f32 %v6757_v40 }
  0x2a   : > { %v604_v53 = vshrl.u32 %v551_v45, 16  ;;  %v607_v54 = vshll.u32 %v551_v45, 16  ;;  %v612_v55 = vshrl.u32 %v552_v52, 16  ;;  %v615_v56 = vshll.u32 %v552_v52, 16  ;;  %v6523_v35 = vld [vmem:[%s7429_s3 + $0x150] sm:$0xff]  }
  0x2b   : > { %v488_v57 = vrot.slane %v456_v46, 4  ;;  %v457_v58 = vpack.c.bf16 %v6473_v47, %v6472_v39  ;;  %v2806_v59 = vsel %vm1676_vm1, %v2804_v50, %v2805_v51  ;;  %v2742_v62 = vld [vmem:[#allocation2 + $0x20] sm:$0xf0]  ;;  %v2743_v63 = vld [vmem:[#allocation2 + $0x28] sm:$0xf]  ;;  %v6525_v51 = vld [vmem:[%s7429_s3 + $0x50] sm:$0xff]  }
  0x2c   : > { %v606_v60 = vrot.slane %v604_v53, 3  ;;  %v609_v61 = vrot.slane %v607_v54, 4  ;;  %5966 = vmatprep.mubr.bf16.mxu0 %v2806_v59  ;;  %v614_v3 = vrot.slane %v612_v55, 3  ;;  %v617_v4 = vrot.slane %v615_v56, 4  ;;  %v553_v8 = vld [vmem:[#allocation2 + $0x20] sm:$0xf8] }
  0x2d   : > { %v2807_v5 = vrot.slane %v2742_v62, 4  ;;  %v2808_v7 = vrot.slane %v2743_v63, 4  ;;  %525 = vst [vmem:[#allocation2 + $0x58] ss:$-4 sps:$4 sm:$0xff] %v488_v57   ;;  %v554_v10 = vld [vmem:[#allocation2 + $0x28] sm:$0xf] }
  0x2e   : > { %v610_v9 = vor.u32 %v609_v61, %v606_v60  ;;  %v621_v11 = vshrl.u32 %v553_v8, 16  ;;  %v624_v12 = vshll.u32 %v553_v8, 16  ;;  %v489_v14 = vrot.slane %v457_v58, 4  ;;  %v2744_v19 = vld [vmem:[#allocation2 + $0x30] sm:$0xf0]  ;;  %v6524_v58 = vld [vmem:[%s7429_s3 + $0x158] sm:$0xff]  }
  0x2f   : > { %v618_v15 = vor.u32 %v617_v4, %v614_v3  ;;  %v2809_v16 = vsel %vm1676_vm1, %v2807_v5, %v2808_v7  ;;  %v629_v17 = vshrl.u32 %v554_v10, 16  ;;  %v632_v18 = vshll.u32 %v554_v10, 16  ;;  %v2745_v20 = vld [vmem:[#allocation2 + $0x38] sm:$0xf]  ;;  %v555_v27 = vld [vmem:[#allocation2 + $0x30] sm:$0xf8] }
  0x30   : > { %5967 = vmatmul.mubr.bf16.vlgmr.msra.gmra.mrb[0].mxu0 %v2809_v16  ;;  %v623_v21 = vrot.slane %v621_v11, 3  ;;  %v626_v22 = vrot.slane %v624_v12, 4  ;;  %v2810_v25 = vrot.slane %v2744_v19, 4  ;;  %v2811_v26 = vrot.slane %v2745_v20, 4  ;;  %527 = vst [vmem:[#allocation2 + $0x68] ss:$-4 sps:$4 sm:$0xff] %v489_v14  }
  0x31   : > { %v6775_v28 = vsel %vm585_vm0, %v610_v9, %v618_v15  ;;  %5999 = vmatpush3.bf16.msra.mxu0 %v6734_v6  ;;  %v631_v30 = vrot.slane %v629_v17, 3  ;;  %v634_v31 = vrot.slane %v632_v18, 4  ;;  %v556_v32 = vld [vmem:[#allocation2 + $0x38] sm:$0xf]  ;;  %v638_v33 = vshrl.u32 %v555_v27, 16 }
  0x32   : > { %5775 = vmatmul.mubr.bf16.vlgmr.msra.gmra.mrb[0].mxu1 %v6775_v28  ;;  %6000 = vmatprep.subr.bf16.mxu0 %v6521_v0  ;;  %v627_v36 = vor.u32 %v626_v22, %v623_v21  ;;  %v2812_v37 = vsel %vm1676_vm1, %v2810_v25, %v2811_v26  ;;  %v641_v38 = vshll.u32 %v555_v27, 16  ;;  %v646_v39 = vshrl.u32 %v556_v32, 16  ;;  %v2746_v43 = vld [vmem:[#allocation2 + $0x40] sm:$0xf0]  ;;  %v2747_v44 = vld [vmem:[#allocation2 + $0x48] sm:$0xf] }
  0x33   : > { %5807 = vmatpush3.bf16.msra.mxu1 %v6727_v1  ;;  %v635_v6 = vor.u32 %v634_v31, %v631_v30  ;;  %5970 = vmatprep.mubr.bf16.mxu0 %v2812_v37  ;;  %v640_v45 = vrot.slane %v638_v33, 3  ;;  %v649_v46 = vshll.u32 %v556_v32, 16  ;;  %v2813_v47 = vrot.slane %v2746_v43, 4  ;;  %v557_v50 = vld [vmem:[#allocation2 + $0x40] sm:$0xf8]  ;;  %v6528_v12 = vld [vmem:[%s7429_s3 + $0x58] sm:$0xff]  }
  0x34   : > { %v643_v52 = vrot.slane %v641_v38, 4  ;;  %v648_v53 = vrot.slane %v646_v39, 3  ;;  %5808 = vmatprep.subr.bf16.mxu1 %v6522_v13  ;;  %v2814_v54 = vrot.slane %v2747_v44, 4  ;;  %v558_v55 = vld [vmem:[#allocation2 + $0x48] sm:$0xf]  ;;  %v655_v56 = vshrl.u32 %v557_v50, 16 }
  0x35   : > { %6001 = vmatpush3.bf16.msra.mxu0 %v6521_v0  ;;  %v6788_v57 = vsel %vm585_vm0, %v627_v36, %v635_v6  ;;  %v651_v1 = vrot.slane %v649_v46, 4  ;;  %v658_v59 = vshll.u32 %v557_v50, 16  ;;  %v663_v60 = vshrl.u32 %v558_v55, 16  ;;  %v2748_v61 = vld [vmem:[#allocation2 + $0x50] sm:$0xf0]  ;;  %v6526_v32 = vld [vmem:[%s7429_s3 + $0x160] sm:$0xff]  }
  0x36   : > { %5778 = vmatprep.mubr.bf16.mxu1 %v6788_v57  ;;  %v644_v62 = vor.u32 %v643_v52, %v640_v45  ;;  %v2815_v63 = vsel %vm1676_vm1, %v2813_v47, %v2814_v54  ;;  %6002 = vmatprep.subr.bf16.mxu0 %v6523_v35  ;;  %v657_v3 = vrot.slane %v655_v56, 3  ;;  %v666_v4 = vshll.u32 %v558_v55, 16  ;;  %v2749_v0 = vld [vmem:[#allocation2 + $0x58] sm:$0xf]  ;;  %v559_v5 = vld [vmem:[#allocation2 + $0x50] sm:$0xf8] }
  0x37   : > { %v652_v7 = vor.u32 %v651_v1, %v648_v53  ;;  %5809 = vmatpush3.bf16.msra.mxu1 %v6522_v13  ;;  %v660_v8 = vrot.slane %v658_v59, 4  ;;  %v665_v9 = vrot.slane %v663_v60, 3  ;;  %v2816_v10 = vrot.slane %v2748_v61, 4  ;;  %v560_v11 = vld [vmem:[#allocation2 + $0x58] sm:$0xf]  ;;  %v6531_v45 = vld [vmem:[%s7429_s3 + $0x60] sm:$0xff]  }
  0x38   : > { %5971 = vmatmul.mubr.bf16.gmra.mrb[4].mxu0 %v2815_v63  ;;  %v668_v14 = vrot.slane %v666_v4, 4  ;;  %v2817_v15 = vrot.slane %v2749_v0, 4  ;;  %v672_v16 = vshrl.u32 %v559_v5, 16  ;;  %v675_v17 = vshll.u32 %v559_v5, 16  ;;  %5810 = vmatprep.subr.bf16.mxu1 %v6525_v51  ;;  %v2750_v18 = vld [vmem:[#allocation2 + $0x60] sm:$0xf0] }
  0x39   : > { %v6799_v19 = vsel %vm585_vm0, %v644_v62, %v652_v7  ;;  %6003 = vmatpush3.bf16.msra.mxu0 %v6523_v35  ;;  %v661_v13 = vor.u32 %v660_v8, %v657_v3  ;;  %v680_v20 = vshrl.u32 %v560_v11, 16  ;;  %v683_v21 = vshll.u32 %v560_v11, 16  ;;  %v2751_v22 = vld [vmem:[#allocation2 + $0x68] sm:$0xf]  ;;  %v561_v25 = vld [vmem:[#allocation2 + $0x60] sm:$0xf8] }
  0x3a   : > { %5779 = vmatmul.mubr.bf16.gmra.mrb[4].mxu1 %v6799_v19  ;;  %6004 = vmatprep.subr.bf16.mxu0 %v6524_v58  ;;  %v669_v26 = vor.u32 %v668_v14, %v665_v9  ;;  %v2818_v27 = vsel %vm1676_vm1, %v2816_v10, %v2817_v15  ;;  %v674_v30 = vrot.slane %v672_v16, 3  ;;  %v677_v31 = vrot.slane %v675_v17, 4  ;;  %v562_v33 = vld [vmem:[#allocation2 + $0x68] sm:$0xf]  ;;  %v930_v53 = vld [vmem:[#allocation2 + $0x10] sm:$0xf0] }
  0x3b   : > { %5974 = vmatprep.mubr.bf16.mxu0 %v2818_v27  ;;  %v682_v35 = vrot.slane %v680_v20, 3  ;;  %v685_v36 = vrot.slane %v683_v21, 4  ;;  %v2819_v37 = vrot.slane %v2750_v18, 4  ;;  %v2820_v38 = vrot.slane %v2751_v22, 4  ;;  %5811 = vmatpush3.bf16.msra.mxu1 %v6525_v51  ;;  %v6527_v50 = vld [vmem:[%s7429_s3 + $0x168] sm:$0xff]  }
  0x3c   : > { %v6807_v39 = vsel %vm585_vm0, %v661_v13, %v669_v26  ;;  %v678_v43 = vor.u32 %v677_v31, %v674_v30  ;;  %v689_v44 = vshrl.u32 %v561_v25, 16  ;;  %v692_v6 = vshll.u32 %v561_v25, 16  ;;  %5812 = vmatprep.subr.bf16.mxu1 %v6528_v12  ;;  %v6533_v0 = vld [vmem:[%s7429_s3 + $0x68] sm:$0xff]   ;;  %v932_v40 = vld [vmem:[#allocation2 + $0x20] sm:$0xf0]  ;;  %v6530_v31 = vld [vmem:[%s7429_s3 + $0x178] sm:$0xff]  }
  0x3d   : > { %6005 = vmatpush3.bf16.msra.mxu0 %v6524_v58  ;;  %5782 = vmatprep.mubr.bf16.mxu1 %v6807_v39  ;;  %v686_v46 = vor.u32 %v685_v36, %v682_v35  ;;  %v2821_v47 = vsel %vm1676_vm1, %v2819_v37, %v2820_v38  ;;  %v697_v51 = vshrl.u32 %v562_v33, 16  ;;  %v700_v52 = vshll.u32 %v562_v33, 16  ;;  %v931_v58 = vld [vmem:[#allocation2 + $0x18] sm:$0x1f]  ;;  %v933_v11 = vld [vmem:[#allocation2 + $0x28] sm:$0x1f] }
  0x3e   : > { %vm964_vm2 = vsmask.f32 3328  ;;  %6006 = vmatprep.subr.bf16.mxu0 %v6526_v32  ;;  %v691_v54 = vrot.slane %v689_v44, 3  ;;  %v694_v55 = vrot.slane %v692_v6, 4  ;;  %v6475_v56 = vround.rtne.f32 %v6762_v48  ;;  %v5520_v30 = vld [vmem:[%s6674_s20 + $0x48] sm:$0xff]  }
  0x3f   : > { %v363_v1 = vmul.f32 %v5398_v41, %v6689_v23  ;;  %v6822_v59 = vsel %vm585_vm0, %v678_v43, %v686_v46  ;;  %v699_v60 = vrot.slane %v697_v51, 3  ;;  %v702_v61 = vrot.slane %v700_v52, 4  ;;  %5813 = vmatpush3.bf16.msra.mxu1 %v6528_v12  ;;  %v6529_v41 = vld [vmem:[%s7429_s3 + $0x170] sm:$0xff]   ;;  %v6857_v44 = vld [vmem:[#allocation2 + $0x38] sm:$0x1f] }
  0x40   : > { %v364_v62 = vmul.f32 %v5399_v42, %v6689_v23  ;;  %5975 = vmatmul.mubr.bf16.gmra.mrb[8].mxu0 %v2821_v47  ;;  %v695_v63 = vor.u32 %v694_v55, %v691_v54  ;;  %v458_v48 = vpack.c.bf16 %v6475_v56, %v6474_v2  ;;  %v983_v4 = vshrl.u32 %v930_v53, 16  ;;  %5814 = vmatprep.subr.bf16.mxu1 %v6531_v45  ;;  %v6535_v12 = vld [vmem:[%s7429_s3 + $0x70] sm:$0xff]   ;;  %v6537_v51 = vld [vmem:[%s7429_s3 + $0x78] sm:$0xff]  }
  0x41   : > { %v402_v3 = vadd.f32 %v6694_v24, %v363_v1  ;;  %6007 = vmatpush3.bf16.msra.mxu0 %v6526_v32  ;;  %v703_v29 = vor.u32 %v702_v61, %v699_v60  ;;  %v986_v5 = vshll.u32 %v930_v53, 16  ;;  %v991_v7 = vshrl.u32 %v931_v58, 16  ;;  %v6855_v35 = vld [vmem:[#allocation2 + $0x30] sm:$0xf0]  ;;  %v6871_v1 = vld [vmem:[%s7429_s3 + $0x180] sm:$0xff]  }
  0x42   : > { %v403_v42 = vadd.f32 %v6694_v24, %v364_v62  ;;  %5783 = vmatmul.mubr.bf16.gmra.mrb[8].mxu1 %v6822_v59  ;;  %6008 = vmatprep.subr.bf16.mxu0 %v6527_v50  ;;  %v490_v2 = vrot.slane %v458_v48, 4  ;;  %v985_v9 = vrot.slane %v983_v4, 4  ;;  %v994_v10 = vshll.u32 %v931_v58, 16  ;;  %v6879_v62 = vld [vmem:[%s7429_s3 + $0x80] sm:$0xff]  }
  0x43   : > { %v6476_v8 = vround.rtne.f32 %v402_v3  ;;  %v6842_v14 = vsel %vm585_vm0, %v695_v63, %v703_v29  ;;  %v988_v16 = vrot.slane %v986_v5, 5  ;;  %v993_v17 = vrot.slane %v991_v7, 4  ;;  %5815 = vmatpush3.bf16.msra.mxu1 %v6531_v45 }
  0x44   : > { %v6477_v15 = vround.rtne.f32 %v403_v42  ;;  %5786 = vmatprep.mubr.bf16.mxu1 %v6842_v14  ;;  %529 = vst [vmem:[#allocation2 + $0x78] ss:$-4 sps:$4 sm:$0xff] %v490_v2   ;;  %v996_v18 = vrot.slane %v994_v10, 5  ;;  %v5403_v13 = vunpack.c.h.bf16 %v6752_v34  ;;  %v365_v20 = vmul.f32 %v5402_v49, %v6689_v23  ;;  %5816 = vmatprep.subr.bf16.mxu1 %v6533_v0 }
  0x45   : > { %v1000_v21 = vshrl.u32 %v932_v40, 16  ;;  %6009 = vmatpush3.bf16.msra.mxu0 %v6527_v50  ;;  %v989_v25 = vor.u32 %v988_v16, %v985_v9  ;;  %v1003_v26 = vshll.u32 %v932_v40, 16  ;;  %v1008_v27 = vshrl.u32 %v933_v11, 16  ;;  %v5521_v50 = vld [vmem:[%s6674_s20 + $0x50] sm:$0xff]  }
  0x46   : > { %v459_v22 = vpack.c.bf16 %v6477_v15, %v6476_v8  ;;  %6010 = vmatprep.subr.bf16.mxu0 %v6529_v41  ;;  %v997_v32 = vor.u32 %v996_v18, %v993_v17  ;;  %v366_v33 = vmul.f32 %v5403_v13, %v6689_v23  ;;  %v404_v34 = vadd.f32 %v6694_v24, %v365_v20 }
  0x47   : > { %v1002_v49 = vrot.slane %v1000_v21, 4  ;;  %v1005_v37 = vrot.slane %v1003_v26, 5  ;;  %v1010_v38 = vrot.slane %v1008_v27, 4  ;;  %v1011_v43 = vshll.u32 %v933_v11, 16  ;;  %5817 = vmatpush3.bf16.msra.mxu1 %v6533_v0 }
  0x48   : > { %v491_v36 = vrot.slane %v459_v22, 4  ;;  %v6860_v6 = vsel %vm964_vm2, %v989_v25, %v997_v32  ;;  %v405_v45 = vadd.f32 %v6694_v24, %v366_v33  ;;  %v6478_v46 = vround.rtne.f32 %v404_v34  ;;  %5818 = vmatprep.subr.bf16.mxu1 %v6535_v12 }
  0x49   : > { %v5406_v47 = vunpack.c.l.bf16 %v5520_v30  ;;  %6011 = vmatpush3.bf16.msra.mxu0 %v6529_v41  ;;  %v1006_v52 = vor.u32 %v1005_v37, %v1002_v49  ;;  %v1013_v53 = vrot.slane %v1011_v43, 5  ;;  %v5407_v54 = vunpack.c.h.bf16 %v5520_v30 }
  0x4a   : > { %531 = vst [vmem:[#allocation2 + $0x88] ss:$-4 sps:$4 sm:$0xff] %v491_v36   ;;  %v1017_v55 = vshrl.u32 %v6855_v35, 16  ;;  %6012 = vmatprep.subr.bf16.mxu0 %v6530_v31  ;;  %v6479_v56 = vround.rtne.f32 %v405_v45  ;;  %v1020_v60 = vshll.u32 %v6855_v35, 16  ;;  %v1025_v61 = vshrl.u32 %v6857_v44, 16 }
  0x4b   : > { %v367_v58 = vmul.f32 %v5406_v47, %v6689_v23  ;;  %v2752_v63 = vld [vmem:[#allocation2 + $0x70] sm:$0xf0]  ;;  %v2753_v48 = vld [vmem:[#allocation2 + $0x78] sm:$0xf]  ;;  %v1014_v41 = vor.u32 %v1013_v53, %v1010_v38  ;;  %v368_v4 = vmul.f32 %v5407_v54, %v6689_v23  ;;  %v5410_v0 = vunpack.c.l.bf16 %v5521_v50  ;;  %5819 = vmatpush3.bf16.msra.mxu1 %v6535_v12  ;;  %v936_v53 = vld [vmem:[#allocation2 + $0x40] sm:$0xf0] }
  0x4c   : > { %v563_v3 = vld [vmem:[#allocation2 + $0x70] sm:$0xf8]  ;;  %v5411_v29 = vunpack.c.h.bf16 %v5521_v50  ;;  %v2822_v42 = vrot.slane %v2752_v63, 4  ;;  %v2823_v5 = vrot.slane %v2753_v48, 4  ;;  %v564_v7 = vld [vmem:[#allocation2 + $0x78] sm:$0xf]  ;;  %5820 = vmatprep.subr.bf16.mxu1 %v6537_v51  ;;  %v460_v10 = vpack.c.bf16 %v6479_v56, %v6478_v46 }
  0x4d   : > { %v706_v40 = vshrl.u32 %v563_v3, 16  ;;  %v709_v2 = vshll.u32 %v563_v3, 16  ;;  %v714_v8 = vshrl.u32 %v564_v7, 16  ;;  %v717_v9 = vshll.u32 %v564_v7, 16  ;;  %6013 = vmatpush3.bf16.msra.mxu0 %v6530_v31  ;;  %v6896_v54 = vld [vmem:[#allocation2 + $0x48] sm:$0x1f] }
  0x4e   : > { %v6883_v11 = vsel %vm964_vm2, %v1006_v52, %v1014_v41  ;;  %v2824_v15 = vsel %vm1676_vm1, %v2822_v42, %v2823_v5  ;;  %6046 = vmatprep.subr.bf16.mxu0 %v6871_v1  ;;  %v406_v12 = vadd.f32 %v6694_v24, %v367_v58  ;;  %v492_v20 = vrot.slane %v460_v10, 4 }
  0x4f   : > { %v708_v16 = vrot.slane %v706_v40, 3  ;;  %v711_v17 = vrot.slane %v709_v2, 4  ;;  %5978 = vmatprep.mubr.bf16.mxu0 %v2824_v15  ;;  %v716_v18 = vrot.slane %v714_v8, 3  ;;  %v719_v13 = vrot.slane %v717_v9, 4  ;;  %5821 = vmatpush3.bf16.msra.mxu1 %v6537_v51 }
  0x50   : > { %v407_v21 = vadd.f32 %v6694_v24, %v368_v4  ;;  %v6480_v30 = vround.rtne.f32 %v406_v12  ;;  %v369_v31 = vmul.f32 %v5410_v0, %v6689_v23  ;;  %v370_v32 = vmul.f32 %v5411_v29, %v6689_v23  ;;  %5854 = vmatprep.subr.bf16.mxu1 %v6879_v62  ;;  %533 = vst [vmem:[#allocation2 + $0x98] ss:$-4 sps:$4 sm:$0xff] %v492_v20  }
  0x51   : > { %v712_v22 = vor.u32 %v711_v17, %v708_v16  ;;  %v2754_v25 = vld [vmem:[#allocation2 + $0x80] sm:$0xf0]  ;;  %v2755_v26 = vld [vmem:[#allocation2 + $0x88] sm:$0xf]  ;;  %v720_v33 = vor.u32 %v719_v13, %v716_v18  ;;  %v1019_v52 = vrot.slane %v1017_v55, 4  ;;  %v1022_v3 = vrot.slane %v1020_v60, 5 }
  0x52   : > { %v565_v27 = vld [vmem:[#allocation2 + $0x80] sm:$0xf8]  ;;  %v2825_v34 = vrot.slane %v2754_v25, 4  ;;  %v2826_v49 = vrot.slane %v2755_v26, 4  ;;  %v566_v36 = vld [vmem:[#allocation2 + $0x88] sm:$0xf]  ;;  %v6481_v46 = vround.rtne.f32 %v407_v21  ;;  %v408_v4 = vadd.f32 %v6694_v24, %v369_v31 }
  0x53   : > { %v723_v37 = vshrl.u32 %v565_v27, 16  ;;  %v726_v38 = vshll.u32 %v565_v27, 16  ;;  %v731_v43 = vshrl.u32 %v566_v36, 16  ;;  %v734_v45 = vshll.u32 %v566_v36, 16  ;;  %v5522_v25 = vld [vmem:[%s6674_s20 + $0x58] sm:$0xff]  }
  0x54   : > { %v6893_v47 = vsel %vm585_vm0, %v712_v22, %v720_v33  ;;  %v2827_v50 = vsel %vm1676_vm1, %v2825_v34, %v2826_v49  ;;  %v461_v48 = vpack.c.bf16 %v6481_v46, %v6480_v30  ;;  %v1027_v41 = vrot.slane %v1025_v61, 4  ;;  %v6534_v22 = vld [vmem:[%s7429_s3 + $0x188] sm:$0xff]   ;;  %v938_v26 = vld [vmem:[#allocation2 + $0x50] sm:$0xf0]  ;;  %v939_v33 = vld [vmem:[#allocation2 + $0x58] sm:$0x1f] }
  0x55   : > { %v725_v51 = vrot.slane %v723_v37, 3  ;;  %5787 = vmatmul.mubr.bf16.gmra.mrb[12].mxu1 %v6893_v47  ;;  %5979 = vmatmul.mubr.bf16.gmra.mrb[12].mxu0 %v2827_v50  ;;  %v728_v56 = vrot.slane %v726_v38, 4  ;;  %v733_v58 = vrot.slane %v731_v43, 3  ;;  %v736_v63 = vrot.slane %v734_v45, 4 }
  0x56   : > { %6014 = vmatprep.mubr.bf16.mxu0 %v6860_v6  ;;  %v1028_v55 = vshll.u32 %v6857_v44, 16  ;;  %v493_v42 = vrot.slane %v461_v48, 4  ;;  %v409_v5 = vadd.f32 %v6694_v24, %v370_v32  ;;  %v1023_v7 = vor.u32 %v1022_v3, %v1019_v52 }
  0x57   : > { %v729_v0 = vor.u32 %v728_v56, %v725_v51  ;;  %v737_v29 = vor.u32 %v736_v63, %v733_v58  ;;  %v6482_v2 = vround.rtne.f32 %v408_v4  ;;  %v1034_v8 = vshrl.u32 %v936_v53, 16  ;;  %v567_v35 = vld [vmem:[#allocation2 + $0x90] sm:$0xf8]  ;;  %v568_v60 = vld [vmem:[#allocation2 + $0x98] sm:$0xf] }
  0x58   : > { %v1030_v40 = vrot.slane %v1028_v55, 5  ;;  %535 = vst [vmem:[#allocation2 + $0xa8] ss:$-4 sps:$4 sm:$0xff] %v493_v42   ;;  %v6483_v61 = vround.rtne.f32 %v409_v5  ;;  %v1037_v44 = vshll.u32 %v936_v53, 16  ;;  %v1042_v10 = vshrl.u32 %v6896_v54, 16  ;;  %v6536_v56 = vld [vmem:[%s7429_s3 + $0x190] sm:$0xff]  }
  0x59   : > { %v6908_v9 = vsel %vm585_vm0, %v729_v0, %v737_v29  ;;  %v740_v15 = vshrl.u32 %v567_v35, 16  ;;  %v743_v16 = vshll.u32 %v567_v35, 16  ;;  %v748_v17 = vshrl.u32 %v568_v60, 16 }
  0x5a   : > { %5790 = vmatprep.mubr.bf16.mxu1 %v6908_v9  ;;  %v751_v12 = vshll.u32 %v568_v60, 16  ;;  %v1031_v18 = vor.u32 %v1030_v40, %v1027_v41  ;;  %v462_v13 = vpack.c.bf16 %v6483_v61, %v6482_v2  ;;  %v1036_v20 = vrot.slane %v1034_v8, 4  ;;  %v5523_v60 = vld [vmem:[%s6674_s20 + $0x60] sm:$0xff]   ;;  %v6538_v61 = vld [vmem:[%s7429_s3 + $0x198] sm:$0xff]  }
  0x5b   : > { %v1039_v21 = vrot.slane %v1037_v44, 5  ;;  %v742_v27 = vrot.slane %v740_v15, 3  ;;  %v745_v30 = vrot.slane %v743_v16, 4  ;;  %v750_v31 = vrot.slane %v748_v17, 3 }
  0x5c   : > { %v753_v32 = vrot.slane %v751_v12, 4  ;;  %v6918_v34 = vsel %vm964_vm2, %v1023_v7, %v1031_v18  ;;  %v494_v49 = vrot.slane %v462_v13, 4  ;;  %v1044_v37 = vrot.slane %v1042_v10, 4 }
  0x5d   : > { %6015 = vmatmul.mubr.bf16.vlgmr.msra.gmra.mrb[0].mxu0 %v6883_v11  ;;  %v1040_v36 = vor.u32 %v1039_v21, %v1036_v20  ;;  %v746_v38 = vor.u32 %v745_v30, %v742_v27  ;;  %v1045_v45 = vshll.u32 %v6896_v54, 16  ;;  %v5414_v46 = vunpack.c.l.bf16 %v5522_v25 }
  0x5e   : > { %v754_v43 = vor.u32 %v753_v32, %v750_v31  ;;  %6047 = vmatpush3.bf16.msra.mxu0 %v6871_v1  ;;  %6018 = vmatprep.mubr.bf16.mxu0 %v6918_v34  ;;  %537 = vst [vmem:[#allocation2 + $0xb8] ss:$-4 sps:$4 sm:$0xff] %v494_v49   ;;  %v5415_v50 = vunpack.c.h.bf16 %v5522_v25  ;;  %v1051_v51 = vshrl.u32 %v938_v26, 16  ;;  %v1054_v52 = vshll.u32 %v938_v26, 16 }
  0x5f   : > { %6048 = vmatprep.subr.bf16.mxu0 %v6534_v22  ;;  %v1059_v53 = vshrl.u32 %v939_v33, 16  ;;  %v569_v63 = vld [vmem:[#allocation2 + $0xa0] sm:$0xf8]  ;;  %v570_v1 = vld [vmem:[#allocation2 + $0xa8] sm:$0xf]  ;;  %v1047_v48 = vrot.slane %v1045_v45, 5  ;;  %v371_v3 = vmul.f32 %v5414_v46, %v6689_v23  ;;  %v5418_v25 = vunpack.c.l.bf16 %v5523_v60 }
  0x60   : > { %v6927_v58 = vsel %vm585_vm0, %v746_v38, %v754_v43  ;;  %v1062_v54 = vshll.u32 %v939_v33, 16  ;;  %v757_v41 = vshrl.u32 %v569_v63, 16  ;;  %v760_v55 = vshll.u32 %v569_v63, 16  ;;  %v6540_v33 = vld [vmem:[%s7429_s3 + $0x1a0] sm:$0xff]  }
  0x61   : > { %5791 = vmatmul.mubr.bf16.gmra.mrb[16].mxu1 %v6927_v58  ;;  %v765_v4 = vshrl.u32 %v570_v1, 16  ;;  %v768_v0 = vshll.u32 %v570_v1, 16  ;;  %v1048_v29 = vor.u32 %v1047_v48, %v1044_v37  ;;  %v372_v42 = vmul.f32 %v5415_v50, %v6689_v23  ;;  %v6943_v23 = vld [vmem:[%s7428_s2] ss:$0 sm:$0xff]  ;;  %v940_v45 = vld [vmem:[#allocation2 + $0x60] sm:$0xf0] }
  0x62   : > { %6049 = vmatpush3.bf16.msra.mxu0 %v6534_v22  ;;  %v410_v5 = vadd.f32 %v6694_v24, %v371_v3  ;;  %v1053_v7 = vrot.slane %v1051_v51, 4  ;;  %v759_v40 = vrot.slane %v757_v41, 3  ;;  %v762_v2 = vrot.slane %v760_v55, 4  ;;  %v6957_v38 = vld [vmem:[%s7427_s1] ss:$0 sm:$0xff]  ;;  %v5524_v3 = vld [vmem:[%s6674_s20 + $0x68] sm:$0xff]  }
  0x63   : > { %v767_v8 = vrot.slane %v765_v4, 3  ;;  %v770_v35 = vrot.slane %v768_v0, 4  ;;  %6050 = vmatprep.subr.bf16.mxu0 %v6536_v56  ;;  %v6938_v44 = vsel %vm964_vm2, %v1040_v36, %v1048_v29  ;;  %v411_v24 = vadd.f32 %v6943_v23, %v372_v42  ;;  %v6542_v41 = vld [vmem:[%s7429_s3 + $0x1a8] sm:$0xff]  }
  0x64   : > { %v6484_v10 = vround.rtne.f32 %v410_v5  ;;  %v1056_v15 = vrot.slane %v1054_v52, 5  ;;  %v763_v16 = vor.u32 %v762_v2, %v759_v40  ;;  %v1061_v12 = vrot.slane %v1059_v53, 4  ;;  %v941_v53 = vld [vmem:[#allocation2 + $0x68] sm:$0x1f] }
  0x65   : > { %v771_v17 = vor.u32 %v770_v35, %v767_v8  ;;  %6019 = vmatmul.mubr.bf16.gmra.mrb[4].mxu0 %v6938_v44  ;;  %v1064_v18 = vrot.slane %v1062_v54, 5  ;;  %v571_v13 = vld [vmem:[#allocation2 + $0xb0] sm:$0xf8]  ;;  %v572_v20 = vld [vmem:[#allocation2 + $0xb8] sm:$0xf]  ;;  %v6485_v21 = vround.rtne.f32 %v411_v24  ;;  %v5419_v26 = vunpack.c.h.bf16 %v5523_v60 }
  0x66   : > { %v1057_v22 = vor.u32 %v1056_v15, %v1053_v7  ;;  %6051 = vmatpush3.bf16.msra.mxu0 %v6536_v56  ;;  %v774_v30 = vshrl.u32 %v571_v13, 16  ;;  %v777_v31 = vshll.u32 %v571_v13, 16  ;;  %v782_v32 = vshrl.u32 %v572_v20, 16  ;;  %v942_v54 = vld [vmem:[#allocation2 + $0x70] sm:$0xf0] }
  0x67   : > { %v6948_v27 = vsel %vm585_vm0, %v763_v16, %v771_v17  ;;  %6052 = vmatprep.subr.bf16.mxu0 %v6538_v61  ;;  %v785_v49 = vshll.u32 %v572_v20, 16  ;;  %v463_v36 = vpack.c.bf16 %v6485_v21, %v6484_v10  ;;  %v1065_v37 = vor.u32 %v1064_v18, %v1061_v12  ;;  %v5525_v17 = vld [vmem:[%s6674_s20 + $0x70] sm:$0xff]  }
  0x68   : > { %5794 = vmatprep.mubr.bf16.mxu1 %v6948_v27  ;;  %v373_v43 = vmul.f32 %v6957_v38, %v5418_v25  ;;  %v776_v46 = vrot.slane %v774_v30, 3  ;;  %v779_v50 = vrot.slane %v777_v31, 4  ;;  %v784_v51 = vrot.slane %v782_v32, 3  ;;  %v6544_v21 = vld [vmem:[%s7429_s3 + $0x1b0] sm:$0xff]  }
  0x69   : > { %v374_v52 = vmul.f32 %v6957_v38, %v5419_v26  ;;  %v787_v56 = vrot.slane %v785_v49, 4  ;;  %v495_v63 = vrot.slane %v463_v36, 4  ;;  %v6962_v1 = vsel %vm964_vm2, %v1057_v22, %v1065_v37 }
  0x6a   : > { %v412_v48 = vadd.f32 %v6943_v23, %v373_v43  ;;  %6053 = vmatpush3.bf16.msra.mxu0 %v6538_v61  ;;  %v780_v55 = vor.u32 %v779_v50, %v776_v46  ;;  %6022 = vmatprep.mubr.bf16.mxu0 %v6962_v1  ;;  %v1068_v0 = vshrl.u32 %v940_v45, 16  ;;  %v1071_v29 = vshll.u32 %v940_v45, 16  ;;  %v943_v61 = vld [vmem:[#allocation2 + $0x78] sm:$0x1f] }
  0x6b   : > { %v413_v4 = vadd.f32 %v6943_v23, %v374_v52  ;;  %6054 = vmatprep.subr.bf16.mxu0 %v6540_v33  ;;  %v788_v42 = vor.u32 %v787_v56, %v784_v51  ;;  %539 = vst [vmem:[#allocation2 + $0xc8] ss:$-4 sps:$4 sm:$0xff] %v495_v63   ;;  %v1076_v7 = vshrl.u32 %v941_v53, 16  ;;  %v1079_v40 = vshll.u32 %v941_v53, 16  ;;  %v6546_v63 = vld [vmem:[%s7429_s3 + $0x1b8] sm:$0xff]  }
  0x6c   : > { %v6486_v5 = vround.rtne.f32 %v412_v48  ;;  %v1070_v8 = vrot.slane %v1068_v0, 4  ;;  %v1073_v35 = vrot.slane %v1071_v29, 5  ;;  %v5422_v60 = vunpack.c.l.bf16 %v5524_v3 }
  0x6d   : > { %v6487_v2 = vround.rtne.f32 %v413_v4  ;;  %v6972_v24 = vsel %vm585_vm0, %v780_v55, %v788_v42  ;;  %v1078_v10 = vrot.slane %v1076_v7, 4  ;;  %v1081_v15 = vrot.slane %v1079_v40, 5  ;;  %v944_v42 = vld [vmem:[#allocation2 + $0x80] sm:$0xf0] }
  0x6e   : > { %v5423_v16 = vunpack.c.h.bf16 %v5524_v3  ;;  %6055 = vmatpush3.bf16.msra.mxu0 %v6540_v33  ;;  %5795 = vmatmul.mubr.bf16.gmra.mrb[20].mxu1 %v6972_v24  ;;  %v1074_v18 = vor.u32 %v1073_v35, %v1070_v8  ;;  %v375_v13 = vmul.f32 %v6957_v38, %v5422_v60  ;;  %v1085_v20 = vshrl.u32 %v942_v54, 16  ;;  %v6994_v7 = vld [vmem:[%s7429_s3 + $0x1c0] sm:$0xff]  }
  0x6f   : > { %v464_v12 = vpack.c.bf16 %v6487_v2, %v6486_v5  ;;  %6056 = vmatprep.subr.bf16.mxu0 %v6542_v41  ;;  %v1082_v22 = vor.u32 %v1081_v15, %v1078_v10  ;;  %v1088_v26 = vshll.u32 %v942_v54, 16  ;;  %v1093_v30 = vshrl.u32 %v943_v61, 16  ;;  %v945_v5 = vld [vmem:[#allocation2 + $0x88] sm:$0x1f] }
  0x70   : > { %v376_v25 = vmul.f32 %v6957_v38, %v5423_v16  ;;  %v414_v32 = vadd.f32 %v6943_v23, %v375_v13  ;;  %v1087_v33 = vrot.slane %v1085_v20, 4  ;;  %v1096_v49 = vshll.u32 %v943_v61, 16 }
  0x71   : > { %v496_v31 = vrot.slane %v464_v12, 4  ;;  %v6983_v36 = vsel %vm964_vm2, %v1074_v18, %v1082_v22  ;;  %v1090_v43 = vrot.slane %v1088_v26, 5  ;;  %v1095_v45 = vrot.slane %v1093_v30, 4 }
  0x72   : > { %v415_v37 = vadd.f32 %v6943_v23, %v376_v25  ;;  %6057 = vmatpush3.bf16.msra.mxu0 %v6542_v41  ;;  %v573_v46 = vld [vmem:[#allocation2 + $0xc0] sm:$0xf8]  ;;  %v574_v50 = vld [vmem:[#allocation2 + $0xc8] sm:$0xf]  ;;  %v6488_v51 = vround.rtne.f32 %v414_v32  ;;  %v1098_v52 = vrot.slane %v1096_v49, 5  ;;  %v5426_v53 = vunpack.c.l.bf16 %v5525_v17 }
  0x73   : > { %541 = vst [vmem:[#allocation2 + $0xd8] ss:$-4 sps:$4 sm:$0xff] %v496_v31   ;;  %6023 = vmatmul.mubr.bf16.gmra.mrb[8].mxu0 %v6983_v36  ;;  %v5427_v56 = vunpack.c.h.bf16 %v5525_v17  ;;  %6058 = vmatprep.subr.bf16.mxu0 %v6544_v21  ;;  %v791_v48 = vshrl.u32 %v573_v46, 16  ;;  %v794_v3 = vshll.u32 %v573_v46, 16  ;;  %v799_v54 = vshrl.u32 %v574_v50, 16 }
  0x74   : > { %v802_v55 = vshll.u32 %v574_v50, 16  ;;  %v6489_v4 = vround.rtne.f32 %v415_v37  ;;  %v1091_v41 = vor.u32 %v1090_v43, %v1087_v33  ;;  %v1099_v0 = vor.u32 %v1098_v52, %v1095_v45 }
  0x75   : > { %v377_v29 = vmul.f32 %v6957_v38, %v5426_v53  ;;  %v793_v40 = vrot.slane %v791_v48, 3  ;;  %v796_v2 = vrot.slane %v794_v3, 4  ;;  %v801_v8 = vrot.slane %v799_v54, 3  ;;  %v947_v3 = vld [vmem:[#allocation2 + $0x98] sm:$0x1f] }
  0x76   : > { %v804_v35 = vrot.slane %v802_v55, 4  ;;  %6059 = vmatpush3.bf16.msra.mxu0 %v6544_v21  ;;  %v465_v60 = vpack.c.bf16 %v6489_v4, %v6488_v51  ;;  %v6997_v61 = vsel %vm964_vm2, %v1091_v41, %v1099_v0  ;;  %v378_v10 = vmul.f32 %v6957_v38, %v5427_v56  ;;  %v946_v51 = vld [vmem:[#allocation2 + $0x90] sm:$0xf0]  ;;  %v1612_v4 = vld [vmem:[#allocation2] sm:$0xf0] }
  0x77   : > { %v416_v15 = vadd.f32 %v6943_v23, %v377_v29  ;;  %6060 = vmatprep.subr.bf16.mxu0 %v6546_v63  ;;  %v797_v16 = vor.u32 %v796_v2, %v793_v40  ;;  %6026 = vmatprep.mubr.bf16.mxu0 %v6997_v61  ;;  %v1102_v12 = vshrl.u32 %v944_v42, 16  ;;  %v1105_v18 = vshll.u32 %v944_v42, 16  ;;  %v1613_v29 = vld [vmem:[#allocation2 + $0x8] sm:$0xf]  ;;  %v948_v2 = vld [vmem:[#allocation2 + $0xa0] sm:$0xf0] }
  0x78   : > { %v805_v17 = vor.u32 %v804_v35, %v801_v8  ;;  %v497_v13 = vrot.slane %v465_v60, 4  ;;  %v417_v20 = vadd.f32 %v6943_v23, %v378_v10  ;;  %v1110_v22 = vshrl.u32 %v945_v5, 16 }
  0x79   : > { %v6490_v30 = vround.rtne.f32 %v416_v15  ;;  %v1104_v31 = vrot.slane %v1102_v12, 4  ;;  %v1107_v32 = vrot.slane %v1105_v18, 5  ;;  %v1113_v50 = vshll.u32 %v945_v5, 16 }
  0x7a   : > { %v7004_v21 = vsel %vm585_vm0, %v797_v16, %v805_v17  ;;  %v575_v25 = vld [vmem:[#allocation2 + $0xd0] sm:$0xf8]  ;;  %v576_v26 = vld [vmem:[#allocation2 + $0xd8] sm:$0xf]  ;;  %6061 = vmatpush3.bf16.msra.mxu0 %v6546_v63  ;;  %543 = vst [vmem:[#allocation2 + $0xe8] ss:$-4 sps:$4 sm:$0xff] %v497_v13   ;;  %v6491_v45 = vround.rtne.f32 %v417_v20 }
  0x7b   : > { %5798 = vmatprep.mubr.bf16.mxu1 %v7004_v21  ;;  %v808_v33 = vshrl.u32 %v575_v25, 16  ;;  %v811_v49 = vshll.u32 %v575_v25, 16  ;;  %v816_v37 = vshrl.u32 %v576_v26, 16  ;;  %v819_v43 = vshll.u32 %v576_v26, 16  ;;  %6094 = vmatprep.subr.bf16.mxu0 %v6994_v7 }
  0x7c   : > { %v1112_v46 = vrot.slane %v1110_v22, 4  ;;  %v466_v54 = vpack.c.bf16 %v6491_v45, %v6490_v30  ;;  %v1108_v63 = vor.u32 %v1107_v32, %v1104_v31  ;;  %v1115_v55 = vrot.slane %v1113_v50, 5 }
  0x7d   : > { %v810_v52 = vrot.slane %v808_v33, 3  ;;  %v813_v53 = vrot.slane %v811_v49, 4  ;;  %v818_v56 = vrot.slane %v816_v37, 3  ;;  %v821_v48 = vrot.slane %v819_v43, 4  ;;  %v949_v49 = vld [vmem:[#allocation2 + $0xa8] sm:$0x1f] }
  0x7e   : > { %v1119_v42 = vshrl.u32 %v946_v51, 16  ;;  %v1122_v40 = vshll.u32 %v946_v51, 16  ;;  %v498_v8 = vrot.slane %v466_v54, 4  ;;  %v1116_v35 = vor.u32 %v1115_v55, %v1112_v46 }
  0x7f   : > { %v814_v41 = vor.u32 %v813_v53, %v810_v52  ;;  %v822_v0 = vor.u32 %v821_v48, %v818_v56  ;;  %v1127_v60 = vshrl.u32 %v947_v3, 16  ;;  %v1130_v16 = vshll.u32 %v947_v3, 16  ;;  %v7016_v52 = vld [vmem:[#allocation2 + $0x10] sm:$0xf0] }
  0x80   : > { %v1121_v10 = vrot.slane %v1119_v42, 4  ;;  %v1124_v15 = vrot.slane %v1122_v40, 5  ;;  %545 = vst [vmem:[#allocation2 + $0xf8] ss:$-4 sps:$4 sm:$0xff] %v498_v8   ;;  %v7013_v18 = vsel %vm964_vm2, %v1108_v63, %v1116_v35  ;;  %v1677_v13 = vrot.slane %v1612_v4, 4 }
  0x81   : > { %v7009_v5 = vsel %vm585_vm0, %v814_v41, %v822_v0  ;;  %v577_v17 = vld [vmem:[#allocation2 + $0xe0] sm:$0xf8]  ;;  %v578_v12 = vld [vmem:[#allocation2 + $0xe8] sm:$0xf]  ;;  %v1129_v20 = vrot.slane %v1127_v60, 4  ;;  %6027 = vmatmul.mubr.bf16.gmra.mrb[12].mxu0 %v7013_v18  ;;  %v1678_v31 = vrot.slane %v1613_v29, 4 }
  0x82   : > { %5799 = vmatmul.mubr.bf16.gmra.mrb[24].mxu1 %v7009_v5  ;;  %v825_v22 = vshrl.u32 %v577_v17, 16  ;;  %v828_v25 = vshll.u32 %v577_v17, 16  ;;  %v833_v26 = vshrl.u32 %v578_v12, 16  ;;  %v836_v30 = vshll.u32 %v578_v12, 16  ;;  %v950_v41 = vld [vmem:[#allocation2 + $0xb0] sm:$0xf0] }
  0x83   : > { %v1125_v32 = vor.u32 %v1124_v15, %v1121_v10  ;;  %v1132_v33 = vrot.slane %v1130_v16, 5  ;;  %v1136_v37 = vshrl.u32 %v948_v2, 16  ;;  %v1139_v56 = vshll.u32 %v948_v2, 16  ;;  %v7026_v8 = vld [vmem:[#allocation2 + $0x18] sm:$0xf] }
  0x84   : > { %v827_v43 = vrot.slane %v825_v22, 3  ;;  %v830_v45 = vrot.slane %v828_v25, 4  ;;  %v835_v46 = vrot.slane %v833_v26, 3  ;;  %v838_v50 = vrot.slane %v836_v30, 4  ;;  %v951_v17 = vld [vmem:[#allocation2 + $0xb8] sm:$0x1f] }
  0x85   : > { %v1133_v51 = vor.u32 %v1132_v33, %v1129_v20  ;;  %v1138_v53 = vrot.slane %v1136_v37, 4  ;;  %v1144_v54 = vshrl.u32 %v949_v49, 16  ;;  %v1147_v63 = vshll.u32 %v949_v49, 16  ;;  %v1616_v25 = vld [vmem:[#allocation2 + $0x20] sm:$0xf0] }
  0x86   : > { %v831_v48 = vor.u32 %v830_v45, %v827_v43  ;;  %v839_v3 = vor.u32 %v838_v50, %v835_v46  ;;  %v1141_v4 = vrot.slane %v1139_v56, 5  ;;  %v1679_v40 = vsel %vm1676_vm1, %v1677_v13, %v1678_v31  ;;  %v952_v26 = vld [vmem:[#allocation2 + $0xc0] sm:$0xf0]  ;;  %v953_v49 = vld [vmem:[#allocation2 + $0xc8] sm:$0x1f] }
  0x87   : > { %v7019_v55 = vsel %vm964_vm2, %v1125_v32, %v1133_v51  ;;  %v579_v29 = vld [vmem:[#allocation2 + $0xf0] sm:$0xf8]  ;;  %v580_v42 = vld [vmem:[#allocation2 + $0xf8] sm:$0xf]  ;;  %v1146_v2 = vrot.slane %v1144_v54, 4  ;;  %v1149_v35 = vrot.slane %v1147_v63, 5 }
  0x88   : > { %v7022_v0 = vsel %vm585_vm0, %v831_v48, %v839_v3  ;;  %6030 = vmatprep.mubr.bf16.mxu0 %v7019_v55  ;;  %v842_v60 = vshrl.u32 %v579_v29, 16  ;;  %v845_v10 = vshll.u32 %v579_v29, 16  ;;  %v850_v15 = vshrl.u32 %v580_v42, 16  ;;  %v1617_v43 = vld [vmem:[#allocation2 + $0x28] sm:$0xf]  ;;  %v7034_v51 = vld [vmem:[%s6674_s20 + $0x78] sm:$0xff]  }
  0x89   : > { %5802 = vmatprep.mubr.bf16.mxu1 %v7022_v0  ;;  %v853_v16 = vshll.u32 %v580_v42, 16  ;;  %v1680_v12 = vrot.slane %v7016_v52, 4  ;;  %v1142_v20 = vor.u32 %v1141_v4, %v1138_v53  ;;  %v1150_v22 = vor.u32 %v1149_v35, %v1146_v2  ;;  %v954_v29 = vld [vmem:[#allocation2 + $0xd0] sm:$0xf0] }
  0x8a   : > { %v1153_v13 = vshrl.u32 %v950_v41, 16  ;;  %v844_v30 = vrot.slane %v842_v60, 3  ;;  %v847_v31 = vrot.slane %v845_v10, 4  ;;  %v852_v32 = vrot.slane %v850_v15, 3  ;;  %v955_v60 = vld [vmem:[#allocation2 + $0xd8] sm:$0x1f] }
  0x8b   : > { %v855_v33 = vrot.slane %v853_v16, 4  ;;  %v7031_v37 = vsel %vm964_vm2, %v1142_v20, %v1150_v22  ;;  %v1156_v46 = vshll.u32 %v950_v41, 16  ;;  %v1161_v50 = vshrl.u32 %v951_v17, 16 }
  0x8c   : > { %v1155_v45 = vrot.slane %v1153_v13, 4  ;;  %v848_v52 = vor.u32 %v847_v31, %v844_v30  ;;  %v1681_v56 = vrot.slane %v7026_v8, 4  ;;  %6031 = vmatmul.mubr.bf16.gmra.mrb[16].mxu0 %v7031_v37  ;;  %v1164_v48 = vshll.u32 %v951_v17, 16  ;;  %v1618_v13 = vld [vmem:[#allocation2 + $0x30] sm:$0xf0] }
  0x8d   : > { %v856_v53 = vor.u32 %v855_v33, %v852_v32  ;;  %v1683_v3 = vrot.slane %v1616_v25, 4  ;;  %v1158_v54 = vrot.slane %v1156_v46, 5  ;;  %v1163_v63 = vrot.slane %v1161_v50, 4  ;;  %v956_v33 = vld [vmem:[#allocation2 + $0xe0] sm:$0xf0] }
  0x8e   : > { %v1170_v4 = vshrl.u32 %v952_v26, 16  ;;  %v1166_v2 = vrot.slane %v1164_v48, 5  ;;  %v1173_v41 = vshll.u32 %v952_v26, 16  ;;  %v1178_v35 = vshrl.u32 %v953_v49, 16  ;;  %v1620_v48 = vld [vmem:[#allocation2 + $0x40] sm:$0xf0] }
  0x8f   : > { %v7039_v42 = vsel %vm585_vm0, %v848_v52, %v856_v53  ;;  %v1159_v10 = vor.u32 %v1158_v54, %v1155_v45  ;;  %v1181_v8 = vshll.u32 %v953_v49, 16  ;;  %v5430_v16 = vunpack.c.l.bf16 %v7034_v51  ;;  %v1619_v45 = vld [vmem:[#allocation2 + $0x38] sm:$0xf] }
  0x90   : > { %5803 = vmatmul.mubr.bf16.gmra.mrb[28].mxu1 %v7039_v42  ;;  %v1172_v15 = vrot.slane %v1170_v4, 4  ;;  %v1684_v17 = vrot.slane %v1617_v43, 4  ;;  %v1167_v20 = vor.u32 %v1166_v2, %v1163_v63  ;;  %v1175_v22 = vrot.slane %v1173_v41, 5  ;;  %v6541_v43 = vld [vmem:[%s7429_s3 + $0x88] sm:$0xff]  }
  0x91   : > { %5822 = vmatprep.mubr.bf16.mxu1 %v1679_v40  ;;  %v1180_v25 = vrot.slane %v1178_v35, 4  ;;  %v1183_v30 = vrot.slane %v1181_v8, 5  ;;  %v1187_v31 = vshrl.u32 %v954_v29, 16  ;;  %v1190_v32 = vshll.u32 %v954_v29, 16  ;;  %v1621_v29 = vld [vmem:[#allocation2 + $0x48] sm:$0xf] }
  0x92   : > { %v5431_v26 = vunpack.c.h.bf16 %v7034_v51  ;;  %v7045_v46 = vsel %vm964_vm2, %v1159_v10, %v1167_v20  ;;  %v1176_v50 = vor.u32 %v1175_v22, %v1172_v15  ;;  %v1195_v49 = vshrl.u32 %v955_v60, 16  ;;  %v957_v51 = vld [vmem:[#allocation2 + $0xe8] sm:$0x1f]  ;;  %v958_v35 = vld [vmem:[#allocation2 + $0xf0] sm:$0xf0] }
  0x93   : > { %v1198_v52 = vshll.u32 %v955_v60, 16  ;;  %v1682_v40 = vsel %vm1676_vm1, %v1680_v12, %v1681_v56  ;;  %6034 = vmatprep.mubr.bf16.mxu0 %v7045_v46  ;;  %v1184_v53 = vor.u32 %v1183_v30, %v1180_v25  ;;  %v1189_v54 = vrot.slane %v1187_v31, 4  ;;  %v959_v8 = vld [vmem:[#allocation2 + $0xf8] sm:$0x1f] }
  0x94   : > { %v1192_v63 = vrot.slane %v1190_v32, 5  ;;  %v1685_v4 = vsel %vm1676_vm1, %v1683_v3, %v1684_v17  ;;  %v1197_v2 = vrot.slane %v1195_v49, 4  ;;  %v379_v60 = vmul.f32 %v6957_v38, %v5430_v16 }
  0x95   : > { %v1200_v41 = vrot.slane %v1198_v52, 5  ;;  %v7055_v12 = vsel %vm964_vm2, %v1176_v50, %v1184_v53  ;;  %v1204_v10 = vshrl.u32 %v956_v33, 16  ;;  %v1207_v15 = vshll.u32 %v956_v33, 16 }
  0x96   : > { %v1193_v56 = vor.u32 %v1192_v63, %v1189_v54  ;;  %v1686_v20 = vrot.slane %v1618_v13, 4  ;;  %6035 = vmatmul.mubr.bf16.gmra.mrb[20].mxu0 %v7055_v12  ;;  %v1212_v25 = vshrl.u32 %v957_v51, 16  ;;  %v1215_v30 = vshll.u32 %v957_v51, 16 }
  0x97   : > { %v1201_v22 = vor.u32 %v1200_v41, %v1197_v2  ;;  %v1687_v3 = vrot.slane %v1619_v45, 4  ;;  %v1689_v17 = vrot.slane %v1620_v48, 4  ;;  %v1206_v31 = vrot.slane %v1204_v10, 4  ;;  %v6543_v45 = vld [vmem:[%s7429_s3 + $0x90] sm:$0xff]  }
  0x98   : > { %5823 = vmatmul.mubr.bf16.vlgmr.msra.gmra.mrb[0].mxu1 %v1682_v40  ;;  %v1209_v32 = vrot.slane %v1207_v15, 5  ;;  %v1214_v50 = vrot.slane %v1212_v25, 4  ;;  %v1217_v33 = vrot.slane %v1215_v30, 5  ;;  %v1221_v49 = vshrl.u32 %v958_v35, 16  ;;  %v1622_v15 = vld [vmem:[#allocation2 + $0x50] sm:$0xf0] }
  0x99   : > { %5855 = vmatpush3.bf16.msra.mxu1 %v6879_v62  ;;  %5826 = vmatprep.mubr.bf16.mxu1 %v1685_v4  ;;  %v7060_v16 = vsel %vm964_vm2, %v1193_v56, %v1201_v22  ;;  %v1690_v13 = vrot.slane %v1621_v29, 4  ;;  %v1224_v40 = vshll.u32 %v958_v35, 16  ;;  %v1229_v53 = vshrl.u32 %v959_v8, 16  ;;  %v6545_v56 = vld [vmem:[%s7429_s3 + $0x98] sm:$0xff]  }
  0x9a   : > { %5856 = vmatprep.subr.bf16.mxu1 %v6541_v43  ;;  %6038 = vmatprep.mubr.bf16.mxu0 %v7060_v16  ;;  %v1210_v52 = vor.u32 %v1209_v32, %v1206_v31  ;;  %v1218_v48 = vor.u32 %v1217_v33, %v1214_v50  ;;  %v1223_v62 = vrot.slane %v1221_v49, 4  ;;  %v1232_v54 = vshll.u32 %v959_v8, 16  ;;  %v1623_v8 = vld [vmem:[#allocation2 + $0x58] sm:$0xf]  ;;  %v6547_v50 = vld [vmem:[%s7429_s3 + $0xa0] sm:$0xff]   ;;  %v6549_v49 = vld [vmem:[%s7429_s3 + $0xa8] sm:$0xff]  }
  0x9b   : > { %v1226_v63 = vrot.slane %v1224_v40, 5  ;;  %v1231_v51 = vrot.slane %v1229_v53, 4  ;;  %v380_v4 = vmul.f32 %v6957_v38, %v5431_v26  ;;  %v1688_v2 = vsel %vm1676_vm1, %v1686_v20, %v1687_v3  ;;  %v1624_v26 = vld [vmem:[#allocation2 + $0x60] sm:$0xf0] }
  0x9c   : > { %v7069_v29 = vsel %vm964_vm2, %v1210_v52, %v1218_v48  ;;  %v1234_v41 = vrot.slane %v1232_v54, 5  ;;  %v418_v35 = vadd.f32 %v6943_v23, %v379_v60  ;;  %v1691_v10 = vsel %vm1676_vm1, %v1689_v17, %v1690_v13  ;;  %v1627_v52 = vld [vmem:[#allocation2 + $0x78] sm:$0xf]  ;;  %v1628_v53 = vld [vmem:[#allocation2 + $0x80] sm:$0xf0] }
  0x9d   : > { %5857 = vmatpush3.bf16.msra.mxu1 %v6541_v43  ;;  %v1227_v22 = vor.u32 %v1226_v63, %v1223_v62  ;;  %v419_v38 = vadd.f32 %v6943_v23, %v380_v4  ;;  %v1625_v43 = vld [vmem:[#allocation2 + $0x68] sm:$0xf]  ;;  %v1692_v3 = vrot.slane %v1622_v15, 4  ;;  %v1693_v31 = vrot.slane %v1623_v8, 4  ;;  %v6551_v4 = vld [vmem:[%s7429_s3 + $0xb0] sm:$0xff]  }
  0x9e   : > { %5858 = vmatprep.subr.bf16.mxu1 %v6543_v45  ;;  %6039 = vmatmul.mubr.bf16.gmra.mrb[24].mxu0 %v7069_v29  ;;  %v1235_v20 = vor.u32 %v1234_v41, %v1231_v51  ;;  %v6492_v25 = vround.rtne.f32 %v418_v35  ;;  %v1695_v17 = vrot.slane %v1624_v26, 4  ;;  %v1696_v32 = vrot.slane %v1625_v43, 4  ;;  %v1629_v48 = vld [vmem:[#allocation2 + $0x88] sm:$0xf]  ;;  %v1630_v15 = vld [vmem:[#allocation2 + $0x90] sm:$0xf0] }
  0x9f   : > { %v6493_v30 = vround.rtne.f32 %v419_v38  ;;  %v1694_v13 = vsel %vm1676_vm1, %v1692_v3, %v1693_v31  ;;  %v1699_v54 = vrot.slane %v1627_v52, 4  ;;  %v1701_v63 = vrot.slane %v1628_v53, 4  ;;  %v1631_v43 = vld [vmem:[#allocation2 + $0x98] sm:$0xf] }
  0xa0   : > { %5827 = vmatmul.mubr.bf16.gmra.mrb[4].mxu1 %v1688_v2  ;;  %v7079_v60 = vsel %vm964_vm2, %v1227_v22, %v1235_v20  ;;  %v1697_v40 = vsel %vm1676_vm1, %v1695_v17, %v1696_v32  ;;  %v1702_v51 = vrot.slane %v1629_v48, 4  ;;  %v6553_v2 = vld [vmem:[%s7429_s3 + $0xb8] sm:$0xff]   ;;  %v1632_v20 = vld [vmem:[#allocation2 + $0xa0] sm:$0xf0]  ;;  %v1704_v32 = vrot.slane %v1630_v15, 4 }
  0xa1   : > { %5830 = vmatprep.mubr.bf16.mxu1 %v1691_v10  ;;  %5859 = vmatpush3.bf16.msra.mxu1 %v6543_v45  ;;  %v467_v23 = vpack.c.bf16 %v6493_v30, %v6492_v25  ;;  %v1626_v45 = vld [vmem:[#allocation2 + $0x70] sm:$0xf0]  ;;  %v1633_v25 = vld [vmem:[#allocation2 + $0xa8] sm:$0xf] }
  0xa2   : > { %6042 = vmatprep.mubr.bf16.mxu0 %v7079_v60  ;;  %5860 = vmatprep.subr.bf16.mxu1 %v6545_v56  ;;  %v1698_v62 = vrot.slane %v1626_v45, 4  ;;  %v1703_v10 = vsel %vm1676_vm1, %v1701_v63, %v1702_v51  ;;  %v1708_v45 = vrot.slane %v1633_v25, 4  ;;  %v1634_v48 = vld [vmem:[#allocation2 + $0xb0] sm:$0xf0]  ;;  %v1637_v63 = vld [vmem:[#allocation2 + $0xc8] sm:$0xf] }
  0xa3   : > { %v499_v33 = vrot.slane %v467_v23, 4  ;;  %v1705_v23 = vrot.slane %v1631_v43, 4  ;;  %v1710_v51 = vrot.slane %v1634_v48, 4  ;;  %v928_v43 = vld [vmem:[#allocation2] sm:$0xf0] }
  0xa4   : > { %v1700_v41 = vsel %vm1676_vm1, %v1698_v62, %v1699_v54  ;;  %v1635_v62 = vld [vmem:[#allocation2 + $0xb8] sm:$0xf]  ;;  %v1636_v54 = vld [vmem:[#allocation2 + $0xc0] sm:$0xf0] }
  0xa5   : > { %5861 = vmatpush3.bf16.msra.mxu1 %v6545_v56  ;;  %547 = vst [vmem:[#allocation2 + $0x108] ss:$-4 sps:$4 sm:$0xff] %v499_v33  }
  0xa6   : > { %5862 = vmatprep.subr.bf16.mxu1 %v6547_v50 }
  0xa8   : > { %5831 = vmatmul.mubr.bf16.gmra.mrb[8].mxu1 %v1694_v13  ;;  %v1707_v13 = vrot.slane %v1632_v20, 4  ;;  %v929_v20 = vld [vmem:[#allocation2 + $0x8] sm:$0x1f] }
  0xa9   : > { %5834 = vmatprep.mubr.bf16.mxu1 %v1697_v40  ;;  %5863 = vmatpush3.bf16.msra.mxu1 %v6547_v50  ;;  %v7101_v50 = vld [vmem:[%s7429_s3 + $0xc0] sm:$0xff]   ;;  %v1706_v40 = vsel %vm1676_vm1, %v1704_v32, %v1705_v23  ;;  %v974_v32 = vshrl.u32 %v929_v20, 16  ;;  %v977_v23 = vshll.u32 %v929_v20, 16 }
  0xaa   : > { %5864 = vmatprep.subr.bf16.mxu1 %v6549_v49  ;;  %v1709_v53 = vsel %vm1676_vm1, %v1707_v13, %v1708_v45  ;;  %v1642_v45 = vld [vmem:[#allocation2 + $0xf0] sm:$0xf0] }
  0xac   : > { %v960_v56 = vld [vmem:[#allocation2 + $0x100] sm:$0xf0]  ;;  %v961_v35 = vld [vmem:[#allocation2 + $0x108] sm:$0x1f] }
  0xad   : > { %5865 = vmatpush3.bf16.msra.mxu1 %v6549_v49  ;;  %v1238_v8 = vshrl.u32 %v960_v56, 16  ;;  %v1241_v22 = vshll.u32 %v960_v56, 16  ;;  %v1246_v38 = vshrl.u32 %v961_v35, 16  ;;  %v1249_v26 = vshll.u32 %v961_v35, 16  ;;  %v582_v20 = vld [vmem:[#allocation2 + $0x108] sm:$0xf] }
  0xae   : > { %5866 = vmatprep.subr.bf16.mxu1 %v6551_v4  ;;  %v1714_v56 = vrot.slane %v1637_v63, 4  ;;  %v6556_v63 = vld [vmem:[%s7429_s3 + $0x1e0] sm:$0xff]  }
  0xaf   : > { %v1240_v30 = vrot.slane %v1238_v8, 4  ;;  %v1243_v3 = vrot.slane %v1241_v22, 5  ;;  %v1248_v31 = vrot.slane %v1246_v38, 4  ;;  %v1251_v17 = vrot.slane %v1249_v26, 5  ;;  %v1639_v8 = vld [vmem:[#allocation2 + $0xd8] sm:$0xf] }
  0xb0   : > { %5835 = vmatmul.mubr.bf16.gmra.mrb[12].mxu1 %v1700_v41  ;;  %v1713_v41 = vrot.slane %v1636_v54, 4  ;;  %v1640_v22 = vld [vmem:[#allocation2 + $0xe0] sm:$0xf0]  ;;  %v1641_v38 = vld [vmem:[#allocation2 + $0xe8] sm:$0xf]  ;;  %v6552_v26 = vld [vmem:[%s7429_s3 + $0x1d0] sm:$0xff]  }
  0xb1   : > { %5838 = vmatprep.mubr.bf16.mxu1 %v1703_v10  ;;  %5867 = vmatpush3.bf16.msra.mxu1 %v6551_v4  ;;  %v1244_v33 = vor.u32 %v1243_v3, %v1240_v30  ;;  %v1252_v49 = vor.u32 %v1251_v17, %v1248_v31  ;;  %v1711_v4 = vrot.slane %v1635_v62, 4  ;;  %v1638_v10 = vld [vmem:[#allocation2 + $0xd0] sm:$0xf0]  ;;  %v1717_v30 = vrot.slane %v1639_v8, 4  ;;  %v6562_v8 = vld [vmem:[%s7429_s3 + $0x1f8] sm:$0xff]  }
  0xb2   : > { %5868 = vmatprep.subr.bf16.mxu1 %v6553_v2  ;;  %v1715_v15 = vsel %vm1676_vm1, %v1713_v41, %v1714_v56  ;;  %v1716_v25 = vrot.slane %v1638_v10, 4  ;;  %v1719_v3 = vrot.slane %v1640_v22, 4  ;;  %v966_v31 = vshrl.u32 %v928_v43, 16  ;;  %v6557_v22 = vld [vmem:[%s7429_s3 + $0xc8] sm:$0xff]  }
  0xb3   : > { %v7104_v52 = vsel %vm964_vm2, %v1244_v33, %v1252_v49  ;;  %v1712_v35 = vsel %vm1676_vm1, %v1710_v51, %v1711_v4  ;;  %v969_v17 = vshll.u32 %v928_v43, 16  ;;  %v6554_v33 = vld [vmem:[%s7429_s3 + $0x1d8] sm:$0xff]   ;;  %v976_v62 = vrot.slane %v974_v32, 4  ;;  %v581_v43 = vld [vmem:[#allocation2 + $0x100] sm:$0xf8] }
  0xb4   : > { %6043 = vmatmul.mubr.bf16.gmra.mrb[28].mxu0 %v7104_v52  ;;  %v1718_v49 = vsel %vm1676_vm1, %v1716_v25, %v1717_v30  ;;  %v979_v54 = vrot.slane %v977_v23, 5  ;;  %v1722_v51 = vrot.slane %v1642_v45, 4  ;;  %v862_v25 = vshll.u32 %v581_v43, 16 }
  0xb5   : > { %5869 = vmatpush3.bf16.msra.mxu1 %v6553_v2  ;;  %6062 = vmatprep.mubr.bf16.mxu0 %v6788_v57  ;;  %v6550_v2 = vld [vmem:[%s7429_s3 + $0x1c8] sm:$0xff]   ;;  %v971_v48 = vrot.slane %v969_v17, 5  ;;  %v867_v30 = vshrl.u32 %v582_v20, 16 }
  0xb6   : > { %5902 = vmatprep.subr.bf16.mxu1 %v7101_v50  ;;  %v980_v56 = vor.u32 %v979_v54, %v976_v62  ;;  %v864_v32 = vrot.slane %v862_v25, 4  ;;  %v3872_v25 = vld [vmem:[#allocation2 + $0x38] sm:$0xf] }
  0xb7   : > { %v869_v23 = vrot.slane %v867_v30, 3  ;;  %v3873_v30 = vld [vmem:[#allocation2 + $0x40] sm:$0xf0] }
  0xb8   : > { %5839 = vmatmul.mubr.bf16.gmra.mrb[16].mxu1 %v1706_v40  ;;  %v1643_v40 = vld [vmem:[#allocation2 + $0xf8] sm:$0xf] }
  0xb9   : > { %5842 = vmatprep.mubr.bf16.mxu1 %v1709_v53  ;;  %v968_v53 = vrot.slane %v966_v31, 4  ;;  %v1723_v4 = vrot.slane %v1643_v40, 4  ;;  %v6563_v31 = vld [vmem:[%s7429_s3 + $0xe0] sm:$0xff]  }
  0xbb   : > { %v972_v41 = vor.u32 %v971_v48, %v968_v53  ;;  %v6565_v48 = vld [vmem:[%s7429_s3 + $0xe8] sm:$0xff]  }
  0xbc   : > { %6063 = vmatmul.mubr.bf16.vlgmr.msra.gmra.mrb[0].mxu0 %v6799_v19 }
  0xbd   : > { %6095 = vmatpush3.bf16.msra.mxu0 %v6994_v7  ;;  %6066 = vmatprep.mubr.bf16.mxu0 %v6807_v39  ;;  %v1720_v7 = vrot.slane %v1641_v38, 4  ;;  %v981_v10 = vsel %vm964_vm2, %v972_v41, %v980_v56  ;;  %v7153_v38 = vld [vmem:[%s7429_s3 + $0x200] sm:$0xff]   ;;  %v6567_v56 = vld [vmem:[%s7429_s3 + $0xf0] sm:$0xff]  }
  0xbe   : > { %6096 = vmatprep.subr.bf16.mxu0 %v6550_v2 }
  0xbf   : > { %v1721_v13 = vsel %vm1676_vm1, %v1719_v3, %v1720_v7  ;;  %v870_v3 = vshll.u32 %v582_v20, 16  ;;  %v583_v7 = vld [vmem:[#allocation2 + $0x110] sm:$0xf8] }
  0xc0   : > { %5843 = vmatmul.mubr.bf16.gmra.mrb[20].mxu1 %v1712_v35  ;;  %v1724_v35 = vsel %vm1676_vm1, %v1722_v51, %v1723_v4  ;;  %v879_v45 = vshll.u32 %v583_v7, 16 }
  0xc1   : > { %5846 = vmatprep.mubr.bf16.mxu1 %v1715_v15  ;;  %6097 = vmatpush3.bf16.msra.mxu0 %v6550_v2  ;;  %v6558_v2 = vld [vmem:[%s7429_s3 + $0x1e8] sm:$0xff]   ;;  %v6560_v15 = vld [vmem:[%s7429_s3 + $0x1f0] sm:$0xff]  }
  0xc2   : > { %6098 = vmatprep.subr.bf16.mxu0 %v6552_v26  ;;  %v881_v51 = vrot.slane %v879_v45, 4  ;;  %v3876_v45 = vld [vmem:[#allocation2 + $0x58] sm:$0xf] }
  0xc4   : > { %6067 = vmatmul.mubr.bf16.gmra.mrb[4].mxu0 %v6822_v59 }
  0xc5   : > { %6070 = vmatprep.mubr.bf16.mxu0 %v6842_v14  ;;  %6099 = vmatpush3.bf16.msra.mxu0 %v6552_v26  ;;  %v6559_v26 = vld [vmem:[%s7429_s3 + $0xd0] sm:$0xff]  }
  0xc6   : > { %6100 = vmatprep.subr.bf16.mxu0 %v6554_v33 }
  0xc8   : > { %5847 = vmatmul.mubr.bf16.gmra.mrb[24].mxu1 %v1718_v49  ;;  %v584_v49 = vld [vmem:[#allocation2 + $0x118] sm:$0xf] }
  0xc9   : > { %5850 = vmatprep.mubr.bf16.mxu1 %v1721_v13  ;;  %6101 = vmatpush3.bf16.msra.mxu0 %v6554_v33  ;;  %v872_v33 = vrot.slane %v870_v3, 4  ;;  %v876_v13 = vshrl.u32 %v583_v7, 16  ;;  %v884_v40 = vshrl.u32 %v584_v49, 16  ;;  %v887_v53 = vshll.u32 %v584_v49, 16  ;;  %v3874_v3 = vld [vmem:[#allocation2 + $0x48] sm:$0xf] }
  0xca   : > { %6102 = vmatprep.subr.bf16.mxu0 %v6556_v63 }
  0xcb   : > { %v873_v54 = vor.u32 %v872_v33, %v869_v23  ;;  %v886_v4 = vrot.slane %v884_v40, 3  ;;  %v889_v41 = vrot.slane %v887_v53, 4  ;;  %v3940_v23 = vrot.slane %v3874_v3, 4  ;;  %v6566_v40 = vld [vmem:[%s7429_s3 + $0x208] sm:$0xff]   ;;  %v3877_v53 = vld [vmem:[#allocation2 + $0x60] sm:$0xf0] }
  0xcc   : > { %6071 = vmatmul.mubr.bf16.gmra.mrb[8].mxu0 %v6893_v47  ;;  %v3884_v3 = vld [vmem:[#allocation2 + $0x98] sm:$0xf] }
  0xcd   : > { %6074 = vmatprep.mubr.bf16.mxu0 %v6908_v9  ;;  %6103 = vmatpush3.bf16.msra.mxu0 %v6556_v63  ;;  %v878_v63 = vrot.slane %v876_v13, 3  ;;  %v3875_v13 = vld [vmem:[#allocation2 + $0x50] sm:$0xf0] }
  0xce   : > { %6104 = vmatprep.subr.bf16.mxu0 %v6558_v2 }
  0xd0   : > { %5851 = vmatmul.mubr.bf16.gmra.mrb[28].mxu1 %v1724_v35  ;;  %v3869_v35 = vld [vmem:[#allocation2 + $0x20] sm:$0xf0] }
  0xd1   : > { %5870 = vmatprep.mubr.bf16.mxu1 %v981_v10  ;;  %6105 = vmatpush3.bf16.msra.mxu0 %v6558_v2  ;;  %v3870_v10 = vld [vmem:[#allocation2 + $0x28] sm:$0xf] }
  0xd2   : > { %6106 = vmatprep.subr.bf16.mxu0 %v6560_v15 }
  0xd4   : > { %6075 = vmatmul.mubr.bf16.gmra.mrb[12].mxu0 %v6927_v58 }
  0xd5   : > { %6078 = vmatprep.mubr.bf16.mxu0 %v6948_v27  ;;  %6107 = vmatpush3.bf16.msra.mxu0 %v6560_v15  ;;  %v882_v15 = vor.u32 %v881_v51, %v878_v63  ;;  %v3945_v63 = vrot.slane %v3877_v53, 4 }
  0xd6   : > { %6108 = vmatprep.subr.bf16.mxu0 %v6562_v8 }
  0xd8   : > { %5871 = vmatmul.mubr.bf16.vlgmr.msra.gmra.mrb[0].mxu1 %v6860_v6  ;;  %v6561_v6 = vld [vmem:[%s7429_s3 + $0xd8] sm:$0xff]  }
  0xd9   : > { %5903 = vmatpush3.bf16.msra.mxu1 %v7101_v50  ;;  %5874 = vmatprep.mubr.bf16.mxu1 %v6883_v11  ;;  %v859_v50 = vshrl.u32 %v581_v43, 16  ;;  %v3934_v43 = vrot.slane %v3870_v10, 4  ;;  %v6570_v10 = vld [vmem:[%s7429_s3 + $0x218] sm:$0xff]  }
  0xda   : > { %5904 = vmatprep.subr.bf16.mxu1 %v6557_v22  ;;  %6109 = vmatpush3.bf16.msra.mxu0 %v6562_v8  ;;  %v890_v8 = vor.u32 %v889_v41, %v886_v4  ;;  %v6568_v4 = vld [vmem:[%s7429_s3 + $0x210] sm:$0xff]  }
  0xdb   : > { %6142 = vmatprep.subr.bf16.mxu0 %v7153_v38  ;;  %v861_v17 = vrot.slane %v859_v50, 3  ;;  %v3871_v50 = vld [vmem:[#allocation2 + $0x30] sm:$0xf0] }
  0xdc   : > { %6079 = vmatmul.mubr.bf16.gmra.mrb[16].mxu0 %v6972_v24  ;;  %v891_v20 = vsel %vm585_vm0, %v882_v15, %v890_v8  ;;  %v3936_v7 = vrot.slane %v3871_v50, 4  ;;  %v3881_v15 = vld [vmem:[#allocation2 + $0x80] sm:$0xf0]  ;;  %v3882_v8 = vld [vmem:[#allocation2 + $0x88] sm:$0xf] }
  0xdd   : > { %5905 = vmatpush3.bf16.msra.mxu1 %v6557_v22  ;;  %6082 = vmatprep.mubr.bf16.mxu0 %v7004_v21  ;;  %v865_v62 = vor.u32 %v864_v32, %v861_v17  ;;  %v6569_v22 = vld [vmem:[%s7429_s3 + $0xf8] sm:$0xff]   ;;  %v7197_v17 = vld [vmem:[%s7429_s3 + $0x100] sm:$0xff]   ;;  %v3939_v32 = vrot.slane %v3873_v30, 4  ;;  %v3883_v30 = vld [vmem:[#allocation2 + $0x90] sm:$0xf0] }
  0xde   : > { %5906 = vmatprep.subr.bf16.mxu1 %v6559_v26 }
  0xdf   : > { %v7183_v2 = vsel %vm585_vm0, %v865_v62, %v873_v54  ;;  %v3941_v49 = vsel %vm1676_vm1, %v3939_v32, %v3940_v23  ;;  %v3942_v62 = vrot.slane %v3875_v13, 4  ;;  %v3943_v54 = vrot.slane %v3876_v45, 4  ;;  %v3886_v32 = vld [vmem:[#allocation2 + $0xa8] sm:$0xf]  ;;  %v6573_v45 = vld [vmem:[%s7429_s3 + $0x230] sm:$0xff]  }
  0xe0   : > { %5875 = vmatmul.mubr.bf16.gmra.mrb[4].mxu1 %v6918_v34  ;;  %v3954_v23 = vrot.slane %v3883_v30, 4  ;;  %v3958_v13 = vrot.slane %v3886_v32, 4  ;;  %v3895_v30 = vld [vmem:[#allocation2 + $0xf0] sm:$0xf0] }
  0xe1   : > { %5878 = vmatprep.mubr.bf16.mxu1 %v6938_v44  ;;  %5907 = vmatpush3.bf16.msra.mxu1 %v6559_v26  ;;  %v3933_v26 = vrot.slane %v3869_v35, 4  ;;  %v3944_v41 = vsel %vm1676_vm1, %v3942_v62, %v3943_v54  ;;  %v3880_v35 = vld [vmem:[#allocation2 + $0x78] sm:$0xf] }
  0xe2   : > { %5908 = vmatprep.subr.bf16.mxu1 %v6561_v6  ;;  %v3888_v62 = vld [vmem:[#allocation2 + $0xb8] sm:$0xf] }
  0xe3   : > { %v6574_v54 = vld [vmem:[%s7429_s3 + $0x238] sm:$0xff]  }
  0xe4   : > { %6083 = vmatmul.mubr.bf16.gmra.mrb[20].mxu0 %v7009_v5 }
  0xe5   : > { %5909 = vmatpush3.bf16.msra.mxu1 %v6561_v6  ;;  %6086 = vmatprep.mubr.bf16.mxu0 %v7022_v0  ;;  %v3935_v6 = vsel %vm1676_vm1, %v3933_v26, %v3934_v43  ;;  %v3949_v26 = vrot.slane %v3880_v35, 4  ;;  %v3951_v43 = vrot.slane %v3881_v15, 4  ;;  %v6578_v35 = vld [vmem:[%s7429_s3 + $0x108] sm:$0xff]   ;;  %v3891_v15 = vld [vmem:[#allocation2 + $0xd0] sm:$0xf0] }
  0xe6   : > { %5910 = vmatprep.subr.bf16.mxu1 %v6563_v31 }
  0xe8   : > { %5879 = vmatmul.mubr.bf16.gmra.mrb[8].mxu1 %v6962_v1 }
  0xe9   : > { %5882 = vmatprep.mubr.bf16.mxu1 %v6983_v36  ;;  %5911 = vmatpush3.bf16.msra.mxu1 %v6563_v31  ;;  %v3937_v31 = vrot.slane %v3872_v25, 4 }
  0xea   : > { %5912 = vmatprep.subr.bf16.mxu1 %v6565_v48 }
  0xeb   : > { %v3938_v33 = vsel %vm1676_vm1, %v3936_v7, %v3937_v31  ;;  %v6572_v7 = vld [vmem:[%s7429_s3 + $0x228] sm:$0xff]   ;;  %v3885_v31 = vld [vmem:[#allocation2 + $0xa0] sm:$0xf0] }
  0xec   : > { %6087 = vmatmul.mubr.bf16.gmra.mrb[24].mxu0 %v7039_v42 }
  0xed   : > { %5913 = vmatpush3.bf16.msra.mxu1 %v6565_v48  ;;  %6090 = vmatprep.mubr.bf16.mxu0 %v7183_v2  ;;  %v3878_v48 = vld [vmem:[#allocation2 + $0x68] sm:$0xf] }
  0xee   : > { %5914 = vmatprep.subr.bf16.mxu1 %v6567_v56  ;;  %v3946_v51 = vrot.slane %v3878_v48, 4  ;;  %v3887_v48 = vld [vmem:[#allocation2 + $0xb0] sm:$0xf0] }
  0xf0   : > { %5883 = vmatmul.mubr.bf16.gmra.mrb[12].mxu1 %v6997_v61 }
  0xf1   : > { %5886 = vmatprep.mubr.bf16.mxu1 %v7013_v18  ;;  %5915 = vmatpush3.bf16.msra.mxu1 %v6567_v56  ;;  %v3947_v56 = vsel %vm1676_vm1, %v3945_v63, %v3946_v51  ;;  %v3889_v63 = vld [vmem:[#allocation2 + $0xc0] sm:$0xf0]  ;;  %v3890_v51 = vld [vmem:[#allocation2 + $0xc8] sm:$0xf] }
  0xf2   : > { %5916 = vmatprep.subr.bf16.mxu1 %v6569_v22 }
  0xf4   : > { %6091 = vmatmul.mubr.bf16.gmra.mrb[28].mxu0 %v891_v20  ;;  %v3952_v20 = vrot.slane %v3882_v8, 4  ;;  %v3892_v8 = vld [vmem:[#allocation2 + $0xd8] sm:$0xf] }
  0xf5   : > { %5917 = vmatpush3.bf16.msra.mxu1 %v6569_v22  ;;  %6110 = vmatprep.mubr.bf16.mxu0 %v3935_v6  ;;  %v6571_v6 = vld [vmem:[%s7429_s3 + $0x220] sm:$0xff]  }
  0xf6   : > { %6190 = vmatprep.subr.bf16.mxu1 %v7197_v17  ;;  %v3953_v25 = vsel %vm1676_vm1, %v3951_v43, %v3952_v20 }
  0xf8   : > { %5887 = vmatmul.mubr.bf16.gmra.mrb[16].mxu1 %v7019_v55 }
  0xf9   : > { %5890 = vmatprep.mubr.bf16.mxu1 %v7031_v37 }
  0xfc   : > { %6111 = vmatmul.mubr.bf16.vlgmr.msra.gmra.mrb[0].mxu0 %v3938_v33  ;;  %v3955_v33 = vrot.slane %v3884_v3, 4  ;;  %v3896_v3 = vld [vmem:[#allocation2 + $0xf8] sm:$0xf] }
  0xfd   : > { %6143 = vmatpush3.bf16.msra.mxu0 %v7153_v38  ;;  %6114 = vmatprep.mubr.bf16.mxu0 %v3941_v49  ;;  %v3879_v38 = vld [vmem:[#allocation2 + $0x70] sm:$0xf0]  ;;  %v3957_v49 = vrot.slane %v3885_v31, 4  ;;  %v3898_v31 = vld [vmem:[#allocation2 + $0x108] sm:$0xf]  ;;  %v3973_v32 = vrot.slane %v3896_v3, 4 }
  0xfe   : > { %6144 = vmatprep.subr.bf16.mxu0 %v6566_v40  ;;  %v3948_v22 = vrot.slane %v3879_v38, 4 }
  0xff   : > { %v3959_v53 = vsel %vm1676_vm1, %v3957_v49, %v3958_v13  ;;  %v6582_v13 = vld [vmem:[%s7429_s3 + $0x128] sm:$0xff]  }
 0x100   : > { %5891 = vmatmul.mubr.bf16.gmra.mrb[20].mxu1 %v7045_v46  ;;  %v3950_v50 = vsel %vm1676_vm1, %v3948_v22, %v3949_v26  ;;  %v3893_v22 = vld [vmem:[#allocation2 + $0xe0] sm:$0xf0]  ;;  %v3894_v26 = vld [vmem:[#allocation2 + $0xe8] sm:$0xf] }
 0x101   : > { %5894 = vmatprep.mubr.bf16.mxu1 %v7055_v12  ;;  %6145 = vmatpush3.bf16.msra.mxu0 %v6566_v40  ;;  %v3956_v40 = vsel %vm1676_vm1, %v3954_v23, %v3955_v33  ;;  %v3969_v43 = vrot.slane %v3893_v22, 4  ;;  %v3970_v20 = vrot.slane %v3894_v26, 4  ;;  %v3976_v33 = vrot.slane %v3898_v31, 4 }
 0x102   : > { %6146 = vmatprep.subr.bf16.mxu0 %v6568_v4 }
 0x104   : > { %6115 = vmatmul.mubr.bf16.gmra.mrb[4].mxu0 %v3944_v41  ;;  %v3961_v41 = vrot.slane %v3888_v62, 4 }
 0x105   : > { %6118 = vmatprep.mubr.bf16.mxu0 %v3947_v56  ;;  %6147 = vmatpush3.bf16.msra.mxu0 %v6568_v4  ;;  %v3960_v4 = vrot.slane %v3887_v48, 4  ;;  %v3964_v56 = vrot.slane %v3890_v51, 4  ;;  %v2763_v51 = vld [vmem:[#allocation2 + $0xc8] sm:$0xf] }
 0x106   : > { %6148 = vmatprep.subr.bf16.mxu0 %v6570_v10 }
 0x107   : > { %v3962_v38 = vsel %vm1676_vm1, %v3960_v4, %v3961_v41  ;;  %v2764_v4 = vld [vmem:[#allocation2 + $0xd0] sm:$0xf0]  ;;  %v2765_v41 = vld [vmem:[#allocation2 + $0xd8] sm:$0xf] }
 0x108   : > { %5895 = vmatmul.mubr.bf16.gmra.mrb[24].mxu1 %v7060_v16 }
 0x109   : > { %5898 = vmatprep.mubr.bf16.mxu1 %v7069_v29  ;;  %6149 = vmatpush3.bf16.msra.mxu0 %v6570_v10 }
 0x10a   : > { %6150 = vmatprep.subr.bf16.mxu0 %v6571_v6 }
 0x10c   : > { %6119 = vmatmul.mubr.bf16.gmra.mrb[8].mxu0 %v3950_v50  ;;  %v6580_v50 = vld [vmem:[%s7429_s3 + $0x118] sm:$0xff]  }
 0x10d   : > { %6122 = vmatprep.mubr.bf16.mxu0 %v3953_v25  ;;  %6151 = vmatpush3.bf16.msra.mxu0 %v6571_v6  ;;  %v3971_v25 = vsel %vm1676_vm1, %v3969_v43, %v3970_v20  ;;  %v963_v43 = vld [vmem:[#allocation2 + $0x118] sm:$0x1f]  ;;  %v2770_v20 = vld [vmem:[#allocation2 + $0x100] sm:$0xf0] }
 0x10e   : > { %6152 = vmatprep.subr.bf16.mxu0 %v6572_v7  ;;  %v1266_v3 = vshll.u32 %v963_v43, 16 }
 0x110   : > { %5899 = vmatmul.mubr.bf16.gmra.mrb[28].mxu1 %v7079_v60 }
 0x111   : > { %5918 = vmatprep.mubr.bf16.mxu1 %v6775_v28  ;;  %6153 = vmatpush3.bf16.msra.mxu0 %v6572_v7  ;;  %v3963_v28 = vrot.slane %v3889_v63, 4  ;;  %v3897_v7 = vld [vmem:[#allocation2 + $0x100] sm:$0xf0] }
 0x112   : > { %6154 = vmatprep.subr.bf16.mxu0 %v6573_v45  ;;  %v3975_v23 = vrot.slane %v3897_v7, 4  ;;  %v2849_v7 = vrot.slane %v2770_v20, 4 }
 0x113   : > { %v3965_v10 = vsel %vm1676_vm1, %v3963_v28, %v3964_v56  ;;  %v2838_v28 = vrot.slane %v2763_v51, 4  ;;  %v2840_v56 = vrot.slane %v2764_v4, 4 }
 0x114   : > { %6123 = vmatmul.mubr.bf16.gmra.mrb[12].mxu0 %v3956_v40  ;;  %v3899_v40 = vld [vmem:[#allocation2 + $0x110] sm:$0xf0] }
 0x115   : > { %6126 = vmatprep.mubr.bf16.mxu0 %v3959_v53  ;;  %6155 = vmatpush3.bf16.msra.mxu0 %v6573_v45  ;;  %v3977_v45 = vsel %vm1676_vm1, %v3975_v23, %v3976_v33  ;;  %v3900_v53 = vld [vmem:[#allocation2 + $0x118] sm:$0xf]  ;;  %v3978_v48 = vrot.slane %v3899_v40, 4 }
 0x116   : > { %6156 = vmatprep.subr.bf16.mxu0 %v6574_v54  ;;  %v3979_v62 = vrot.slane %v3900_v53, 4 }
 0x118   : > { %5919 = vmatmul.mubr.bf16.vlgmr.msra.gmra.mrb[0].mxu1 %v6788_v57  ;;  %v3966_v57 = vrot.slane %v3891_v15, 4  ;;  %v2768_v15 = vld [vmem:[#allocation2 + $0xf0] sm:$0xf0] }
 0x119   : > { %6198 = vmatpush3.bf16.msra.mxu1 %v7197_v17  ;;  %5922 = vmatprep.mubr.bf16.mxu1 %v6799_v19  ;;  %v3967_v17 = vrot.slane %v3892_v8, 4  ;;  %v6579_v19 = vld [vmem:[%s7429_s3 + $0x110] sm:$0xff]   ;;  %v2769_v8 = vld [vmem:[#allocation2 + $0xf8] sm:$0xf] }
 0x11a   : > { %6191 = vmatprep.subr.bf16.mxu1 %v6578_v35  ;;  %6157 = vmatpush3.bf16.msra.mxu0 %v6574_v54  ;;  %v6584_v54 = vld [vmem:[%s7429_s3 + $0x138] sm:$0xff]  }
 0x11b   : > { %v3968_v6 = vsel %vm1676_vm1, %v3966_v57, %v3967_v17  ;;  %v2846_v57 = vrot.slane %v2768_v15, 4  ;;  %v2847_v17 = vrot.slane %v2769_v8, 4 }
 0x11c   : > { %6127 = vmatmul.mubr.bf16.gmra.mrb[16].mxu0 %v3962_v38  ;;  %v2841_v38 = vrot.slane %v2765_v41, 4 }
 0x11d   : > { %6199 = vmatpush3.bf16.msra.mxu1 %v6578_v35  ;;  %6130 = vmatprep.mubr.bf16.mxu0 %v3965_v10  ;;  %v2766_v35 = vld [vmem:[#allocation2 + $0xe0] sm:$0xf0]  ;;  %v2767_v10 = vld [vmem:[#allocation2 + $0xe8] sm:$0xf] }
 0x11e   : > { %6192 = vmatprep.subr.bf16.mxu1 %v6579_v19  ;;  %v2843_v22 = vrot.slane %v2766_v35, 4  ;;  %v2844_v26 = vrot.slane %v2767_v10, 4 }
 0x120   : > { %5923 = vmatmul.mubr.bf16.gmra.mrb[4].mxu1 %v6807_v39  ;;  %v3972_v39 = vrot.slane %v3895_v30, 4  ;;  %v1263_v30 = vshrl.u32 %v963_v43, 16 }
 0x121   : > { %5926 = vmatprep.mubr.bf16.mxu1 %v6822_v59  ;;  %6200 = vmatpush3.bf16.msra.mxu1 %v6579_v19  ;;  %v6581_v59 = vld [vmem:[%s7429_s3 + $0x120] sm:$0xff]   ;;  %v962_v19 = vld [vmem:[#allocation2 + $0x110] sm:$0xf0] }
 0x122   : > { %6193 = vmatprep.subr.bf16.mxu1 %v6580_v50  ;;  %v3974_v49 = vsel %vm1676_vm1, %v3972_v39, %v3973_v32 }
 0x124   : > { %6131 = vmatmul.mubr.bf16.gmra.mrb[20].mxu0 %v3968_v6  ;;  %v2848_v6 = vsel %vm1676_vm1, %v2846_v57, %v2847_v17 }
 0x125   : > { %6201 = vmatpush3.bf16.msra.mxu1 %v6580_v50  ;;  %6134 = vmatprep.mubr.bf16.mxu0 %v3971_v25  ;;  %v2771_v50 = vld [vmem:[#allocation2 + $0x108] sm:$0xf]  ;;  %v1258_v25 = vshll.u32 %v962_v19, 16 }
 0x126   : > { %6194 = vmatprep.subr.bf16.mxu1 %v6581_v59  ;;  %v2850_v31 = vrot.slane %v2771_v50, 4 }
 0x127   : > { %v1260_v32 = vrot.slane %v1258_v25, 5 }
 0x128   : > { %5927 = vmatmul.mubr.bf16.gmra.mrb[8].mxu1 %v6842_v14  ;;  %v6583_v14 = vld [vmem:[%s7429_s3 + $0x130] sm:$0xff]   ;;  %v2851_v23 = vsel %vm1676_vm1, %v2849_v7, %v2850_v31 }
 0x129   : > { %5930 = vmatprep.mubr.bf16.mxu1 %v6893_v47  ;;  %6202 = vmatpush3.bf16.msra.mxu1 %v6581_v59  ;;  %v3980_v47 = vsel %vm1676_vm1, %v3978_v48, %v3979_v62  ;;  %v1265_v59 = vrot.slane %v1263_v30, 4 }
 0x12a   : > { %6195 = vmatprep.subr.bf16.mxu1 %v6582_v13 }
 0x12c   : > { %6135 = vmatmul.mubr.bf16.gmra.mrb[24].mxu0 %v3974_v49 }
 0x12d   : > { %6203 = vmatpush3.bf16.msra.mxu1 %v6582_v13  ;;  %6138 = vmatprep.mubr.bf16.mxu0 %v3977_v45 }
 0x12e   : > { %6196 = vmatprep.subr.bf16.mxu1 %v6583_v14 }
 0x130   : > { %5931 = vmatmul.mubr.bf16.gmra.mrb[12].mxu1 %v6908_v9  ;;  %v2756_v9 = vld [vmem:[#allocation2 + $0x90] sm:$0xf0] }
 0x131   : > { %5934 = vmatprep.mubr.bf16.mxu1 %v6927_v58  ;;  %6204 = vmatpush3.bf16.msra.mxu1 %v6583_v14  ;;  %v2757_v58 = vld [vmem:[#allocation2 + $0x98] sm:$0xf] }
 0x132   : > { %6197 = vmatprep.subr.bf16.mxu1 %v6584_v54 }
 0x134   : > { %6139 = vmatmul.mubr.bf16.gmra.mrb[28].mxu0 %v3980_v47 }
 0x135   : > { %6205 = vmatpush3.bf16.msra.mxu1 %v6584_v54  ;;  %6158 = vmatprep.mubr.bf16.mxu0 %v6883_v11  ;;  %v2828_v11 = vrot.slane %v2756_v9, 4 }
 0x138   : > { %5935 = vmatmul.mubr.bf16.gmra.mrb[16].mxu1 %v6948_v27  ;;  %v2829_v27 = vrot.slane %v2757_v58, 4 }
 0x139   : > { %5938 = vmatprep.mubr.bf16.mxu1 %v6972_v24  ;;  %v2759_v24 = vld [vmem:[#allocation2 + $0xa8] sm:$0xf] }
 0x13c   : > { %6159 = vmatmul.mubr.bf16.vlgmr.msra.gmra.mrb[0].mxu0 %v6918_v34  ;;  %v2830_v34 = vsel %vm1676_vm1, %v2828_v11, %v2829_v27 }
 0x13d   : > { %6162 = vmatprep.mubr.bf16.mxu0 %v6938_v44  ;;  %v2758_v44 = vld [vmem:[#allocation2 + $0xa0] sm:$0xf0] }
 0x140   : > { %5939 = vmatmul.mubr.bf16.gmra.mrb[20].mxu1 %v7004_v21  ;;  %v2760_v21 = vld [vmem:[#allocation2 + $0xb0] sm:$0xf0] }
 0x141   : > { %5942 = vmatprep.mubr.bf16.mxu1 %v7009_v5  ;;  %v2832_v5 = vrot.slane %v2759_v24, 4 }
 0x144   : > { %6163 = vmatmul.mubr.bf16.gmra.mrb[4].mxu0 %v6962_v1  ;;  %v2761_v1 = vld [vmem:[#allocation2 + $0xb8] sm:$0xf] }
 0x145   : > { %6166 = vmatprep.mubr.bf16.mxu0 %v6983_v36  ;;  %v2831_v36 = vrot.slane %v2758_v44, 4  ;;  %v2835_v63 = vrot.slane %v2761_v1, 4 }
 0x148   : > { %5943 = vmatmul.mubr.bf16.gmra.mrb[24].mxu1 %v7022_v0  ;;  %v2834_v0 = vrot.slane %v2760_v21, 4 }
 0x149   : > { %5946 = vmatprep.mubr.bf16.mxu1 %v7039_v42  ;;  %v2833_v42 = vsel %vm1676_vm1, %v2831_v36, %v2832_v5 }
 0x14c   : > { %6167 = vmatmul.mubr.bf16.gmra.mrb[8].mxu0 %v6997_v61  ;;  %v2836_v61 = vsel %vm1676_vm1, %v2834_v0, %v2835_v63 }
 0x14d   : > { %6170 = vmatprep.mubr.bf16.mxu0 %v7013_v18  ;;  %v2762_v18 = vld [vmem:[#allocation2 + $0xc0] sm:$0xf0] }
 0x150   : > { %5947 = vmatmul.mubr.bf16.gmra.mrb[28].mxu1 %v7183_v2  ;;  %v2837_v2 = vrot.slane %v2762_v18, 4 }
 0x151   : > { %5982 = vmatprep.mubr.bf16.mxu1 %v2830_v34 }
 0x154   : > { %6171 = vmatmul.mubr.bf16.gmra.mrb[12].mxu0 %v7019_v55  ;;  %v2839_v55 = vsel %vm1676_vm1, %v2837_v2, %v2838_v28 }
 0x155   : > { %6174 = vmatprep.mubr.bf16.mxu0 %v7031_v37  ;;  %v2842_v37 = vsel %vm1676_vm1, %v2840_v56, %v2841_v38 }
 0x158   : > { %5983 = vmatmul.mubr.bf16.vlgmr.msra.gmra.mrb[16].mxu1 %v2833_v42 }
 0x159   : > { %5986 = vmatprep.mubr.bf16.mxu1 %v2836_v61 }
 0x15c   : > { %6175 = vmatmul.mubr.bf16.gmra.mrb[16].mxu0 %v7045_v46  ;;  %v2845_v46 = vsel %vm1676_vm1, %v2843_v22, %v2844_v26 }
 0x15d   : > { %6178 = vmatprep.mubr.bf16.mxu0 %v7055_v12  ;;  %v1255_v12 = vshrl.u32 %v962_v19, 16 }
 0x15f   : > { %v1257_v39 = vrot.slane %v1255_v12, 4 }
 0x160   : > { %5987 = vmatmul.mubr.bf16.gmra.mrb[20].mxu1 %v2839_v55 }
 0x161   : > { %5990 = vmatprep.mubr.bf16.mxu1 %v2842_v37 }
 0x164   : > { %6179 = vmatmul.mubr.bf16.gmra.mrb[20].mxu0 %v7060_v16  ;;  %v1268_v16 = vrot.slane %v1266_v3, 5 }
 0x165   : > { %6182 = vmatprep.mubr.bf16.mxu0 %v7069_v29  ;;  %v1261_v29 = vor.u32 %v1260_v32, %v1257_v39 }
 0x166   : > { %v1269_v33 = vor.u32 %v1268_v16, %v1265_v59 }
 0x168   : > { %5991 = vmatmul.mubr.bf16.gmra.mrb[24].mxu1 %v2845_v46  ;;  %v1270_v49 = vsel %vm964_vm2, %v1261_v29, %v1269_v33 }
 0x169   : > { %5994 = vmatprep.mubr.bf16.mxu1 %v2848_v6 }
 0x16c   : > { %6183 = vmatmul.mubr.bf16.gmra.mrb[24].mxu0 %v7079_v60 }
 0x16d   : > { %6186 = vmatprep.mubr.bf16.mxu0 %v7104_v52 }
 0x170   : > { %5995 = vmatmul.mubr.bf16.gmra.mrb[28].mxu1 %v2851_v23 }
 0x174   : > { %6187 = vmatmul.mubr.bf16.gmra.mrb[28].mxu0 %v1270_v49 }
 0x1eb   : > { %v5920_v13 = vpop.f32.mrb[0].mxu1 }
 0x1ec   : > { %v2517_v45 = vpop.f32.mrb[1].mxu1 }
 0x1ed   : > { %v5921_v40 = vpop.f32.mrb[2].mxu1 }
 0x1ee   : > { %v2520_v53 = vpop.f32.mrb[3].mxu1 }
 0x1f3   : > { %v5924_v48 = vpop.f32.mrb[4].mxu1 }
 0x1f4   : > { %v2533_v62 = vpop.f32.mrb[5].mxu1 }
 0x1f5   : > { %v5925_v14 = vpop.f32.mrb[6].mxu1 }
 0x1f6   : > { %v2536_v47 = vpop.f32.mrb[7].mxu1 }
 0x1fb   : > { %v5928_v60 = vpop.f32.mrb[8].mxu1 }
 0x1fc   : > { %v2549_v54 = vpop.f32.mrb[9].mxu1 }
 0x1fd   : > { %v7306_v9 = vpop.f32.mrb[10].mxu1 }
 0x1fe   : > { %v7308_v52 = vpop.f32.mrb[11].mxu1 }
 0x203   : > { %v7310_v58 = vpop.f32.mrb[12].mxu1 }
 0x204   : > { %v7312_v11 = vpop.f32.mrb[13].mxu1 }
 0x205   : > { %v7314_v27 = vpop.f32.mrb[14].mxu1 }
 0x206   : > { %v7316_v34 = vpop.f32.mrb[15].mxu1 }
 0x20f   : > { %v6160_v44 = vpop.f32.mrb[0].mxu0 }
 0x210   : > { %v6206_v24 = vadd.f32 %v6160_v44, %v5920_v13  ;;  %v4435_v21 = vpop.f32.mrb[1].mxu0 }
 0x211   : > { %v7318_v1 = vadd.f32 %v4435_v21, %v2517_v45  ;;  %v6161_v36 = vpop.f32.mrb[2].mxu0 }
 0x212   : > { %v7320_v5 = vadd.f32 %v6161_v36, %v5921_v40  ;;  %v4438_v0 = vpop.f32.mrb[3].mxu0  ;;  %v4858_v41 = vmul.f32 %v6206_v24, %v6206_v24 }
 0x213   : > { %v7329_v63 = vadd.f32 %v4438_v0, %v2520_v53  ;;  %v4856_v61 = vmul.f32 %v7318_v1, %v7318_v1 }
 0x214   : > { %v5440_v42 = vpack.c.bf16 %v7320_v5, %v6206_v24  ;;  %v4859_v37 = vmul.f32 %v7320_v5, %v7320_v5 }
 0x215   : > { %v5435_v18 = vpack.c.bf16 %v7329_v63, %v7318_v1  ;;  %v4818_v51 = vadd.f32 %v7329_v63, %v7318_v1  ;;  %v4857_v4 = vmul.f32 %v7329_v63, %v7329_v63 }
 0x216   : > { %5527 = vst [vmem:[%s7327_s17 + $0x8] sm:$0xff] %v5440_v42  }
 0x217   : > { %5436 = vst [vmem:[%s7327_s17] sm:$0xff] %v5435_v18   ;;  %v4819_v2 = vadd.f32 %v6206_v24, %v4818_v51  ;;  %v4888_v28 = vadd.f32 %v4857_v4, %v4856_v61  ;;  %v6164_v56 = vpop.f32.mrb[4].mxu0 }
 0x218   : > { %v6210_v38 = vadd.f32 %v6164_v56, %v5924_v48  ;;  %v4451_v55 = vpop.f32.mrb[5].mxu0 }
 0x219   : > { %v4889_v35 = vadd.f32 %v4888_v28, %v4858_v41  ;;  %v6211_v10 = vadd.f32 %v4451_v55, %v2533_v62  ;;  %v4820_v15 = vadd.f32 %v7320_v5, %v4819_v2  ;;  %v6165_v8 = vpop.f32.mrb[6].mxu0 }
 0x21a   : > { %v4928_v22 = vmin.f32 %v6206_v24, %v6210_v38  ;;  %v4966_v26 = vmax.f32 %v6206_v24, %v6210_v38  ;;  %v6212_v57 = vadd.f32 %v6165_v8, %v5925_v14  ;;  %v4454_v17 = vpop.f32.mrb[7].mxu0  ;;  %v4862_v33 = vmul.f32 %v6210_v38, %v6210_v38 }
 0x21b   : > { %v4821_v19 = vadd.f32 %v6211_v10, %v4820_v15  ;;  %v4860_v43 = vmul.f32 %v6211_v10, %v6211_v10  ;;  %v4890_v46 = vadd.f32 %v4889_v35, %v4859_v37  ;;  %v4926_v20 = vmin.f32 %v7318_v1, %v6211_v10 }
 0x21c   : > { %v4964_v12 = vmax.f32 %v7318_v1, %v6211_v10  ;;  %v5450_v6 = vpack.c.bf16 %v6212_v57, %v6210_v38  ;;  %v4929_v50 = vmin.f32 %v7320_v5, %v6212_v57  ;;  %v4967_v30 = vmax.f32 %v7320_v5, %v6212_v57 }
 0x21d   : > { %v4891_v25 = vadd.f32 %v4890_v46, %v4860_v43  ;;  %v6213_v3 = vadd.f32 %v4454_v17, %v2536_v47  ;;  %v4863_v53 = vmul.f32 %v6212_v57, %v6212_v57 }
 0x21e   : > { %5529 = vst [vmem:[%s7327_s17 + $0x18] sm:$0xff] %v5450_v6  }
 0x21f   : > { %v5445_v7 = vpack.c.bf16 %v6213_v3, %v6211_v10  ;;  %v4822_v31 = vadd.f32 %v6213_v3, %v4821_v19  ;;  %v4861_v39 = vmul.f32 %v6213_v3, %v6213_v3  ;;  %v4927_v32 = vmin.f32 %v7329_v63, %v6213_v3  ;;  %v6168_v59 = vpop.f32.mrb[8].mxu0 }
 0x220   : > { %v4965_v16 = vmax.f32 %v7329_v63, %v6213_v3  ;;  %v6214_v23 = vadd.f32 %v6168_v59, %v5928_v60  ;;  %v4467_v29 = vpop.f32.mrb[9].mxu0 }
 0x221   : > { %5528 = vst [vmem:[%s7327_s17 + $0x10] sm:$0xff] %v5445_v7   ;;  %v4823_v49 = vadd.f32 %v6210_v38, %v4822_v31  ;;  %v4892_v13 = vadd.f32 %v4891_v25, %v4861_v39  ;;  %v6215_v45 = vadd.f32 %v4467_v29, %v2549_v54  ;;  %v6169_v40 = vpop.f32.mrb[10].mxu0 }
 0x222   : > { %v7353_v48 = vmin.f32 %v4928_v22, %v6214_v23  ;;  %v7355_v62 = vmax.f32 %v4966_v26, %v6214_v23  ;;  %v6216_v14 = vadd.f32 %v6169_v40, %v7306_v9  ;;  %v4470_v47 = vpop.f32.mrb[11].mxu0  ;;  %v4866_v38 = vmul.f32 %v6214_v23, %v6214_v23 }
 0x223   : > { %v4893_v44 = vadd.f32 %v4892_v13, %v4862_v33  ;;  %v4824_v24 = vadd.f32 %v6212_v57, %v4823_v49  ;;  %v4864_v21 = vmul.f32 %v6215_v45, %v6215_v45  ;;  %v7358_v60 = vmin.f32 %v4926_v20, %v6215_v45 }
 0x224   : > { %v7360_v1 = vmax.f32 %v4964_v12, %v6215_v45  ;;  %v5460_v36 = vpack.c.bf16 %v6216_v14, %v6214_v23  ;;  %v7362_v5 = vmin.f32 %v4929_v50, %v6216_v14  ;;  %v7364_v63 = vmax.f32 %v4967_v30, %v6216_v14 }
 0x225   : > { %v4825_v54 = vadd.f32 %v6215_v45, %v4824_v24  ;;  %v4894_v0 = vadd.f32 %v4893_v44, %v4863_v53  ;;  %v6217_v42 = vadd.f32 %v4470_v47, %v7308_v52  ;;  %v4867_v10 = vmul.f32 %v6216_v14, %v6216_v14 }
 0x226   : > { %5531 = vst [vmem:[%s7327_s17 + $0x28] sm:$0xff] %v5460_v36  }
 0x227   : > { %v4895_v9 = vadd.f32 %v4894_v0, %v4864_v21  ;;  %v5455_v61 = vpack.c.bf16 %v6217_v42, %v6215_v45  ;;  %v4826_v18 = vadd.f32 %v6217_v42, %v4825_v54  ;;  %v4865_v51 = vmul.f32 %v6217_v42, %v6217_v42  ;;  %v6172_v4 = vpop.f32.mrb[12].mxu0 }
 0x228   : > { %v7368_v41 = vmin.f32 %v4927_v32, %v6217_v42  ;;  %v7370_v2 = vmax.f32 %v4965_v16, %v6217_v42  ;;  %v6218_v28 = vadd.f32 %v6172_v4, %v7310_v58  ;;  %v4483_v56 = vpop.f32.mrb[13].mxu0 }
 0x229   : > { %5530 = vst [vmem:[%s7327_s17 + $0x20] sm:$0xff] %v5455_v61   ;;  %v4827_v55 = vadd.f32 %v6214_v23, %v4826_v18  ;;  %v4896_v37 = vadd.f32 %v4895_v9, %v4865_v51  ;;  %v6219_v35 = vadd.f32 %v4483_v56, %v7312_v11  ;;  %v6173_v52 = vpop.f32.mrb[14].mxu0 }
 0x22a   : > { %v4936_v15 = vmin.f32 %v7353_v48, %v6218_v28  ;;  %v4974_v8 = vmax.f32 %v7355_v62, %v6218_v28  ;;  %v6220_v22 = vadd.f32 %v6173_v52, %v7314_v27  ;;  %v4486_v26 = vpop.f32.mrb[15].mxu0  ;;  %v4870_v49 = vmul.f32 %v6218_v28, %v6218_v28 }
 0x22b   : > { %v5984_v57 = vpop.f32.mrb[16].mxu1  ;;  %v4897_v17 = vadd.f32 %v4896_v37, %v4866_v38  ;;  %v4828_v58 = vadd.f32 %v6216_v14, %v4827_v55  ;;  %v4868_v19 = vmul.f32 %v6219_v35, %v6219_v35  ;;  %v4934_v43 = vmin.f32 %v7358_v60, %v6219_v35 }
 0x22c   : > { %v3031_v46 = vpop.f32.mrb[17].mxu1  ;;  %v4972_v20 = vmax.f32 %v7360_v1, %v6219_v35  ;;  %v5470_v11 = vpack.c.bf16 %v6220_v22, %v6218_v28  ;;  %v4937_v12 = vmin.f32 %v7362_v5, %v6220_v22  ;;  %v4975_v27 = vmax.f32 %v7364_v63, %v6220_v22 }
 0x22d   : > { %v5985_v6 = vpop.f32.mrb[18].mxu1  ;;  %v4829_v50 = vadd.f32 %v6219_v35, %v4828_v58  ;;  %v4898_v25 = vadd.f32 %v4897_v17, %v4867_v10  ;;  %v6221_v30 = vadd.f32 %v4486_v26, %v7316_v34  ;;  %v4871_v34 = vmul.f32 %v6220_v22, %v6220_v22 }
 0x22e   : > { %v3034_v3 = vpop.f32.mrb[19].mxu1  ;;  %5533 = vst [vmem:[%s7327_s17 + $0x38] sm:$0xff] %v5470_v11  }
 0x22f   : > { %v4899_v7 = vadd.f32 %v4898_v25, %v4868_v19  ;;  %v5465_v31 = vpack.c.bf16 %v6221_v30, %v6219_v35  ;;  %v4830_v39 = vadd.f32 %v6221_v30, %v4829_v50  ;;  %v4869_v32 = vmul.f32 %v6221_v30, %v6221_v30  ;;  %v6176_v59 = vpop.f32.mrb[16].mxu0 }
 0x230   : > { %v4935_v16 = vmin.f32 %v7368_v41, %v6221_v30  ;;  %v4973_v23 = vmax.f32 %v7370_v2, %v6221_v30  ;;  %v6222_v29 = vadd.f32 %v6176_v59, %v5984_v57  ;;  %v4499_v33 = vpop.f32.mrb[17].mxu0 }
 0x231   : > { %5532 = vst [vmem:[%s7327_s17 + $0x30] sm:$0xff] %v5465_v31   ;;  %v4831_v13 = vadd.f32 %v6218_v28, %v4830_v39  ;;  %v4900_v45 = vadd.f32 %v4899_v7, %v4869_v32  ;;  %v6223_v40 = vadd.f32 %v4499_v33, %v3031_v46  ;;  %v6177_v53 = vpop.f32.mrb[18].mxu0 }
 0x232   : > { %v7387_v48 = vmin.f32 %v4936_v15, %v6222_v29  ;;  %v7389_v62 = vmax.f32 %v4974_v8, %v6222_v29  ;;  %v6224_v14 = vadd.f32 %v6177_v53, %v5985_v6  ;;  %v4502_v47 = vpop.f32.mrb[19].mxu0  ;;  %v4874_v52 = vmul.f32 %v6222_v29, %v6222_v29 }
 0x233   : > { %v5988_v44 = vpop.f32.mrb[20].mxu1  ;;  %v4901_v24 = vadd.f32 %v4900_v45, %v4870_v49  ;;  %v4832_v21 = vadd.f32 %v6220_v22, %v4831_v13  ;;  %v4872_v60 = vmul.f32 %v6223_v40, %v6223_v40  ;;  %v7391_v1 = vmin.f32 %v4934_v43, %v6223_v40 }
 0x234   : > { %v3047_v36 = vpop.f32.mrb[21].mxu1  ;;  %v7393_v5 = vmax.f32 %v4972_v20, %v6223_v40  ;;  %v5480_v54 = vpack.c.bf16 %v6224_v14, %v6222_v29  ;;  %v7395_v0 = vmin.f32 %v4937_v12, %v6224_v14  ;;  %v7397_v61 = vmax.f32 %v4975_v27, %v6224_v14 }
 0x235   : > { %v5989_v63 = vpop.f32.mrb[22].mxu1  ;;  %v4833_v42 = vadd.f32 %v6223_v40, %v4832_v21  ;;  %v4902_v9 = vadd.f32 %v4901_v24, %v4871_v34  ;;  %v6225_v18 = vadd.f32 %v4502_v47, %v3034_v3  ;;  %v4875_v26 = vmul.f32 %v6224_v14, %v6224_v14 }
 0x236   : > { %v3050_v51 = vpop.f32.mrb[23].mxu1  ;;  %5535 = vst [vmem:[%s7327_s17 + $0x48] sm:$0xff] %v5480_v54  }
 0x237   : > { %v4903_v4 = vadd.f32 %v4902_v9, %v4872_v60  ;;  %v5475_v41 = vpack.c.bf16 %v6225_v18, %v6223_v40  ;;  %v4834_v2 = vadd.f32 %v6225_v18, %v4833_v42  ;;  %v4873_v28 = vmul.f32 %v6225_v18, %v6225_v18  ;;  %v6180_v56 = vpop.f32.mrb[20].mxu0 }
 0x238   : > { %v7400_v38 = vmin.f32 %v4935_v16, %v6225_v18  ;;  %v7402_v55 = vmax.f32 %v4973_v23, %v6225_v18  ;;  %v6226_v37 = vadd.f32 %v6180_v56, %v5988_v44  ;;  %v4515_v35 = vpop.f32.mrb[21].mxu0 }
 0x239   : > { %5534 = vst [vmem:[%s7327_s17 + $0x40] sm:$0xff] %v5475_v41   ;;  %v4835_v10 = vadd.f32 %v6222_v29, %v4834_v2  ;;  %v4904_v15 = vadd.f32 %v4903_v4, %v4873_v28  ;;  %v6227_v8 = vadd.f32 %v4515_v35, %v3047_v36  ;;  %v6181_v22 = vpop.f32.mrb[22].mxu0 }
 0x23a   : > { %v4944_v57 = vmin.f32 %v7387_v48, %v6226_v37  ;;  %v4982_v17 = vmax.f32 %v7389_v62, %v6226_v37  ;;  %v6228_v58 = vadd.f32 %v6181_v22, %v5989_v63  ;;  %v4518_v19 = vpop.f32.mrb[23].mxu0  ;;  %v4878_v53 = vmul.f32 %v6226_v37, %v6226_v37 }
 0x23b   : > { %v5992_v43 = vpop.f32.mrb[24].mxu1  ;;  %v4905_v46 = vadd.f32 %v4904_v15, %v4874_v52  ;;  %v4836_v20 = vadd.f32 %v6224_v14, %v4835_v10  ;;  %v4876_v11 = vmul.f32 %v6227_v8, %v6227_v8  ;;  %v4942_v12 = vmin.f32 %v7391_v1, %v6227_v8 }
 0x23c   : > { %v3063_v6 = vpop.f32.mrb[25].mxu1  ;;  %v4980_v50 = vmax.f32 %v7393_v5, %v6227_v8  ;;  %v5490_v25 = vpack.c.bf16 %v6228_v58, %v6226_v37  ;;  %v4945_v27 = vmin.f32 %v7395_v0, %v6228_v58  ;;  %v4983_v31 = vmax.f32 %v7397_v61, %v6228_v58 }
 0x23d   : > { %v5993_v30 = vpop.f32.mrb[26].mxu1  ;;  %v4837_v3 = vadd.f32 %v6227_v8, %v4836_v20  ;;  %v4906_v7 = vadd.f32 %v4905_v46, %v4875_v26  ;;  %v6229_v39 = vadd.f32 %v4518_v19, %v3050_v51  ;;  %v4879_v47 = vmul.f32 %v6228_v58, %v6228_v58 }
 0x23e   : > { %v3066_v32 = vpop.f32.mrb[27].mxu1  ;;  %5537 = vst [vmem:[%s7327_s17 + $0x58] sm:$0xff] %v5490_v25  }
 0x23f   : > { %v4907_v59 = vadd.f32 %v4906_v7, %v4876_v11  ;;  %v5485_v16 = vpack.c.bf16 %v6229_v39, %v6227_v8  ;;  %v4838_v23 = vadd.f32 %v6229_v39, %v4837_v3  ;;  %v4877_v29 = vmul.f32 %v6229_v39, %v6229_v39  ;;  %v6184_v33 = vpop.f32.mrb[24].mxu0 }
 0x240   : > { %v4943_v49 = vmin.f32 %v7400_v38, %v6229_v39  ;;  %v4981_v13 = vmax.f32 %v7402_v55, %v6229_v39  ;;  %v6230_v45 = vadd.f32 %v6184_v33, %v5992_v43  ;;  %v4531_v40 = vpop.f32.mrb[25].mxu0 }
 0x241   : > { %5536 = vst [vmem:[%s7327_s17 + $0x50] sm:$0xff] %v5485_v16   ;;  %v4839_v34 = vadd.f32 %v6226_v37, %v4838_v23  ;;  %v4908_v48 = vadd.f32 %v4907_v59, %v4877_v29  ;;  %v6231_v62 = vadd.f32 %v4531_v40, %v3063_v6  ;;  %v6185_v14 = vpop.f32.mrb[26].mxu0 }
 0x242   : > { %v4948_v44 = vmin.f32 %v4944_v57, %v6230_v45  ;;  %v4986_v24 = vmax.f32 %v4982_v17, %v6230_v45  ;;  %v6232_v21 = vadd.f32 %v6185_v14, %v5993_v30  ;;  %v4534_v60 = vpop.f32.mrb[27].mxu0  ;;  %v4882_v22 = vmul.f32 %v6230_v45, %v6230_v45 }
 0x243   : > { %v5996_v1 = vpop.f32.mrb[28].mxu1  ;;  %v4909_v36 = vadd.f32 %v4908_v48, %v4878_v53  ;;  %v4840_v5 = vadd.f32 %v6228_v58, %v4839_v34  ;;  %v4880_v54 = vmul.f32 %v6231_v62, %v6231_v62  ;;  %v4946_v0 = vmin.f32 %v4942_v12, %v6231_v62 }
 0x244   : > { %v3079_v63 = vpop.f32.mrb[29].mxu1  ;;  %v4984_v42 = vmax.f32 %v4980_v50, %v6231_v62  ;;  %v5500_v9 = vpack.c.bf16 %v6232_v21, %v6230_v45  ;;  %v4949_v61 = vmin.f32 %v4945_v27, %v6232_v21  ;;  %v4987_v41 = vmax.f32 %v4983_v31, %v6232_v21 }
 0x245   : > { %v5997_v18 = vpop.f32.mrb[30].mxu1  ;;  %v4841_v51 = vadd.f32 %v6231_v62, %v4840_v5  ;;  %v4910_v4 = vadd.f32 %v4909_v36, %v4879_v47  ;;  %v6233_v2 = vadd.f32 %v4534_v60, %v3066_v32  ;;  %v4883_v19 = vmul.f32 %v6232_v21, %v6232_v21 }
 0x246   : > { %v3082_v28 = vpop.f32.mrb[31].mxu1  ;;  %5539 = vst [vmem:[%s7327_s17 + $0x68] sm:$0xff] %v5500_v9  }
 0x247   : > { %v4911_v56 = vadd.f32 %v4910_v4, %v4880_v54  ;;  %v5495_v38 = vpack.c.bf16 %v6233_v2, %v6231_v62  ;;  %v4842_v55 = vadd.f32 %v6233_v2, %v4841_v51  ;;  %v4881_v37 = vmul.f32 %v6233_v2, %v6233_v2  ;;  %v6188_v35 = vpop.f32.mrb[28].mxu0 }
 0x248   : > { %v4947_v52 = vmin.f32 %v4943_v49, %v6233_v2  ;;  %v4985_v10 = vmax.f32 %v4981_v13, %v6233_v2  ;;  %v6234_v15 = vadd.f32 %v6188_v35, %v5996_v1  ;;  %v4547_v8 = vpop.f32.mrb[29].mxu0 }
 0x249   : > { %5538 = vst [vmem:[%s7327_s17 + $0x60] sm:$0xff] %v5495_v38   ;;  %v4843_v26 = vadd.f32 %v6230_v45, %v4842_v55  ;;  %v4912_v57 = vadd.f32 %v4911_v56, %v4881_v37  ;;  %v6235_v17 = vadd.f32 %v4547_v8, %v3079_v63  ;;  %v6189_v58 = vpop.f32.mrb[30].mxu0 }
 0x24a   : > { %v4952_v43 = vmin.f32 %v4948_v44, %v6234_v15  ;;  %v4990_v46 = vmax.f32 %v4986_v24, %v6234_v15  ;;  %v6236_v20 = vadd.f32 %v6189_v58, %v5997_v18  ;;  %v4550_v11 = vpop.f32.mrb[31].mxu0  ;;  %v4886_v53 = vmul.f32 %v6234_v15, %v6234_v15 }
 0x24b   : > { %v4913_v12 = vadd.f32 %v4912_v57, %v4882_v22  ;;  %v4844_v6 = vadd.f32 %v6232_v21, %v4843_v26  ;;  %v4884_v50 = vmul.f32 %v6235_v17, %v6235_v17  ;;  %v4950_v25 = vmin.f32 %v4946_v0, %v6235_v17 }
 0x24c   : > { %v4988_v27 = vmax.f32 %v4984_v42, %v6235_v17  ;;  %v5510_v30 = vpack.c.bf16 %v6236_v20, %v6234_v15  ;;  %v4953_v3 = vmin.f32 %v4949_v61, %v6236_v20  ;;  %v4991_v39 = vmax.f32 %v4987_v41, %v6236_v20 }
 0x24d   : > { %v4845_v7 = vadd.f32 %v6235_v17, %v4844_v6  ;;  %v4914_v31 = vadd.f32 %v4913_v12, %v4883_v19  ;;  %v6237_v32 = vadd.f32 %v4550_v11, %v3082_v28  ;;  %v4887_v47 = vmul.f32 %v6236_v20, %v6236_v20 }
 0x24e   : > { %5541 = vst [vmem:[%s7327_s17 + $0x78] sm:$0xff] %v5510_v30   ;;  %v4955_v59 = vmin.f32 %v4952_v43, %v4953_v3  ;;  %v4993_v23 = vmax.f32 %v4990_v46, %v4991_v39 }
 0x24f   : > { %v4915_v16 = vadd.f32 %v4914_v31, %v4884_v50  ;;  %v5505_v29 = vpack.c.bf16 %v6237_v32, %v6235_v17  ;;  %v4846_v33 = vadd.f32 %v6237_v32, %v4845_v7  ;;  %v4885_v49 = vmul.f32 %v6237_v32, %v6237_v32 }
 0x250   : > { %v4951_v13 = vmin.f32 %v4947_v52, %v6237_v32  ;;  %v4989_v45 = vmax.f32 %v4985_v10, %v6237_v32 }
 0x251   : > { %5540 = vst [vmem:[%s7327_s17 + $0x70] sm:$0xff] %v5505_v29   ;;  %v4847_v40 = vadd.f32 %v6234_v15, %v4846_v33  ;;  %v4916_v34 = vadd.f32 %v4915_v16, %v4885_v49 }
 0x252   : > { %v4954_v48 = vmin.f32 %v4950_v25, %v4951_v13  ;;  %v4992_v62 = vmax.f32 %v4988_v27, %v4989_v45 }
 0x253   : > { %v4848_v14 = vadd.f32 %v6236_v20, %v4847_v40  ;;  %v4917_v44 = vadd.f32 %v4916_v34, %v4886_v53 }
 0x254   : > { %v4956_v24 = vmin.f32 %v4954_v48, %v4955_v59  ;;  %v4994_v21 = vmax.f32 %v4992_v62, %v4993_v23 }
 0x255   : > { %v4849_v60 = vrot.slane %v4848_v14, 4  ;;  %v4918_v1 = vadd.f32 %v4917_v44, %v4887_v47 }
 0x256   : > { %v4957_v36 = vrot.slane %v4956_v24, 4  ;;  %v4995_v5 = vrot.slane %v4994_v21, 4 }
 0x257   : > { %v4850_v54 = vadd.f32 %v4849_v60, %v4848_v14  ;;  %v4919_v0 = vrot.slane %v4918_v1, 4 }
 0x258   : > { %v4958_v63 = vmin.f32 %v4956_v24, %v4957_v36  ;;  %v4996_v42 = vmax.f32 %v4994_v21, %v4995_v5 }
 0x259   : > { %v4851_v9 = vrot.slane %v4850_v54, 2  ;;  %v4920_v61 = vadd.f32 %v4919_v0, %v4918_v1 }
 0x25a   : > { %v4959_v18 = vrot.slane %v4958_v63, 2  ;;  %v4997_v51 = vrot.slane %v4996_v42, 2 }
 0x25b   : > { %v4852_v4 = vadd.f32 %v4851_v9, %v4850_v54  ;;  %v4921_v41 = vrot.slane %v4920_v61, 2 }
 0x25c   : > { %v4960_v2 = vmin.f32 %v4958_v63, %v4959_v18  ;;  %v4998_v28 = vmax.f32 %v4996_v42, %v4997_v51 }
 0x25d   : > { %v4853_v56 = vrot.slane %v4852_v4, 1  ;;  %v4922_v38 = vadd.f32 %v4921_v41, %v4920_v61 }
 0x25e   : > { %v4961_v55 = vrot.slane %v4960_v2, 1  ;;  %v4999_v37 = vrot.slane %v4998_v28, 1 }
 0x25f   : > { %v4854_v35 = vadd.f32 %v4853_v56, %v4852_v4  ;;  %v4923_v52 = vrot.slane %v4922_v38, 1 }
 0x260   : > { %v4962_v10 = vmin.f32 %v4960_v2, %v4961_v55  ;;  %v5000_v15 = vmax.f32 %v4998_v28, %v4999_v37 }
 0x261   : > { %4855 = vst [vmem:[%s235_s23] sm:$0x1] %v4854_v35  ;;  %v4924_v8 = vadd.f32 %v4923_v52, %v4922_v38 }
 0x262   : > { %4963 = vst [vmem:[%s235_s23 + $0x2] sm:$0x1] %v4962_v10  ;;  %5001 = vst [vmem:[%s235_s23 + $0x3] sm:$0x1] %v5000_v15 }
 0x263   : > { %4925 = vst [vmem:[%s235_s23 + $0x1] sm:$0x1] %v4924_v8 }
 0x264 PF: > { %s16_s18 = sadd.s32 1, %s6591_s18  }
 0x265   : > { %p13_p4 = scmp.ge.s32.totalorder %s16_s18, 4  }
 0x267   :  { %15 = sbr.rel (!%p13_p4) target bundleno = 1 (0x1), region = 93 }

</bundles_post_ra>
